<compile_context>
chip_gen: v7x
topology: tpu7x:2x2x1
jax: 0.10.0
libtpu: 0.0.40
codegen_flags: <defaults>
</compile_context>

<pallas_src>
import functools

import numpy as np

import jax
import jax.numpy as jnp
from jax.experimental import pallas as pl
from jax.experimental.pallas import tpu as pltpu

L = 10
INPUT_DIMS = 3
DEPTHS = [32, 32, 32]
EMB = 2 * INPUT_DIMS * L          # 60 canonical embedding size
EMB_PACK = 16 * L                 # 160 rows in the packed octave-major layout
EPS = 1e-5

# --- per-generation compile-time choices (v7x: 64 MiB VMEM, bf16 VALU on v6e/v7x)
_KIND = jax.devices()[0].device_kind.lower()
_IS_V7 = ("v7" in _KIND) or ("7x" in _KIND) or ("tpu7" in _KIND.replace(" ", ""))
_HAS_BF16_VALU = ("v6" in _KIND) or _IS_V7
MAX_TILE = 4096 if _IS_V7 else 8192
VMEM_LIMIT_BYTES = (40 if _IS_V7 else 64) * 1024 * 1024
ACT_DTYPE = jnp.bfloat16 if _HAS_BF16_VALU else jnp.float32


def _round_up(a, m):
    return (a + m - 1) // m * m


# ---------------------------------------------------------------------------
# Kernel: fused positional encoding + 3 BasicBlocks + fc for one batch tile.
#   nb_ref : (1,)          i32   SMEM scalar-prefetch: true batch size
#   x_ref  : (16, TILE)    f32   rows [x,y,z,0*5, x+.5,y+.5,z+.5, .5*5]
#   w0_ref : (64, 160)     bf16  block-0 conv1 (rows 0:32) + shortcut (rows 32:64),
#                                columns in the packed octave-major PE layout
#   w_ref  : (6, 32, 32)   bf16  [conv2_0, conv1_1, conv2_1, conv1_2, conv2_2, fc(row0)]
#   bn_ref : (32, 16)      f32   cols 2k / 2k+1 = gamma / beta of BN k
#   out_ref: (1, TILE)     f32   lane-dense occupancy values for this tile
# ---------------------------------------------------------------------------
def occnet_kernel(nb_ref, x_ref, w0_ref, w_ref, bn_ref, out_ref, *, act_dtype):
    i = pl.program_id(0)
    tile = out_ref.shape[1]
    remaining = nb_ref[0] - i * tile        # valid points left for this tile

    def compute(use_mask):
        # ---- positional encoding: one sin pass + angle-doubling recurrence --
        # base rows 0:8  = sin(pi*x_d)   (pad rows -> sin(0)      = 0)
        # base rows 8:16 = cos(pi*x_d)   (pad rows -> sin(pi*0.5) = 1)
        x16 = x_ref[...]                                   # (16, tile) f32
        base = jnp.sin(jnp.pi * x16)
        s = base[0:8, :]
        c = base[8:16, :]
        parts = [s, c]
        for _ in range(L - 1):
            # exact double-angle identities; f32 error compounds ~2x/octave,
            # comparable to direct fp32 sin of 2^9*pi*x (both ~1e-4 abs).
            s, c = 2.0 * s * c, (c - s) * (c + s)
            parts += [s, c]
        e = jnp.concatenate(parts, axis=0)                 # (160, tile) f32, 8-aligned pieces
        e = e.astype(jnp.bfloat16)

        if use_mask:
            lane = jax.lax.broadcasted_iota(jnp.int32, (1, tile), 1)
            mask = (lane < remaining).astype(jnp.float32)  # (1, tile)
            inv_n = 1.0 / jnp.sum(mask, axis=1, keepdims=True)   # (1, 1)
        else:
            mask = None
            inv_n = 1.0 / float(tile)

        def bn(y, idx):
            # BatchNorm2d training mode, one-pass batch stats, f32 math.
            g = bn_ref[:, 2 * idx:2 * idx + 1]             # (32, 1)
            b = bn_ref[:, 2 * idx + 1:2 * idx + 2]         # (32, 1)
            ym = y * mask if use_mask else y
            s1 = jnp.sum(ym, axis=1, keepdims=True)        # sum x
            s2 = jnp.sum(ym * y, axis=1, keepdims=True)    # sum x^2 (masked)
            mu = s1 * inv_n
            var = jnp.maximum(s2 * inv_n - mu * mu, 0.0)   # biased variance
            scale = g * jax.lax.rsqrt(var + EPS)
            return (y * scale + (b - mu * scale)).astype(act_dtype)

        def conv(y, widx):
            # 1x1 conv == (32,32) @ (32,tile); bf16 MXU operands, f32 accumulate.
            return jnp.dot(w_ref[widx], y.astype(jnp.bfloat16),
                           preferred_element_type=jnp.float32)

        relu = lambda t: jnp.maximum(t, 0.0)

        # ---- block 0: 60 -> 32, conv+BN shortcut (conv1 & shortcut fused) ---
        pre = jnp.dot(w0_ref[...], e, preferred_element_type=jnp.float32)  # (64, tile)
        h = relu(bn(pre[0:32, :], 0))                      # conv1 -> bn1 -> relu
        h = bn(conv(h, 0), 1)                              # conv2 -> bn2 (gamma=0)
        idn = bn(pre[32:64, :], 2)                         # shortcut conv -> bn
        h = relu(h + idn)

        # ---- block 1: 32 -> 32, identity shortcut ---------------------------
        idn = h
        h = relu(bn(conv(h, 1), 3))
        h = bn(conv(h, 2), 4)
        h = relu(h + idn)

        # ---- block 2: 32 -> 32, identity shortcut ---------------------------
        idn = h
        h = relu(bn(conv(h, 3), 5))
        h = bn(conv(h, 4), 6)
        h = relu(h + idn)

        # ---- fc (32 -> 1) on the idle MXU; row 0 of w_ref[5] is the fc weight
        o = jnp.dot(w_ref[5], h.astype(jnp.bfloat16),
                    preferred_element_type=jnp.float32)    # (32, tile)
        out_ref[...] = o[0:1, :]                           # lane-dense (1, tile)

    # Full tiles skip all masking; only the final partial tile pays for it.
    @pl.when(remaining >= tile)
    def _():
        compute(use_mask=False)

    @pl.when(remaining < tile)
    def _():
        compute(use_mask=True)


# ---------------------------------------------------------------------------
# Wrapper
# ---------------------------------------------------------------------------
@jax.jit
def occupancy_network_forward(x, params):
    w0, w_stack, bn_stack = params
    bs = x.shape[0]

    # Batch tiling: lane tile of up to MAX_TILE points (lane-dense, 128-aligned).
    tile = MAX_TILE if bs >= MAX_TILE else _round_up(bs, 128)
    b_pad = _round_up(bs, tile)
    nt = b_pad // tile

    # Packed input rows: [x, y, z, 0*5, x+.5, y+.5, z+.5, .5*5]
    # (the +0.5 bakes the cos = sin(a + pi/2) phase into the base angle pi*x).
    xt = jnp.transpose(x).astype(jnp.float32)              # (3, bs)
    zeros5 = jnp.zeros((5, bs), jnp.float32)
    x16 = jnp.concatenate([xt, zeros5, xt + 0.5, zeros5 + 0.5], axis=0)  # (16, bs)
    if b_pad != bs:
        x16 = jnp.pad(x16, ((0, 0), (0, b_pad - bs)))      # (16, b_pad)

    nb = jnp.asarray([bs], jnp.int32)                      # scalar prefetch

    kernel = functools.partial(occnet_kernel, act_dtype=ACT_DTYPE)

    cost = pl.CostEstimate(
        flops=int(33000 * b_pad),
        transcendentals=int(16 * b_pad),
        bytes_accessed=int(68 * b_pad + 64 * 1024),
    )

    out = pl.pallas_call(
        kernel,
        out_shape=jax.ShapeDtypeStruct((1, b_pad), jnp.float32),
        grid_spec=pltpu.PrefetchScalarGridSpec(
            num_scalar_prefetch=1,
            grid=(nt,),
            in_specs=[
                pl.BlockSpec((16, tile), lambda i, nb: (0, i)),   # points: walks batch
                pl.BlockSpec(w0.shape, lambda i, nb: (0, 0)),     # resident weights
                pl.BlockSpec(w_stack.shape, lambda i, nb: (0, 0, 0)),
                pl.BlockSpec(bn_stack.shape, lambda i, nb: (0, 0)),
            ],
            out_specs=pl.BlockSpec((1, tile), lambda i, nb: (0, i)),  # single-row output
        ),
        compiler_params=pltpu.CompilerParams(
            dimension_semantics=("parallel",),
            vmem_limit_bytes=VMEM_LIMIT_BYTES),
        cost_estimate=cost,
    )(nb, x16, w0, w_stack, bn_stack)

    xs = out[0, :bs]                                       # (bs,)
    # PyTorch: xs.squeeze() on (B,1,1,1) -> (B,);  returns (xs, x).
    return xs, x


# ---------------------------------------------------------------------------
# Deterministic parameter initialization (mirrors the PyTorch __init__),
# packed into 3 kernel inputs.
# ---------------------------------------------------------------------------
def init_params(key):
    ks = jax.random.split(key, 8)
    d = DEPTHS

    def kaiming(k, cout, cin):
        # kaiming_normal_(mode='fan_out', 'relu'): std = sqrt(2 / fan_out),
        # fan_out = cout * 1 * 1; stored as (O, I) like torch's (O, I, 1, 1).
        std = (2.0 / cout) ** 0.5
        return np.asarray(jax.random.normal(k, (cout, cin), jnp.float32)) * std

    conv1_0 = kaiming(ks[0], d[0], EMB)                    # (32, 60)
    conv2_0 = kaiming(ks[1], d[0], d[0])
    sc_0 = kaiming(ks[2], d[0], EMB)
    conv1_1 = kaiming(ks[3], d[1], d[0])
    conv2_1 = kaiming(ks[4], d[1], d[1])
    conv1_2 = kaiming(ks[5], d[2], d[1])
    conv2_2 = kaiming(ks[6], d[2], d[2])
    fc_w = kaiming(ks[7], 1, d[2])                         # (1, 32)

    # Block-0 fused weight (64, 160): rows [conv1 ; shortcut]; columns follow
    # the packed octave-major embedding layout: for octave j, dim p
    #   sin(2^j * pi * x_p) -> col 16*j + p,  cos(...) -> col 16*j + 8 + p,
    # remapped from the canonical [sin 2^0..2^9, cos 2^0..2^9] per-dim order.
    w0_np = np.zeros((2 * d[0], EMB_PACK), np.float32)
    for p in range(INPUT_DIMS):
        for j in range(L):
            old_sin = 2 * L * p + j
            old_cos = 2 * L * p + L + j
            w0_np[:d[0], 16 * j + p] = conv1_0[:, old_sin]
            w0_np[:d[0], 16 * j + 8 + p] = conv1_0[:, old_cos]
            w0_np[d[0]:, 16 * j + p] = sc_0[:, old_sin]
            w0_np[d[0]:, 16 * j + 8 + p] = sc_0[:, old_cos]
    w0 = jnp.asarray(w0_np).astype(jnp.bfloat16)

    # Conv weight stack (6, 32, 32): 5 convs + fc packed in row 0 of slot 5.
    fc_pad = np.zeros((d[2], d[2]), np.float32)
    fc_pad[0, :] = fc_w[0]
    w_stack = jnp.asarray(
        np.stack([conv2_0, conv1_1, conv2_1, conv1_2, conv2_2, fc_pad])
    ).astype(jnp.bfloat16)

    # BN params packed (32, 16) f32.
    # BN order: bn1_0, bn2_0, bn_sc0, bn1_1, bn2_1, bn1_2, bn2_2
    # (bn2 of every BasicBlock is zero-gamma-initialised, betas all zero).
    gammas = [1.0, 0.0, 1.0, 1.0, 0.0, 1.0, 0.0]
    bn_np = np.zeros((d[0], 16), np.float32)
    for j, g in enumerate(gammas):
        bn_np[:, 2 * j] = g
    bn_stack = jnp.asarray(bn_np)

    return [w0, w_stack, bn_stack]


if __name__ == "__main__":
    key = jax.random.PRNGKey(0)
    kx, kp = jax.random.split(key)

    bs = 8
    x = jax.random.uniform(kx, (bs, INPUT_DIMS), jnp.float32,
                           minval=-1.0, maxval=1.0)
    params = init_params(kp)

    xs, x_out = occupancy_network_forward(x, params)
    jax.block_until_ready(xs)

    assert xs.shape == (bs,), xs.shape
    assert x_out.shape == (bs, INPUT_DIMS), x_out.shape
    assert bool(jnp.all(jnp.isfinite(xs)))
    print("KERNEL_OK")
</pallas_src>

<mosaic_0001>
module attributes {stable_mosaic.version = 11 : i64} {
  func.func @occnet_kernel(%arg0: i32, %arg1: memref<1xi32, #tpu.memory_space<smem>>, %arg2: memref<16x128xf32, #tpu.memory_space<vmem>>, %arg3: memref<64x160xbf16, #tpu.memory_space<vmem>>, %arg4: memref<6x32x32xbf16, #tpu.memory_space<vmem>>, %arg5: memref<32x16xf32, #tpu.memory_space<vmem>>, %arg6: memref<1x128xf32, #tpu.memory_space<vmem>>) attributes {dimension_semantics = [#tpu.dimension_semantics<parallel>], iteration_bounds = array<i64: 1>, scalar_prefetch = 1 : i64, scratch_operands = 0 : i64, tpu.core_type = #tpu.core_type<tc>, window_params = [{transform_indices = @transform_0, window_bounds = array<i64: 16, 128>}, {pipeline_mode = #tpu.pipeline_mode<synchronous>, transform_indices = @transform_1, window_bounds = array<i64: 64, 160>}, {pipeline_mode = #tpu.pipeline_mode<synchronous>, transform_indices = @transform_2, window_bounds = array<i64: 6, 32, 32>}, {pipeline_mode = #tpu.pipeline_mode<synchronous>, transform_indices = @transform_3, window_bounds = array<i64: 32, 16>}, {transform_indices = @transform_4, window_bounds = array<i64: 1, 128>}]} {
    %c0 = arith.constant 0 : index
    %0 = memref.load %arg1[%c0] : memref<1xi32, #tpu.memory_space<smem>>
    %c128_i32 = arith.constant 128 : i32
    %1 = arith.muli %arg0, %c128_i32 : i32
    %2 = arith.subi %0, %1 : i32
    %c128_i32_0 = arith.constant 128 : i32
    %3 = arith.cmpi sge, %2, %c128_i32_0 : i32
    %4 = arith.extui %3 : i1 to i32
    %c0_i32 = arith.constant 0 : i32
    %5 = arith.cmpi ne, %4, %c0_i32 : i32
    scf.if %5 {
      %c0_3 = arith.constant 0 : index
      %c0_4 = arith.constant 0 : index
      %9 = vector.load %arg2[%c0_3, %c0_4] : memref<16x128xf32, #tpu.memory_space<vmem>>, vector<16x128xf32>
      %cst = arith.constant 3.14159274 : f32
      %10 = vector.broadcast %cst : f32 to vector<16x128xf32>
      %11 = arith.mulf %10, %9 : vector<16x128xf32>
      %12 = math.sin %11 : vector<16x128xf32>
      %13 = vector.extract_strided_slice %12 {offsets = [0, 0], sizes = [8, 128], strides = [1, 1]} : vector<16x128xf32> to vector<8x128xf32>
      %14 = vector.extract_strided_slice %12 {offsets = [8, 0], sizes = [8, 128], strides = [1, 1]} : vector<16x128xf32> to vector<8x128xf32>
      %cst_5 = arith.constant 2.000000e+00 : f32
      %15 = vector.broadcast %cst_5 : f32 to vector<8x128xf32>
      %16 = arith.mulf %15, %13 : vector<8x128xf32>
      %17 = arith.mulf %16, %14 : vector<8x128xf32>
      %18 = arith.subf %14, %13 : vector<8x128xf32>
      %19 = arith.addf %14, %13 : vector<8x128xf32>
      %20 = arith.mulf %18, %19 : vector<8x128xf32>
      %cst_6 = arith.constant 2.000000e+00 : f32
      %21 = vector.broadcast %cst_6 : f32 to vector<8x128xf32>
      %22 = arith.mulf %21, %17 : vector<8x128xf32>
      %23 = arith.mulf %22, %20 : vector<8x128xf32>
      %24 = arith.subf %20, %17 : vector<8x128xf32>
      %25 = arith.addf %20, %17 : vector<8x128xf32>
      %26 = arith.mulf %24, %25 : vector<8x128xf32>
      %cst_7 = arith.constant 2.000000e+00 : f32
      %27 = vector.broadcast %cst_7 : f32 to vector<8x128xf32>
      %28 = arith.mulf %27, %23 : vector<8x128xf32>
      %29 = arith.mulf %28, %26 : vector<8x128xf32>
      %30 = arith.subf %26, %23 : vector<8x128xf32>
      %31 = arith.addf %26, %23 : vector<8x128xf32>
      %32 = arith.mulf %30, %31 : vector<8x128xf32>
      %cst_8 = arith.constant 2.000000e+00 : f32
      %33 = vector.broadcast %cst_8 : f32 to vector<8x128xf32>
      %34 = arith.mulf %33, %29 : vector<8x128xf32>
      %35 = arith.mulf %34, %32 : vector<8x128xf32>
      %36 = arith.subf %32, %29 : vector<8x128xf32>
      %37 = arith.addf %32, %29 : vector<8x128xf32>
      %38 = arith.mulf %36, %37 : vector<8x128xf32>
      %cst_9 = arith.constant 2.000000e+00 : f32
      %39 = vector.broadcast %cst_9 : f32 to vector<8x128xf32>
      %40 = arith.mulf %39, %35 : vector<8x128xf32>
      %41 = arith.mulf %40, %38 : vector<8x128xf32>
      %42 = arith.subf %38, %35 : vector<8x128xf32>
      %43 = arith.addf %38, %35 : vector<8x128xf32>
      %44 = arith.mulf %42, %43 : vector<8x128xf32>
      %cst_10 = arith.constant 2.000000e+00 : f32
      %45 = vector.broadcast %cst_10 : f32 to vector<8x128xf32>
      %46 = arith.mulf %45, %41 : vector<8x128xf32>
      %47 = arith.mulf %46, %44 : vector<8x128xf32>
      %48 = arith.subf %44, %41 : vector<8x128xf32>
      %49 = arith.addf %44, %41 : vector<8x128xf32>
      %50 = arith.mulf %48, %49 : vector<8x128xf32>
      %cst_11 = arith.constant 2.000000e+00 : f32
      %51 = vector.broadcast %cst_11 : f32 to vector<8x128xf32>
      %52 = arith.mulf %51, %47 : vector<8x128xf32>
      %53 = arith.mulf %52, %50 : vector<8x128xf32>
      %54 = arith.subf %50, %47 : vector<8x128xf32>
      %55 = arith.addf %50, %47 : vector<8x128xf32>
      %56 = arith.mulf %54, %55 : vector<8x128xf32>
      %cst_12 = arith.constant 2.000000e+00 : f32
      %57 = vector.broadcast %cst_12 : f32 to vector<8x128xf32>
      %58 = arith.mulf %57, %53 : vector<8x128xf32>
      %59 = arith.mulf %58, %56 : vector<8x128xf32>
      %60 = arith.subf %56, %53 : vector<8x128xf32>
      %61 = arith.addf %56, %53 : vector<8x128xf32>
      %62 = arith.mulf %60, %61 : vector<8x128xf32>
      %cst_13 = arith.constant 2.000000e+00 : f32
      %63 = vector.broadcast %cst_13 : f32 to vector<8x128xf32>
      %64 = arith.mulf %63, %59 : vector<8x128xf32>
      %65 = arith.mulf %64, %62 : vector<8x128xf32>
      %66 = arith.subf %62, %59 : vector<8x128xf32>
      %67 = arith.addf %62, %59 : vector<8x128xf32>
      %68 = arith.mulf %66, %67 : vector<8x128xf32>
      %69 = tpu.concatenate %13, %14, %17, %20, %23, %26, %29, %32, %35, %38, %41, %44, %47, %50, %53, %56 in 0 : vector<8x128xf32>, vector<8x128xf32>, vector<8x128xf32>, vector<8x128xf32>, vector<8x128xf32>, vector<8x128xf32>, vector<8x128xf32>, vector<8x128xf32>, vector<8x128xf32>, vector<8x128xf32>, vector<8x128xf32>, vector<8x128xf32>, vector<8x128xf32>, vector<8x128xf32>, vector<8x128xf32>, vector<8x128xf32> -> vector<128x128xf32>
      %70 = tpu.concatenate %59, %62, %65, %68 in 0 : vector<8x128xf32>, vector<8x128xf32>, vector<8x128xf32>, vector<8x128xf32> -> vector<32x128xf32>
      %71 = tpu.concatenate %69, %70 in 0 : vector<128x128xf32>, vector<32x128xf32> -> vector<160x128xf32>
      %72 = arith.truncf %71 : vector<160x128xf32> to vector<160x128xbf16>
      %c0_14 = arith.constant 0 : index
      %c0_15 = arith.constant 0 : index
      %73 = vector.load %arg3[%c0_14, %c0_15] : memref<64x160xbf16, #tpu.memory_space<vmem>>, vector<64x160xbf16>
      %cst_16 = arith.constant dense<0.000000e+00> : vector<64x128xf32>
      %74 = tpu.matmul %73, %72, %cst_16 {dimension_numbers = #tpu.dot_dimension_numbers<[1], [0], [0], [1], [0, 0, 1, 1], [], []>} : vector<64x160xbf16>, vector<160x128xbf16>, vector<64x128xf32> -> vector<64x128xf32>
      %75 = vector.extract_strided_slice %74 {offsets = [0, 0], sizes = [32, 128], strides = [1, 1]} : vector<64x128xf32> to vector<32x128xf32>
      %c0_17 = arith.constant 0 : index
      %c0_18 = arith.constant 0 : index
      %76 = vector.load %arg5[%c0_17, %c0_18] : memref<32x16xf32, #tpu.memory_space<vmem>>, vector<32x1xf32>
      %c0_19 = arith.constant 0 : index
      %c1 = arith.constant 1 : index
      %77 = vector.load %arg5[%c0_19, %c1] : memref<32x16xf32, #tpu.memory_space<vmem>>, vector<32x1xf32>
      %cst_20 = arith.constant dense<0.000000e+00> : vector<32xf32>
      %78 = vector.multi_reduction <add>, %75, %cst_20 [1] : vector<32x128xf32> to vector<32xf32>
      %79 = vector.shape_cast %78 : vector<32xf32> to vector<32x1xf32>
      %80 = arith.mulf %75, %75 : vector<32x128xf32>
      %cst_21 = arith.constant dense<0.000000e+00> : vector<32xf32>
      %81 = vector.multi_reduction <add>, %80, %cst_21 [1] : vector<32x128xf32> to vector<32xf32>
      %82 = vector.shape_cast %81 : vector<32xf32> to vector<32x1xf32>
      %cst_22 = arith.constant 7.812500e-03 : f32
      %83 = vector.broadcast %cst_22 : f32 to vector<32x1xf32>
      %84 = arith.mulf %79, %83 : vector<32x1xf32>
      %cst_23 = arith.constant 7.812500e-03 : f32
      %85 = vector.broadcast %cst_23 : f32 to vector<32x1xf32>
      %86 = arith.mulf %82, %85 : vector<32x1xf32>
      %87 = arith.mulf %84, %84 : vector<32x1xf32>
      %88 = arith.subf %86, %87 : vector<32x1xf32>
      %cst_24 = arith.constant 0.000000e+00 : f32
      %89 = vector.broadcast %cst_24 : f32 to vector<32x1xf32>
      %90 = arith.maximumf %88, %89 : vector<32x1xf32>
      %cst_25 = arith.constant 9.99999974E-6 : f32
      %91 = vector.broadcast %cst_25 : f32 to vector<32x1xf32>
      %92 = arith.addf %90, %91 : vector<32x1xf32>
      %93 = math.rsqrt %92 : vector<32x1xf32>
      %94 = arith.mulf %76, %93 : vector<32x1xf32>
      %95 = vector.broadcast %94 : vector<32x1xf32> to vector<32x128xf32>
      %96 = arith.mulf %75, %95 : vector<32x128xf32>
      %97 = arith.mulf %84, %94 : vector<32x1xf32>
      %98 = arith.subf %77, %97 : vector<32x1xf32>
      %99 = vector.broadcast %98 : vector<32x1xf32> to vector<32x128xf32>
      %100 = arith.addf %96, %99 : vector<32x128xf32>
      %cst_26 = arith.constant 0.000000e+00 : f32
      %101 = vector.broadcast %cst_26 : f32 to vector<32x128xf32>
      %102 = arith.maximumf %100, %101 : vector<32x128xf32>
      %c0_27 = arith.constant 0 : index
      %c0_28 = arith.constant 0 : index
      %c0_29 = arith.constant 0 : index
      %103 = vector.load %arg4[%c0_27, %c0_28, %c0_29] : memref<6x32x32xbf16, #tpu.memory_space<vmem>>, vector<1x32x32xbf16>
      %104 = vector.shape_cast %103 : vector<1x32x32xbf16> to vector<32x32xbf16>
      %105 = arith.truncf %102 : vector<32x128xf32> to vector<32x128xbf16>
      %cst_30 = arith.constant dense<0.000000e+00> : vector<32x128xf32>
      %106 = tpu.matmul %104, %105, %cst_30 {dimension_numbers = #tpu.dot_dimension_numbers<[1], [0], [0], [1], [0, 0, 1, 1], [], []>} : vector<32x32xbf16>, vector<32x128xbf16>, vector<32x128xf32> -> vector<32x128xf32>
      %c0_31 = arith.constant 0 : index
      %c2 = arith.constant 2 : index
      %107 = vector.load %arg5[%c0_31, %c2] : memref<32x16xf32, #tpu.memory_space<vmem>>, vector<32x1xf32>
      %c0_32 = arith.constant 0 : index
      %c3 = arith.constant 3 : index
      %108 = vector.load %arg5[%c0_32, %c3] : memref<32x16xf32, #tpu.memory_space<vmem>>, vector<32x1xf32>
      %cst_33 = arith.constant dense<0.000000e+00> : vector<32xf32>
      %109 = vector.multi_reduction <add>, %106, %cst_33 [1] : vector<32x128xf32> to vector<32xf32>
      %110 = vector.shape_cast %109 : vector<32xf32> to vector<32x1xf32>
      %111 = arith.mulf %106, %106 : vector<32x128xf32>
      %cst_34 = arith.constant dense<0.000000e+00> : vector<32xf32>
      %112 = vector.multi_reduction <add>, %111, %cst_34 [1] : vector<32x128xf32> to vector<32xf32>
      %113 = vector.shape_cast %112 : vector<32xf32> to vector<32x1xf32>
      %cst_35 = arith.constant 7.812500e-03 : f32
      %114 = vector.broadcast %cst_35 : f32 to vector<32x1xf32>
      %115 = arith.mulf %110, %114 : vector<32x1xf32>
      %cst_36 = arith.constant 7.812500e-03 : f32
      %116 = vector.broadcast %cst_36 : f32 to vector<32x1xf32>
      %117 = arith.mulf %113, %116 : vector<32x1xf32>
      %118 = arith.mulf %115, %115 : vector<32x1xf32>
      %119 = arith.subf %117, %118 : vector<32x1xf32>
      %cst_37 = arith.constant 0.000000e+00 : f32
      %120 = vector.broadcast %cst_37 : f32 to vector<32x1xf32>
      %121 = arith.maximumf %119, %120 : vector<32x1xf32>
      %cst_38 = arith.constant 9.99999974E-6 : f32
      %122 = vector.broadcast %cst_38 : f32 to vector<32x1xf32>
      %123 = arith.addf %121, %122 : vector<32x1xf32>
      %124 = math.rsqrt %123 : vector<32x1xf32>
      %125 = arith.mulf %107, %124 : vector<32x1xf32>
      %126 = vector.broadcast %125 : vector<32x1xf32> to vector<32x128xf32>
      %127 = arith.mulf %106, %126 : vector<32x128xf32>
      %128 = arith.mulf %115, %125 : vector<32x1xf32>
      %129 = arith.subf %108, %128 : vector<32x1xf32>
      %130 = vector.broadcast %129 : vector<32x1xf32> to vector<32x128xf32>
      %131 = arith.addf %127, %130 : vector<32x128xf32>
      %132 = vector.extract_strided_slice %74 {offsets = [32, 0], sizes = [32, 128], strides = [1, 1]} : vector<64x128xf32> to vector<32x128xf32>
      %c0_39 = arith.constant 0 : index
      %c4 = arith.constant 4 : index
      %133 = vector.load %arg5[%c0_39, %c4] : memref<32x16xf32, #tpu.memory_space<vmem>>, vector<32x1xf32>
      %c0_40 = arith.constant 0 : index
      %c5 = arith.constant 5 : index
      %134 = vector.load %arg5[%c0_40, %c5] : memref<32x16xf32, #tpu.memory_space<vmem>>, vector<32x1xf32>
      %cst_41 = arith.constant dense<0.000000e+00> : vector<32xf32>
      %135 = vector.multi_reduction <add>, %132, %cst_41 [1] : vector<32x128xf32> to vector<32xf32>
      %136 = vector.shape_cast %135 : vector<32xf32> to vector<32x1xf32>
      %137 = arith.mulf %132, %132 : vector<32x128xf32>
      %cst_42 = arith.constant dense<0.000000e+00> : vector<32xf32>
      %138 = vector.multi_reduction <add>, %137, %cst_42 [1] : vector<32x128xf32> to vector<32xf32>
      %139 = vector.shape_cast %138 : vector<32xf32> to vector<32x1xf32>
      %cst_43 = arith.constant 7.812500e-03 : f32
      %140 = vector.broadcast %cst_43 : f32 to vector<32x1xf32>
      %141 = arith.mulf %136, %140 : vector<32x1xf32>
      %cst_44 = arith.constant 7.812500e-03 : f32
      %142 = vector.broadcast %cst_44 : f32 to vector<32x1xf32>
      %143 = arith.mulf %139, %142 : vector<32x1xf32>
      %144 = arith.mulf %141, %141 : vector<32x1xf32>
      %145 = arith.subf %143, %144 : vector<32x1xf32>
      %cst_45 = arith.constant 0.000000e+00 : f32
      %146 = vector.broadcast %cst_45 : f32 to vector<32x1xf32>
      %147 = arith.maximumf %145, %146 : vector<32x1xf32>
      %cst_46 = arith.constant 9.99999974E-6 : f32
      %148 = vector.broadcast %cst_46 : f32 to vector<32x1xf32>
      %149 = arith.addf %147, %148 : vector<32x1xf32>
      %150 = math.rsqrt %149 : vector<32x1xf32>
      %151 = arith.mulf %133, %150 : vector<32x1xf32>
      %152 = vector.broadcast %151 : vector<32x1xf32> to vector<32x128xf32>
      %153 = arith.mulf %132, %152 : vector<32x128xf32>
      %154 = arith.mulf %141, %151 : vector<32x1xf32>
      %155 = arith.subf %134, %154 : vector<32x1xf32>
      %156 = vector.broadcast %155 : vector<32x1xf32> to vector<32x128xf32>
      %157 = arith.addf %153, %156 : vector<32x128xf32>
      %158 = arith.addf %131, %157 : vector<32x128xf32>
      %cst_47 = arith.constant 0.000000e+00 : f32
      %159 = vector.broadcast %cst_47 : f32 to vector<32x128xf32>
      %160 = arith.maximumf %158, %159 : vector<32x128xf32>
      %c1_48 = arith.constant 1 : index
      %c0_49 = arith.constant 0 : index
      %c0_50 = arith.constant 0 : index
      %161 = vector.load %arg4[%c1_48, %c0_49, %c0_50] : memref<6x32x32xbf16, #tpu.memory_space<vmem>>, vector<1x32x32xbf16>
      %162 = vector.shape_cast %161 : vector<1x32x32xbf16> to vector<32x32xbf16>
      %163 = arith.truncf %160 : vector<32x128xf32> to vector<32x128xbf16>
      %cst_51 = arith.constant dense<0.000000e+00> : vector<32x128xf32>
      %164 = tpu.matmul %162, %163, %cst_51 {dimension_numbers = #tpu.dot_dimension_numbers<[1], [0], [0], [1], [0, 0, 1, 1], [], []>} : vector<32x32xbf16>, vector<32x128xbf16>, vector<32x128xf32> -> vector<32x128xf32>
      %c0_52 = arith.constant 0 : index
      %c6 = arith.constant 6 : index
      %165 = vector.load %arg5[%c0_52, %c6] : memref<32x16xf32, #tpu.memory_space<vmem>>, vector<32x1xf32>
      %c0_53 = arith.constant 0 : index
      %c7 = arith.constant 7 : index
      %166 = vector.load %arg5[%c0_53, %c7] : memref<32x16xf32, #tpu.memory_space<vmem>>, vector<32x1xf32>
      %cst_54 = arith.constant dense<0.000000e+00> : vector<32xf32>
      %167 = vector.multi_reduction <add>, %164, %cst_54 [1] : vector<32x128xf32> to vector<32xf32>
      %168 = vector.shape_cast %167 : vector<32xf32> to vector<32x1xf32>
      %169 = arith.mulf %164, %164 : vector<32x128xf32>
      %cst_55 = arith.constant dense<0.000000e+00> : vector<32xf32>
      %170 = vector.multi_reduction <add>, %169, %cst_55 [1] : vector<32x128xf32> to vector<32xf32>
      %171 = vector.shape_cast %170 : vector<32xf32> to vector<32x1xf32>
      %cst_56 = arith.constant 7.812500e-03 : f32
      %172 = vector.broadcast %cst_56 : f32 to vector<32x1xf32>
      %173 = arith.mulf %168, %172 : vector<32x1xf32>
      %cst_57 = arith.constant 7.812500e-03 : f32
      %174 = vector.broadcast %cst_57 : f32 to vector<32x1xf32>
      %175 = arith.mulf %171, %174 : vector<32x1xf32>
      %176 = arith.mulf %173, %173 : vector<32x1xf32>
      %177 = arith.subf %175, %176 : vector<32x1xf32>
      %cst_58 = arith.constant 0.000000e+00 : f32
      %178 = vector.broadcast %cst_58 : f32 to vector<32x1xf32>
      %179 = arith.maximumf %177, %178 : vector<32x1xf32>
      %cst_59 = arith.constant 9.99999974E-6 : f32
      %180 = vector.broadcast %cst_59 : f32 to vector<32x1xf32>
      %181 = arith.addf %179, %180 : vector<32x1xf32>
      %182 = math.rsqrt %181 : vector<32x1xf32>
      %183 = arith.mulf %165, %182 : vector<32x1xf32>
      %184 = vector.broadcast %183 : vector<32x1xf32> to vector<32x128xf32>
      %185 = arith.mulf %164, %184 : vector<32x128xf32>
      %186 = arith.mulf %173, %183 : vector<32x1xf32>
      %187 = arith.subf %166, %186 : vector<32x1xf32>
      %188 = vector.broadcast %187 : vector<32x1xf32> to vector<32x128xf32>
      %189 = arith.addf %185, %188 : vector<32x128xf32>
      %cst_60 = arith.constant 0.000000e+00 : f32
      %190 = vector.broadcast %cst_60 : f32 to vector<32x128xf32>
      %191 = arith.maximumf %189, %190 : vector<32x128xf32>
      %c2_61 = arith.constant 2 : index
      %c0_62 = arith.constant 0 : index
      %c0_63 = arith.constant 0 : index
      %192 = vector.load %arg4[%c2_61, %c0_62, %c0_63] : memref<6x32x32xbf16, #tpu.memory_space<vmem>>, vector<1x32x32xbf16>
      %193 = vector.shape_cast %192 : vector<1x32x32xbf16> to vector<32x32xbf16>
      %194 = arith.truncf %191 : vector<32x128xf32> to vector<32x128xbf16>
      %cst_64 = arith.constant dense<0.000000e+00> : vector<32x128xf32>
      %195 = tpu.matmul %193, %194, %cst_64 {dimension_numbers = #tpu.dot_dimension_numbers<[1], [0], [0], [1], [0, 0, 1, 1], [], []>} : vector<32x32xbf16>, vector<32x128xbf16>, vector<32x128xf32> -> vector<32x128xf32>
      %c0_65 = arith.constant 0 : index
      %c8 = arith.constant 8 : index
      %196 = vector.load %arg5[%c0_65, %c8] : memref<32x16xf32, #tpu.memory_space<vmem>>, vector<32x1xf32>
      %c0_66 = arith.constant 0 : index
      %c9 = arith.constant 9 : index
      %197 = vector.load %arg5[%c0_66, %c9] : memref<32x16xf32, #tpu.memory_space<vmem>>, vector<32x1xf32>
      %cst_67 = arith.constant dense<0.000000e+00> : vector<32xf32>
      %198 = vector.multi_reduction <add>, %195, %cst_67 [1] : vector<32x128xf32> to vector<32xf32>
      %199 = vector.shape_cast %198 : vector<32xf32> to vector<32x1xf32>
      %200 = arith.mulf %195, %195 : vector<32x128xf32>
      %cst_68 = arith.constant dense<0.000000e+00> : vector<32xf32>
      %201 = vector.multi_reduction <add>, %200, %cst_68 [1] : vector<32x128xf32> to vector<32xf32>
      %202 = vector.shape_cast %201 : vector<32xf32> to vector<32x1xf32>
      %cst_69 = arith.constant 7.812500e-03 : f32
      %203 = vector.broadcast %cst_69 : f32 to vector<32x1xf32>
      %204 = arith.mulf %199, %203 : vector<32x1xf32>
      %cst_70 = arith.constant 7.812500e-03 : f32
      %205 = vector.broadcast %cst_70 : f32 to vector<32x1xf32>
      %206 = arith.mulf %202, %205 : vector<32x1xf32>
      %207 = arith.mulf %204, %204 : vector<32x1xf32>
      %208 = arith.subf %206, %207 : vector<32x1xf32>
      %cst_71 = arith.constant 0.000000e+00 : f32
      %209 = vector.broadcast %cst_71 : f32 to vector<32x1xf32>
      %210 = arith.maximumf %208, %209 : vector<32x1xf32>
      %cst_72 = arith.constant 9.99999974E-6 : f32
      %211 = vector.broadcast %cst_72 : f32 to vector<32x1xf32>
      %212 = arith.addf %210, %211 : vector<32x1xf32>
      %213 = math.rsqrt %212 : vector<32x1xf32>
      %214 = arith.mulf %196, %213 : vector<32x1xf32>
      %215 = vector.broadcast %214 : vector<32x1xf32> to vector<32x128xf32>
      %216 = arith.mulf %195, %215 : vector<32x128xf32>
      %217 = arith.mulf %204, %214 : vector<32x1xf32>
      %218 = arith.subf %197, %217 : vector<32x1xf32>
      %219 = vector.broadcast %218 : vector<32x1xf32> to vector<32x128xf32>
      %220 = arith.addf %216, %219 : vector<32x128xf32>
      %221 = arith.addf %220, %160 : vector<32x128xf32>
      %cst_73 = arith.constant 0.000000e+00 : f32
      %222 = vector.broadcast %cst_73 : f32 to vector<32x128xf32>
      %223 = arith.maximumf %221, %222 : vector<32x128xf32>
      %c3_74 = arith.constant 3 : index
      %c0_75 = arith.constant 0 : index
      %c0_76 = arith.constant 0 : index
      %224 = vector.load %arg4[%c3_74, %c0_75, %c0_76] : memref<6x32x32xbf16, #tpu.memory_space<vmem>>, vector<1x32x32xbf16>
      %225 = vector.shape_cast %224 : vector<1x32x32xbf16> to vector<32x32xbf16>
      %226 = arith.truncf %223 : vector<32x128xf32> to vector<32x128xbf16>
      %cst_77 = arith.constant dense<0.000000e+00> : vector<32x128xf32>
      %227 = tpu.matmul %225, %226, %cst_77 {dimension_numbers = #tpu.dot_dimension_numbers<[1], [0], [0], [1], [0, 0, 1, 1], [], []>} : vector<32x32xbf16>, vector<32x128xbf16>, vector<32x128xf32> -> vector<32x128xf32>
      %c0_78 = arith.constant 0 : index
      %c10 = arith.constant 10 : index
      %228 = vector.load %arg5[%c0_78, %c10] : memref<32x16xf32, #tpu.memory_space<vmem>>, vector<32x1xf32>
      %c0_79 = arith.constant 0 : index
      %c11 = arith.constant 11 : index
      %229 = vector.load %arg5[%c0_79, %c11] : memref<32x16xf32, #tpu.memory_space<vmem>>, vector<32x1xf32>
      %cst_80 = arith.constant dense<0.000000e+00> : vector<32xf32>
      %230 = vector.multi_reduction <add>, %227, %cst_80 [1] : vector<32x128xf32> to vector<32xf32>
      %231 = vector.shape_cast %230 : vector<32xf32> to vector<32x1xf32>
      %232 = arith.mulf %227, %227 : vector<32x128xf32>
      %cst_81 = arith.constant dense<0.000000e+00> : vector<32xf32>
      %233 = vector.multi_reduction <add>, %232, %cst_81 [1] : vector<32x128xf32> to vector<32xf32>
      %234 = vector.shape_cast %233 : vector<32xf32> to vector<32x1xf32>
      %cst_82 = arith.constant 7.812500e-03 : f32
      %235 = vector.broadcast %cst_82 : f32 to vector<32x1xf32>
      %236 = arith.mulf %231, %235 : vector<32x1xf32>
      %cst_83 = arith.constant 7.812500e-03 : f32
      %237 = vector.broadcast %cst_83 : f32 to vector<32x1xf32>
      %238 = arith.mulf %234, %237 : vector<32x1xf32>
      %239 = arith.mulf %236, %236 : vector<32x1xf32>
      %240 = arith.subf %238, %239 : vector<32x1xf32>
      %cst_84 = arith.constant 0.000000e+00 : f32
      %241 = vector.broadcast %cst_84 : f32 to vector<32x1xf32>
      %242 = arith.maximumf %240, %241 : vector<32x1xf32>
      %cst_85 = arith.constant 9.99999974E-6 : f32
      %243 = vector.broadcast %cst_85 : f32 to vector<32x1xf32>
      %244 = arith.addf %242, %243 : vector<32x1xf32>
      %245 = math.rsqrt %244 : vector<32x1xf32>
      %246 = arith.mulf %228, %245 : vector<32x1xf32>
      %247 = vector.broadcast %246 : vector<32x1xf32> to vector<32x128xf32>
      %248 = arith.mulf %227, %247 : vector<32x128xf32>
      %249 = arith.mulf %236, %246 : vector<32x1xf32>
      %250 = arith.subf %229, %249 : vector<32x1xf32>
      %251 = vector.broadcast %250 : vector<32x1xf32> to vector<32x128xf32>
      %252 = arith.addf %248, %251 : vector<32x128xf32>
      %cst_86 = arith.constant 0.000000e+00 : f32
      %253 = vector.broadcast %cst_86 : f32 to vector<32x128xf32>
      %254 = arith.maximumf %252, %253 : vector<32x128xf32>
      %c4_87 = arith.constant 4 : index
      %c0_88 = arith.constant 0 : index
      %c0_89 = arith.constant 0 : index
      %255 = vector.load %arg4[%c4_87, %c0_88, %c0_89] : memref<6x32x32xbf16, #tpu.memory_space<vmem>>, vector<1x32x32xbf16>
      %256 = vector.shape_cast %255 : vector<1x32x32xbf16> to vector<32x32xbf16>
      %257 = arith.truncf %254 : vector<32x128xf32> to vector<32x128xbf16>
      %cst_90 = arith.constant dense<0.000000e+00> : vector<32x128xf32>
      %258 = tpu.matmul %256, %257, %cst_90 {dimension_numbers = #tpu.dot_dimension_numbers<[1], [0], [0], [1], [0, 0, 1, 1], [], []>} : vector<32x32xbf16>, vector<32x128xbf16>, vector<32x128xf32> -> vector<32x128xf32>
      %c0_91 = arith.constant 0 : index
      %c12 = arith.constant 12 : index
      %259 = vector.load %arg5[%c0_91, %c12] : memref<32x16xf32, #tpu.memory_space<vmem>>, vector<32x1xf32>
      %c0_92 = arith.constant 0 : index
      %c13 = arith.constant 13 : index
      %260 = vector.load %arg5[%c0_92, %c13] : memref<32x16xf32, #tpu.memory_space<vmem>>, vector<32x1xf32>
      %cst_93 = arith.constant dense<0.000000e+00> : vector<32xf32>
      %261 = vector.multi_reduction <add>, %258, %cst_93 [1] : vector<32x128xf32> to vector<32xf32>
      %262 = vector.shape_cast %261 : vector<32xf32> to vector<32x1xf32>
      %263 = arith.mulf %258, %258 : vector<32x128xf32>
      %cst_94 = arith.constant dense<0.000000e+00> : vector<32xf32>
      %264 = vector.multi_reduction <add>, %263, %cst_94 [1] : vector<32x128xf32> to vector<32xf32>
      %265 = vector.shape_cast %264 : vector<32xf32> to vector<32x1xf32>
      %cst_95 = arith.constant 7.812500e-03 : f32
      %266 = vector.broadcast %cst_95 : f32 to vector<32x1xf32>
      %267 = arith.mulf %262, %266 : vector<32x1xf32>
      %cst_96 = arith.constant 7.812500e-03 : f32
      %268 = vector.broadcast %cst_96 : f32 to vector<32x1xf32>
      %269 = arith.mulf %265, %268 : vector<32x1xf32>
      %270 = arith.mulf %267, %267 : vector<32x1xf32>
      %271 = arith.subf %269, %270 : vector<32x1xf32>
      %cst_97 = arith.constant 0.000000e+00 : f32
      %272 = vector.broadcast %cst_97 : f32 to vector<32x1xf32>
      %273 = arith.maximumf %271, %272 : vector<32x1xf32>
      %cst_98 = arith.constant 9.99999974E-6 : f32
      %274 = vector.broadcast %cst_98 : f32 to vector<32x1xf32>
      %275 = arith.addf %273, %274 : vector<32x1xf32>
      %276 = math.rsqrt %275 : vector<32x1xf32>
      %277 = arith.mulf %259, %276 : vector<32x1xf32>
      %278 = vector.broadcast %277 : vector<32x1xf32> to vector<32x128xf32>
      %279 = arith.mulf %258, %278 : vector<32x128xf32>
      %280 = arith.mulf %267, %277 : vector<32x1xf32>
      %281 = arith.subf %260, %280 : vector<32x1xf32>
      %282 = vector.broadcast %281 : vector<32x1xf32> to vector<32x128xf32>
      %283 = arith.addf %279, %282 : vector<32x128xf32>
      %284 = arith.addf %283, %223 : vector<32x128xf32>
      %cst_99 = arith.constant 0.000000e+00 : f32
      %285 = vector.broadcast %cst_99 : f32 to vector<32x128xf32>
      %286 = arith.maximumf %284, %285 : vector<32x128xf32>
      %c5_100 = arith.constant 5 : index
      %c0_101 = arith.constant 0 : index
      %c0_102 = arith.constant 0 : index
      %287 = vector.load %arg4[%c5_100, %c0_101, %c0_102] : memref<6x32x32xbf16, #tpu.memory_space<vmem>>, vector<1x32x32xbf16>
      %288 = vector.shape_cast %287 : vector<1x32x32xbf16> to vector<32x32xbf16>
      %289 = arith.truncf %286 : vector<32x128xf32> to vector<32x128xbf16>
      %cst_103 = arith.constant dense<0.000000e+00> : vector<32x128xf32>
      %290 = tpu.matmul %288, %289, %cst_103 {dimension_numbers = #tpu.dot_dimension_numbers<[1], [0], [0], [1], [0, 0, 1, 1], [], []>} : vector<32x32xbf16>, vector<32x128xbf16>, vector<32x128xf32> -> vector<32x128xf32>
      %291 = vector.extract_strided_slice %290 {offsets = [0, 0], sizes = [1, 128], strides = [1, 1]} : vector<32x128xf32> to vector<1x128xf32>
      %c0_104 = arith.constant 0 : index
      %c0_105 = arith.constant 0 : index
      %292 = vector.load %arg6[%c0_104, %c0_105] : memref<1x128xf32, #tpu.memory_space<vmem>>, vector<1x128xf32>
      tpu.vector_store %arg6[%c0_104, %c0_105], %291 {strides = array<i32>} : memref<1x128xf32, #tpu.memory_space<vmem>>, vector<1x128xf32>,
    } else {
    }
    %c128_i32_1 = arith.constant 128 : i32
    %6 = arith.cmpi slt, %2, %c128_i32_1 : i32
    %7 = arith.extui %6 : i1 to i32
    %c0_i32_2 = arith.constant 0 : i32
    %8 = arith.cmpi ne, %7, %c0_i32_2 : i32
    scf.if %8 {
      %c0_3 = arith.constant 0 : index
      %c0_4 = arith.constant 0 : index
      %9 = vector.load %arg2[%c0_3, %c0_4] : memref<16x128xf32, #tpu.memory_space<vmem>>, vector<16x128xf32>
      %cst = arith.constant 3.14159274 : f32
      %10 = vector.broadcast %cst : f32 to vector<16x128xf32>
      %11 = arith.mulf %10, %9 : vector<16x128xf32>
      %12 = math.sin %11 : vector<16x128xf32>
      %13 = vector.extract_strided_slice %12 {offsets = [0, 0], sizes = [8, 128], strides = [1, 1]} : vector<16x128xf32> to vector<8x128xf32>
      %14 = vector.extract_strided_slice %12 {offsets = [8, 0], sizes = [8, 128], strides = [1, 1]} : vector<16x128xf32> to vector<8x128xf32>
      %cst_5 = arith.constant 2.000000e+00 : f32
      %15 = vector.broadcast %cst_5 : f32 to vector<8x128xf32>
      %16 = arith.mulf %15, %13 : vector<8x128xf32>
      %17 = arith.mulf %16, %14 : vector<8x128xf32>
      %18 = arith.subf %14, %13 : vector<8x128xf32>
      %19 = arith.addf %14, %13 : vector<8x128xf32>
      %20 = arith.mulf %18, %19 : vector<8x128xf32>
      %cst_6 = arith.constant 2.000000e+00 : f32
      %21 = vector.broadcast %cst_6 : f32 to vector<8x128xf32>
      %22 = arith.mulf %21, %17 : vector<8x128xf32>
      %23 = arith.mulf %22, %20 : vector<8x128xf32>
      %24 = arith.subf %20, %17 : vector<8x128xf32>
      %25 = arith.addf %20, %17 : vector<8x128xf32>
      %26 = arith.mulf %24, %25 : vector<8x128xf32>
      %cst_7 = arith.constant 2.000000e+00 : f32
      %27 = vector.broadcast %cst_7 : f32 to vector<8x128xf32>
      %28 = arith.mulf %27, %23 : vector<8x128xf32>
      %29 = arith.mulf %28, %26 : vector<8x128xf32>
      %30 = arith.subf %26, %23 : vector<8x128xf32>
      %31 = arith.addf %26, %23 : vector<8x128xf32>
      %32 = arith.mulf %30, %31 : vector<8x128xf32>
      %cst_8 = arith.constant 2.000000e+00 : f32
      %33 = vector.broadcast %cst_8 : f32 to vector<8x128xf32>
      %34 = arith.mulf %33, %29 : vector<8x128xf32>
      %35 = arith.mulf %34, %32 : vector<8x128xf32>
      %36 = arith.subf %32, %29 : vector<8x128xf32>
      %37 = arith.addf %32, %29 : vector<8x128xf32>
      %38 = arith.mulf %36, %37 : vector<8x128xf32>
      %cst_9 = arith.constant 2.000000e+00 : f32
      %39 = vector.broadcast %cst_9 : f32 to vector<8x128xf32>
      %40 = arith.mulf %39, %35 : vector<8x128xf32>
      %41 = arith.mulf %40, %38 : vector<8x128xf32>
      %42 = arith.subf %38, %35 : vector<8x128xf32>
      %43 = arith.addf %38, %35 : vector<8x128xf32>
      %44 = arith.mulf %42, %43 : vector<8x128xf32>
      %cst_10 = arith.constant 2.000000e+00 : f32
      %45 = vector.broadcast %cst_10 : f32 to vector<8x128xf32>
      %46 = arith.mulf %45, %41 : vector<8x128xf32>
      %47 = arith.mulf %46, %44 : vector<8x128xf32>
      %48 = arith.subf %44, %41 : vector<8x128xf32>
      %49 = arith.addf %44, %41 : vector<8x128xf32>
      %50 = arith.mulf %48, %49 : vector<8x128xf32>
      %cst_11 = arith.constant 2.000000e+00 : f32
      %51 = vector.broadcast %cst_11 : f32 to vector<8x128xf32>
      %52 = arith.mulf %51, %47 : vector<8x128xf32>
      %53 = arith.mulf %52, %50 : vector<8x128xf32>
      %54 = arith.subf %50, %47 : vector<8x128xf32>
      %55 = arith.addf %50, %47 : vector<8x128xf32>
      %56 = arith.mulf %54, %55 : vector<8x128xf32>
      %cst_12 = arith.constant 2.000000e+00 : f32
      %57 = vector.broadcast %cst_12 : f32 to vector<8x128xf32>
      %58 = arith.mulf %57, %53 : vector<8x128xf32>
      %59 = arith.mulf %58, %56 : vector<8x128xf32>
      %60 = arith.subf %56, %53 : vector<8x128xf32>
      %61 = arith.addf %56, %53 : vector<8x128xf32>
      %62 = arith.mulf %60, %61 : vector<8x128xf32>
      %cst_13 = arith.constant 2.000000e+00 : f32
      %63 = vector.broadcast %cst_13 : f32 to vector<8x128xf32>
      %64 = arith.mulf %63, %59 : vector<8x128xf32>
      %65 = arith.mulf %64, %62 : vector<8x128xf32>
      %66 = arith.subf %62, %59 : vector<8x128xf32>
      %67 = arith.addf %62, %59 : vector<8x128xf32>
      %68 = arith.mulf %66, %67 : vector<8x128xf32>
      %69 = tpu.concatenate %13, %14, %17, %20, %23, %26, %29, %32, %35, %38, %41, %44, %47, %50, %53, %56 in 0 : vector<8x128xf32>, vector<8x128xf32>, vector<8x128xf32>, vector<8x128xf32>, vector<8x128xf32>, vector<8x128xf32>, vector<8x128xf32>, vector<8x128xf32>, vector<8x128xf32>, vector<8x128xf32>, vector<8x128xf32>, vector<8x128xf32>, vector<8x128xf32>, vector<8x128xf32>, vector<8x128xf32>, vector<8x128xf32> -> vector<128x128xf32>
      %70 = tpu.concatenate %59, %62, %65, %68 in 0 : vector<8x128xf32>, vector<8x128xf32>, vector<8x128xf32>, vector<8x128xf32> -> vector<32x128xf32>
      %71 = tpu.concatenate %69, %70 in 0 : vector<128x128xf32>, vector<32x128xf32> -> vector<160x128xf32>
      %72 = arith.truncf %71 : vector<160x128xf32> to vector<160x128xbf16>
      %73 = tpu.iota {dimensions = array<i32: 1>} : vector<1x128xi32>
      %74 = vector.broadcast %2 : i32 to vector<1x128xi32>
      %75 = arith.cmpi slt, %73, %74 : vector<1x128xi32>
      %76 = arith.extui %75 : vector<1x128xi1> to vector<1x128xi32>
      %77 = arith.sitofp %76 : vector<1x128xi32> to vector<1x128xf32>
      %cst_14 = arith.constant dense<0.000000e+00> : vector<1xf32>
      %78 = vector.multi_reduction <add>, %77, %cst_14 [1] : vector<1x128xf32> to vector<1xf32>
      %79 = vector.shape_cast %78 : vector<1xf32> to vector<1x1xf32>
      %cst_15 = arith.constant 1.000000e+00 : f32
      %80 = vector.broadcast %cst_15 : f32 to vector<1x1xf32>
      %81 = arith.divf %80, %79 : vector<1x1xf32>
      %c0_16 = arith.constant 0 : index
      %c0_17 = arith.constant 0 : index
      %82 = vector.load %arg3[%c0_16, %c0_17] : memref<64x160xbf16, #tpu.memory_space<vmem>>, vector<64x160xbf16>
      %cst_18 = arith.constant dense<0.000000e+00> : vector<64x128xf32>
      %83 = tpu.matmul %82, %72, %cst_18 {dimension_numbers = #tpu.dot_dimension_numbers<[1], [0], [0], [1], [0, 0, 1, 1], [], []>} : vector<64x160xbf16>, vector<160x128xbf16>, vector<64x128xf32> -> vector<64x128xf32>
      %84 = vector.extract_strided_slice %83 {offsets = [0, 0], sizes = [32, 128], strides = [1, 1]} : vector<64x128xf32> to vector<32x128xf32>
      %c0_19 = arith.constant 0 : index
      %c0_20 = arith.constant 0 : index
      %85 = vector.load %arg5[%c0_19, %c0_20] : memref<32x16xf32, #tpu.memory_space<vmem>>, vector<32x1xf32>
      %c0_21 = arith.constant 0 : index
      %c1 = arith.constant 1 : index
      %86 = vector.load %arg5[%c0_21, %c1] : memref<32x16xf32, #tpu.memory_space<vmem>>, vector<32x1xf32>
      %87 = vector.broadcast %77 : vector<1x128xf32> to vector<32x128xf32>
      %88 = arith.mulf %84, %87 : vector<32x128xf32>
      %cst_22 = arith.constant dense<0.000000e+00> : vector<32xf32>
      %89 = vector.multi_reduction <add>, %88, %cst_22 [1] : vector<32x128xf32> to vector<32xf32>
      %90 = vector.shape_cast %89 : vector<32xf32> to vector<32x1xf32>
      %91 = arith.mulf %88, %84 : vector<32x128xf32>
      %cst_23 = arith.constant dense<0.000000e+00> : vector<32xf32>
      %92 = vector.multi_reduction <add>, %91, %cst_23 [1] : vector<32x128xf32> to vector<32xf32>
      %93 = vector.shape_cast %92 : vector<32xf32> to vector<32x1xf32>
      %94 = vector.broadcast %81 : vector<1x1xf32> to vector<32x1xf32>
      %95 = arith.mulf %90, %94 : vector<32x1xf32>
      %96 = vector.broadcast %81 : vector<1x1xf32> to vector<32x1xf32>
      %97 = arith.mulf %93, %96 : vector<32x1xf32>
      %98 = arith.mulf %95, %95 : vector<32x1xf32>
      %99 = arith.subf %97, %98 : vector<32x1xf32>
      %cst_24 = arith.constant 0.000000e+00 : f32
      %100 = vector.broadcast %cst_24 : f32 to vector<32x1xf32>
      %101 = arith.maximumf %99, %100 : vector<32x1xf32>
      %cst_25 = arith.constant 9.99999974E-6 : f32
      %102 = vector.broadcast %cst_25 : f32 to vector<32x1xf32>
      %103 = arith.addf %101, %102 : vector<32x1xf32>
      %104 = math.rsqrt %103 : vector<32x1xf32>
      %105 = arith.mulf %85, %104 : vector<32x1xf32>
      %106 = vector.broadcast %105 : vector<32x1xf32> to vector<32x128xf32>
      %107 = arith.mulf %84, %106 : vector<32x128xf32>
      %108 = arith.mulf %95, %105 : vector<32x1xf32>
      %109 = arith.subf %86, %108 : vector<32x1xf32>
      %110 = vector.broadcast %109 : vector<32x1xf32> to vector<32x128xf32>
      %111 = arith.addf %107, %110 : vector<32x128xf32>
      %cst_26 = arith.constant 0.000000e+00 : f32
      %112 = vector.broadcast %cst_26 : f32 to vector<32x128xf32>
      %113 = arith.maximumf %111, %112 : vector<32x128xf32>
      %c0_27 = arith.constant 0 : index
      %c0_28 = arith.constant 0 : index
      %c0_29 = arith.constant 0 : index
      %114 = vector.load %arg4[%c0_27, %c0_28, %c0_29] : memref<6x32x32xbf16, #tpu.memory_space<vmem>>, vector<1x32x32xbf16>
      %115 = vector.shape_cast %114 : vector<1x32x32xbf16> to vector<32x32xbf16>
      %116 = arith.truncf %113 : vector<32x128xf32> to vector<32x128xbf16>
      %cst_30 = arith.constant dense<0.000000e+00> : vector<32x128xf32>
      %117 = tpu.matmul %115, %116, %cst_30 {dimension_numbers = #tpu.dot_dimension_numbers<[1], [0], [0], [1], [0, 0, 1, 1], [], []>} : vector<32x32xbf16>, vector<32x128xbf16>, vector<32x128xf32> -> vector<32x128xf32>
      %c0_31 = arith.constant 0 : index
      %c2 = arith.constant 2 : index
      %118 = vector.load %arg5[%c0_31, %c2] : memref<32x16xf32, #tpu.memory_space<vmem>>, vector<32x1xf32>
      %c0_32 = arith.constant 0 : index
      %c3 = arith.constant 3 : index
      %119 = vector.load %arg5[%c0_32, %c3] : memref<32x16xf32, #tpu.memory_space<vmem>>, vector<32x1xf32>
      %120 = vector.broadcast %77 : vector<1x128xf32> to vector<32x128xf32>
      %121 = arith.mulf %117, %120 : vector<32x128xf32>
      %cst_33 = arith.constant dense<0.000000e+00> : vector<32xf32>
      %122 = vector.multi_reduction <add>, %121, %cst_33 [1] : vector<32x128xf32> to vector<32xf32>
      %123 = vector.shape_cast %122 : vector<32xf32> to vector<32x1xf32>
      %124 = arith.mulf %121, %117 : vector<32x128xf32>
      %cst_34 = arith.constant dense<0.000000e+00> : vector<32xf32>
      %125 = vector.multi_reduction <add>, %124, %cst_34 [1] : vector<32x128xf32> to vector<32xf32>
      %126 = vector.shape_cast %125 : vector<32xf32> to vector<32x1xf32>
      %127 = vector.broadcast %81 : vector<1x1xf32> to vector<32x1xf32>
      %128 = arith.mulf %123, %127 : vector<32x1xf32>
      %129 = vector.broadcast %81 : vector<1x1xf32> to vector<32x1xf32>
      %130 = arith.mulf %126, %129 : vector<32x1xf32>
      %131 = arith.mulf %128, %128 : vector<32x1xf32>
      %132 = arith.subf %130, %131 : vector<32x1xf32>
      %cst_35 = arith.constant 0.000000e+00 : f32
      %133 = vector.broadcast %cst_35 : f32 to vector<32x1xf32>
      %134 = arith.maximumf %132, %133 : vector<32x1xf32>
      %cst_36 = arith.constant 9.99999974E-6 : f32
      %135 = vector.broadcast %cst_36 : f32 to vector<32x1xf32>
      %136 = arith.addf %134, %135 : vector<32x1xf32>
      %137 = math.rsqrt %136 : vector<32x1xf32>
      %138 = arith.mulf %118, %137 : vector<32x1xf32>
      %139 = vector.broadcast %138 : vector<32x1xf32> to vector<32x128xf32>
      %140 = arith.mulf %117, %139 : vector<32x128xf32>
      %141 = arith.mulf %128, %138 : vector<32x1xf32>
      %142 = arith.subf %119, %141 : vector<32x1xf32>
      %143 = vector.broadcast %142 : vector<32x1xf32> to vector<32x128xf32>
      %144 = arith.addf %140, %143 : vector<32x128xf32>
      %145 = vector.extract_strided_slice %83 {offsets = [32, 0], sizes = [32, 128], strides = [1, 1]} : vector<64x128xf32> to vector<32x128xf32>
      %c0_37 = arith.constant 0 : index
      %c4 = arith.constant 4 : index
      %146 = vector.load %arg5[%c0_37, %c4] : memref<32x16xf32, #tpu.memory_space<vmem>>, vector<32x1xf32>
      %c0_38 = arith.constant 0 : index
      %c5 = arith.constant 5 : index
      %147 = vector.load %arg5[%c0_38, %c5] : memref<32x16xf32, #tpu.memory_space<vmem>>, vector<32x1xf32>
      %148 = vector.broadcast %77 : vector<1x128xf32> to vector<32x128xf32>
      %149 = arith.mulf %145, %148 : vector<32x128xf32>
      %cst_39 = arith.constant dense<0.000000e+00> : vector<32xf32>
      %150 = vector.multi_reduction <add>, %149, %cst_39 [1] : vector<32x128xf32> to vector<32xf32>
      %151 = vector.shape_cast %150 : vector<32xf32> to vector<32x1xf32>
      %152 = arith.mulf %149, %145 : vector<32x128xf32>
      %cst_40 = arith.constant dense<0.000000e+00> : vector<32xf32>
      %153 = vector.multi_reduction <add>, %152, %cst_40 [1] : vector<32x128xf32> to vector<32xf32>
      %154 = vector.shape_cast %153 : vector<32xf32> to vector<32x1xf32>
      %155 = vector.broadcast %81 : vector<1x1xf32> to vector<32x1xf32>
      %156 = arith.mulf %151, %155 : vector<32x1xf32>
      %157 = vector.broadcast %81 : vector<1x1xf32> to vector<32x1xf32>
      %158 = arith.mulf %154, %157 : vector<32x1xf32>
      %159 = arith.mulf %156, %156 : vector<32x1xf32>
      %160 = arith.subf %158, %159 : vector<32x1xf32>
      %cst_41 = arith.constant 0.000000e+00 : f32
      %161 = vector.broadcast %cst_41 : f32 to vector<32x1xf32>
      %162 = arith.maximumf %160, %161 : vector<32x1xf32>
      %cst_42 = arith.constant 9.99999974E-6 : f32
      %163 = vector.broadcast %cst_42 : f32 to vector<32x1xf32>
      %164 = arith.addf %162, %163 : vector<32x1xf32>
      %165 = math.rsqrt %164 : vector<32x1xf32>
      %166 = arith.mulf %146, %165 : vector<32x1xf32>
      %167 = vector.broadcast %166 : vector<32x1xf32> to vector<32x128xf32>
      %168 = arith.mulf %145, %167 : vector<32x128xf32>
      %169 = arith.mulf %156, %166 : vector<32x1xf32>
      %170 = arith.subf %147, %169 : vector<32x1xf32>
      %171 = vector.broadcast %170 : vector<32x1xf32> to vector<32x128xf32>
      %172 = arith.addf %168, %171 : vector<32x128xf32>
      %173 = arith.addf %144, %172 : vector<32x128xf32>
      %cst_43 = arith.constant 0.000000e+00 : f32
      %174 = vector.broadcast %cst_43 : f32 to vector<32x128xf32>
      %175 = arith.maximumf %173, %174 : vector<32x128xf32>
      %c1_44 = arith.constant 1 : index
      %c0_45 = arith.constant 0 : index
      %c0_46 = arith.constant 0 : index
      %176 = vector.load %arg4[%c1_44, %c0_45, %c0_46] : memref<6x32x32xbf16, #tpu.memory_space<vmem>>, vector<1x32x32xbf16>
      %177 = vector.shape_cast %176 : vector<1x32x32xbf16> to vector<32x32xbf16>
      %178 = arith.truncf %175 : vector<32x128xf32> to vector<32x128xbf16>
      %cst_47 = arith.constant dense<0.000000e+00> : vector<32x128xf32>
      %179 = tpu.matmul %177, %178, %cst_47 {dimension_numbers = #tpu.dot_dimension_numbers<[1], [0], [0], [1], [0, 0, 1, 1], [], []>} : vector<32x32xbf16>, vector<32x128xbf16>, vector<32x128xf32> -> vector<32x128xf32>
      %c0_48 = arith.constant 0 : index
      %c6 = arith.constant 6 : index
      %180 = vector.load %arg5[%c0_48, %c6] : memref<32x16xf32, #tpu.memory_space<vmem>>, vector<32x1xf32>
      %c0_49 = arith.constant 0 : index
      %c7 = arith.constant 7 : index
      %181 = vector.load %arg5[%c0_49, %c7] : memref<32x16xf32, #tpu.memory_space<vmem>>, vector<32x1xf32>
      %182 = vector.broadcast %77 : vector<1x128xf32> to vector<32x128xf32>
      %183 = arith.mulf %179, %182 : vector<32x128xf32>
      %cst_50 = arith.constant dense<0.000000e+00> : vector<32xf32>
      %184 = vector.multi_reduction <add>, %183, %cst_50 [1] : vector<32x128xf32> to vector<32xf32>
      %185 = vector.shape_cast %184 : vector<32xf32> to vector<32x1xf32>
      %186 = arith.mulf %183, %179 : vector<32x128xf32>
      %cst_51 = arith.constant dense<0.000000e+00> : vector<32xf32>
      %187 = vector.multi_reduction <add>, %186, %cst_51 [1] : vector<32x128xf32> to vector<32xf32>
      %188 = vector.shape_cast %187 : vector<32xf32> to vector<32x1xf32>
      %189 = vector.broadcast %81 : vector<1x1xf32> to vector<32x1xf32>
      %190 = arith.mulf %185, %189 : vector<32x1xf32>
      %191 = vector.broadcast %81 : vector<1x1xf32> to vector<32x1xf32>
      %192 = arith.mulf %188, %191 : vector<32x1xf32>
      %193 = arith.mulf %190, %190 : vector<32x1xf32>
      %194 = arith.subf %192, %193 : vector<32x1xf32>
      %cst_52 = arith.constant 0.000000e+00 : f32
      %195 = vector.broadcast %cst_52 : f32 to vector<32x1xf32>
      %196 = arith.maximumf %194, %195 : vector<32x1xf32>
      %cst_53 = arith.constant 9.99999974E-6 : f32
      %197 = vector.broadcast %cst_53 : f32 to vector<32x1xf32>
      %198 = arith.addf %196, %197 : vector<32x1xf32>
      %199 = math.rsqrt %198 : vector<32x1xf32>
      %200 = arith.mulf %180, %199 : vector<32x1xf32>
      %201 = vector.broadcast %200 : vector<32x1xf32> to vector<32x128xf32>
      %202 = arith.mulf %179, %201 : vector<32x128xf32>
      %203 = arith.mulf %190, %200 : vector<32x1xf32>
      %204 = arith.subf %181, %203 : vector<32x1xf32>
      %205 = vector.broadcast %204 : vector<32x1xf32> to vector<32x128xf32>
      %206 = arith.addf %202, %205 : vector<32x128xf32>
      %cst_54 = arith.constant 0.000000e+00 : f32
      %207 = vector.broadcast %cst_54 : f32 to vector<32x128xf32>
      %208 = arith.maximumf %206, %207 : vector<32x128xf32>
      %c2_55 = arith.constant 2 : index
      %c0_56 = arith.constant 0 : index
      %c0_57 = arith.constant 0 : index
      %209 = vector.load %arg4[%c2_55, %c0_56, %c0_57] : memref<6x32x32xbf16, #tpu.memory_space<vmem>>, vector<1x32x32xbf16>
      %210 = vector.shape_cast %209 : vector<1x32x32xbf16> to vector<32x32xbf16>
      %211 = arith.truncf %208 : vector<32x128xf32> to vector<32x128xbf16>
      %cst_58 = arith.constant dense<0.000000e+00> : vector<32x128xf32>
      %212 = tpu.matmul %210, %211, %cst_58 {dimension_numbers = #tpu.dot_dimension_numbers<[1], [0], [0], [1], [0, 0, 1, 1], [], []>} : vector<32x32xbf16>, vector<32x128xbf16>, vector<32x128xf32> -> vector<32x128xf32>
      %c0_59 = arith.constant 0 : index
      %c8 = arith.constant 8 : index
      %213 = vector.load %arg5[%c0_59, %c8] : memref<32x16xf32, #tpu.memory_space<vmem>>, vector<32x1xf32>
      %c0_60 = arith.constant 0 : index
      %c9 = arith.constant 9 : index
      %214 = vector.load %arg5[%c0_60, %c9] : memref<32x16xf32, #tpu.memory_space<vmem>>, vector<32x1xf32>
      %215 = vector.broadcast %77 : vector<1x128xf32> to vector<32x128xf32>
      %216 = arith.mulf %212, %215 : vector<32x128xf32>
      %cst_61 = arith.constant dense<0.000000e+00> : vector<32xf32>
      %217 = vector.multi_reduction <add>, %216, %cst_61 [1] : vector<32x128xf32> to vector<32xf32>
      %218 = vector.shape_cast %217 : vector<32xf32> to vector<32x1xf32>
      %219 = arith.mulf %216, %212 : vector<32x128xf32>
      %cst_62 = arith.constant dense<0.000000e+00> : vector<32xf32>
      %220 = vector.multi_reduction <add>, %219, %cst_62 [1] : vector<32x128xf32> to vector<32xf32>
      %221 = vector.shape_cast %220 : vector<32xf32> to vector<32x1xf32>
      %222 = vector.broadcast %81 : vector<1x1xf32> to vector<32x1xf32>
      %223 = arith.mulf %218, %222 : vector<32x1xf32>
      %224 = vector.broadcast %81 : vector<1x1xf32> to vector<32x1xf32>
      %225 = arith.mulf %221, %224 : vector<32x1xf32>
      %226 = arith.mulf %223, %223 : vector<32x1xf32>
      %227 = arith.subf %225, %226 : vector<32x1xf32>
      %cst_63 = arith.constant 0.000000e+00 : f32
      %228 = vector.broadcast %cst_63 : f32 to vector<32x1xf32>
      %229 = arith.maximumf %227, %228 : vector<32x1xf32>
      %cst_64 = arith.constant 9.99999974E-6 : f32
      %230 = vector.broadcast %cst_64 : f32 to vector<32x1xf32>
      %231 = arith.addf %229, %230 : vector<32x1xf32>
      %232 = math.rsqrt %231 : vector<32x1xf32>
      %233 = arith.mulf %213, %232 : vector<32x1xf32>
      %234 = vector.broadcast %233 : vector<32x1xf32> to vector<32x128xf32>
      %235 = arith.mulf %212, %234 : vector<32x128xf32>
      %236 = arith.mulf %223, %233 : vector<32x1xf32>
      %237 = arith.subf %214, %236 : vector<32x1xf32>
      %238 = vector.broadcast %237 : vector<32x1xf32> to vector<32x128xf32>
      %239 = arith.addf %235, %238 : vector<32x128xf32>
      %240 = arith.addf %239, %175 : vector<32x128xf32>
      %cst_65 = arith.constant 0.000000e+00 : f32
      %241 = vector.broadcast %cst_65 : f32 to vector<32x128xf32>
      %242 = arith.maximumf %240, %241 : vector<32x128xf32>
      %c3_66 = arith.constant 3 : index
      %c0_67 = arith.constant 0 : index
      %c0_68 = arith.constant 0 : index
      %243 = vector.load %arg4[%c3_66, %c0_67, %c0_68] : memref<6x32x32xbf16, #tpu.memory_space<vmem>>, vector<1x32x32xbf16>
      %244 = vector.shape_cast %243 : vector<1x32x32xbf16> to vector<32x32xbf16>
      %245 = arith.truncf %242 : vector<32x128xf32> to vector<32x128xbf16>
      %cst_69 = arith.constant dense<0.000000e+00> : vector<32x128xf32>
      %246 = tpu.matmul %244, %245, %cst_69 {dimension_numbers = #tpu.dot_dimension_numbers<[1], [0], [0], [1], [0, 0, 1, 1], [], []>} : vector<32x32xbf16>, vector<32x128xbf16>, vector<32x128xf32> -> vector<32x128xf32>
      %c0_70 = arith.constant 0 : index
      %c10 = arith.constant 10 : index
      %247 = vector.load %arg5[%c0_70, %c10] : memref<32x16xf32, #tpu.memory_space<vmem>>, vector<32x1xf32>
      %c0_71 = arith.constant 0 : index
      %c11 = arith.constant 11 : index
      %248 = vector.load %arg5[%c0_71, %c11] : memref<32x16xf32, #tpu.memory_space<vmem>>, vector<32x1xf32>
      %249 = vector.broadcast %77 : vector<1x128xf32> to vector<32x128xf32>
      %250 = arith.mulf %246, %249 : vector<32x128xf32>
      %cst_72 = arith.constant dense<0.000000e+00> : vector<32xf32>
      %251 = vector.multi_reduction <add>, %250, %cst_72 [1] : vector<32x128xf32> to vector<32xf32>
      %252 = vector.shape_cast %251 : vector<32xf32> to vector<32x1xf32>
      %253 = arith.mulf %250, %246 : vector<32x128xf32>
      %cst_73 = arith.constant dense<0.000000e+00> : vector<32xf32>
      %254 = vector.multi_reduction <add>, %253, %cst_73 [1] : vector<32x128xf32> to vector<32xf32>
      %255 = vector.shape_cast %254 : vector<32xf32> to vector<32x1xf32>
      %256 = vector.broadcast %81 : vector<1x1xf32> to vector<32x1xf32>
      %257 = arith.mulf %252, %256 : vector<32x1xf32>
      %258 = vector.broadcast %81 : vector<1x1xf32> to vector<32x1xf32>
      %259 = arith.mulf %255, %258 : vector<32x1xf32>
      %260 = arith.mulf %257, %257 : vector<32x1xf32>
      %261 = arith.subf %259, %260 : vector<32x1xf32>
      %cst_74 = arith.constant 0.000000e+00 : f32
      %262 = vector.broadcast %cst_74 : f32 to vector<32x1xf32>
      %263 = arith.maximumf %261, %262 : vector<32x1xf32>
      %cst_75 = arith.constant 9.99999974E-6 : f32
      %264 = vector.broadcast %cst_75 : f32 to vector<32x1xf32>
      %265 = arith.addf %263, %264 : vector<32x1xf32>
      %266 = math.rsqrt %265 : vector<32x1xf32>
      %267 = arith.mulf %247, %266 : vector<32x1xf32>
      %268 = vector.broadcast %267 : vector<32x1xf32> to vector<32x128xf32>
      %269 = arith.mulf %246, %268 : vector<32x128xf32>
      %270 = arith.mulf %257, %267 : vector<32x1xf32>
      %271 = arith.subf %248, %270 : vector<32x1xf32>
      %272 = vector.broadcast %271 : vector<32x1xf32> to vector<32x128xf32>
      %273 = arith.addf %269, %272 : vector<32x128xf32>
      %cst_76 = arith.constant 0.000000e+00 : f32
      %274 = vector.broadcast %cst_76 : f32 to vector<32x128xf32>
      %275 = arith.maximumf %273, %274 : vector<32x128xf32>
      %c4_77 = arith.constant 4 : index
      %c0_78 = arith.constant 0 : index
      %c0_79 = arith.constant 0 : index
      %276 = vector.load %arg4[%c4_77, %c0_78, %c0_79] : memref<6x32x32xbf16, #tpu.memory_space<vmem>>, vector<1x32x32xbf16>
      %277 = vector.shape_cast %276 : vector<1x32x32xbf16> to vector<32x32xbf16>
      %278 = arith.truncf %275 : vector<32x128xf32> to vector<32x128xbf16>
      %cst_80 = arith.constant dense<0.000000e+00> : vector<32x128xf32>
      %279 = tpu.matmul %277, %278, %cst_80 {dimension_numbers = #tpu.dot_dimension_numbers<[1], [0], [0], [1], [0, 0, 1, 1], [], []>} : vector<32x32xbf16>, vector<32x128xbf16>, vector<32x128xf32> -> vector<32x128xf32>
      %c0_81 = arith.constant 0 : index
      %c12 = arith.constant 12 : index
      %280 = vector.load %arg5[%c0_81, %c12] : memref<32x16xf32, #tpu.memory_space<vmem>>, vector<32x1xf32>
      %c0_82 = arith.constant 0 : index
      %c13 = arith.constant 13 : index
      %281 = vector.load %arg5[%c0_82, %c13] : memref<32x16xf32, #tpu.memory_space<vmem>>, vector<32x1xf32>
      %282 = vector.broadcast %77 : vector<1x128xf32> to vector<32x128xf32>
      %283 = arith.mulf %279, %282 : vector<32x128xf32>
      %cst_83 = arith.constant dense<0.000000e+00> : vector<32xf32>
      %284 = vector.multi_reduction <add>, %283, %cst_83 [1] : vector<32x128xf32> to vector<32xf32>
      %285 = vector.shape_cast %284 : vector<32xf32> to vector<32x1xf32>
      %286 = arith.mulf %283, %279 : vector<32x128xf32>
      %cst_84 = arith.constant dense<0.000000e+00> : vector<32xf32>
      %287 = vector.multi_reduction <add>, %286, %cst_84 [1] : vector<32x128xf32> to vector<32xf32>
      %288 = vector.shape_cast %287 : vector<32xf32> to vector<32x1xf32>
      %289 = vector.broadcast %81 : vector<1x1xf32> to vector<32x1xf32>
      %290 = arith.mulf %285, %289 : vector<32x1xf32>
      %291 = vector.broadcast %81 : vector<1x1xf32> to vector<32x1xf32>
      %292 = arith.mulf %288, %291 : vector<32x1xf32>
      %293 = arith.mulf %290, %290 : vector<32x1xf32>
      %294 = arith.subf %292, %293 : vector<32x1xf32>
      %cst_85 = arith.constant 0.000000e+00 : f32
      %295 = vector.broadcast %cst_85 : f32 to vector<32x1xf32>
      %296 = arith.maximumf %294, %295 : vector<32x1xf32>
      %cst_86 = arith.constant 9.99999974E-6 : f32
      %297 = vector.broadcast %cst_86 : f32 to vector<32x1xf32>
      %298 = arith.addf %296, %297 : vector<32x1xf32>
      %299 = math.rsqrt %298 : vector<32x1xf32>
      %300 = arith.mulf %280, %299 : vector<32x1xf32>
      %301 = vector.broadcast %300 : vector<32x1xf32> to vector<32x128xf32>
      %302 = arith.mulf %279, %301 : vector<32x128xf32>
      %303 = arith.mulf %290, %300 : vector<32x1xf32>
      %304 = arith.subf %281, %303 : vector<32x1xf32>
      %305 = vector.broadcast %304 : vector<32x1xf32> to vector<32x128xf32>
      %306 = arith.addf %302, %305 : vector<32x128xf32>
      %307 = arith.addf %306, %242 : vector<32x128xf32>
      %cst_87 = arith.constant 0.000000e+00 : f32
      %308 = vector.broadcast %cst_87 : f32 to vector<32x128xf32>
      %309 = arith.maximumf %307, %308 : vector<32x128xf32>
      %c5_88 = arith.constant 5 : index
      %c0_89 = arith.constant 0 : index
      %c0_90 = arith.constant 0 : index
      %310 = vector.load %arg4[%c5_88, %c0_89, %c0_90] : memref<6x32x32xbf16, #tpu.memory_space<vmem>>, vector<1x32x32xbf16>
      %311 = vector.shape_cast %310 : vector<1x32x32xbf16> to vector<32x32xbf16>
      %312 = arith.truncf %309 : vector<32x128xf32> to vector<32x128xbf16>
      %cst_91 = arith.constant dense<0.000000e+00> : vector<32x128xf32>
      %313 = tpu.matmul %311, %312, %cst_91 {dimension_numbers = #tpu.dot_dimension_numbers<[1], [0], [0], [1], [0, 0, 1, 1], [], []>} : vector<32x32xbf16>, vector<32x128xbf16>, vector<32x128xf32> -> vector<32x128xf32>
      %314 = vector.extract_strided_slice %313 {offsets = [0, 0], sizes = [1, 128], strides = [1, 1]} : vector<32x128xf32> to vector<1x128xf32>
      %c0_92 = arith.constant 0 : index
      %c0_93 = arith.constant 0 : index
      %315 = vector.load %arg6[%c0_92, %c0_93] : memref<1x128xf32, #tpu.memory_space<vmem>>, vector<1x128xf32>
      tpu.vector_store %arg6[%c0_92, %c0_93], %314 {strides = array<i32>} : memref<1x128xf32, #tpu.memory_space<vmem>>, vector<1x128xf32>,
    } else {
    }
    return
  }
  func.func @transform_0(%arg0: i32, %arg1: memref<1xi32, #tpu.memory_space<smem>>) -> (i32, i32) {
    %c0_i32 = arith.constant 0 : i32
    %c0_i32_0 = arith.constant 0 : i32
    return %c0_i32, %arg0 : i32, i32
  }
  func.func @transform_1(%arg0: i32, %arg1: memref<1xi32, #tpu.memory_space<smem>>) -> (i32, i32) {
    %c0_i32 = arith.constant 0 : i32
    %c0_i32_0 = arith.constant 0 : i32
    %c0_i32_1 = arith.constant 0 : i32
    return %c0_i32, %c0_i32_0 : i32, i32
  }
  func.func @transform_2(%arg0: i32, %arg1: memref<1xi32, #tpu.memory_space<smem>>) -> (i32, i32, i32) {
    %c0_i32 = arith.constant 0 : i32
    %c0_i32_0 = arith.constant 0 : i32
    %c0_i32_1 = arith.constant 0 : i32
    %c0_i32_2 = arith.constant 0 : i32
    return %c0_i32, %c0_i32_0, %c0_i32_1 : i32, i32, i32
  }
  func.func @transform_3(%arg0: i32, %arg1: memref<1xi32, #tpu.memory_space<smem>>) -> (i32, i32) {
    %c0_i32 = arith.constant 0 : i32
    %c0_i32_0 = arith.constant 0 : i32
    %c0_i32_1 = arith.constant 0 : i32
    return %c0_i32, %c0_i32_0 : i32, i32
  }
  func.func @transform_4(%arg0: i32, %arg1: memref<1xi32, #tpu.memory_space<smem>>) -> (i32, i32) {
    %c0_i32 = arith.constant 0 : i32
    %c0_i32_0 = arith.constant 0 : i32
    return %c0_i32, %arg0 : i32, i32
  }
}

</mosaic_0001>

<bundles_post_ra>
// kernel: occupancy_network_forward.1
= control target key start
LH: loop header
LB: loop body
LE: loop exit
PB: predicated region body
PF: predicated region fallthrough
CT: control target
= control target key end

     0   :  { %11 = vsyncpa [#allocation5], 0  ;;  %s5380_s0 = inlined_call_operand.<no memory space> [shape: s32[1], index: 0, kind: input, shape index: {}]   ;;  %s5381_s1 = inlined_call_operand.hbm [shape: f32[16,128], index: 1, kind: input, shape index: {}]   ;;  %s5382_s2 = inlined_call_operand.hbm [shape: bf16[64,160], index: 2, kind: input, shape index: {}]   ;;  %s5383_s3 = inlined_call_operand.hbm [shape: bf16[6,32,32], index: 3, kind: input, shape index: {}]   ;;  %s5384_s4 = inlined_call_operand.hbm [shape: f32[32,16], index: 4, kind: input, shape index: {}]   ;;  %s5385_s5 = inlined_call_operand.hbm [shape: f32[1,128], index: 5, kind: output, shape index: {}]  }
   0x1   :  { %12 = vsyncpa [#allocation8], 0 }
   0x2   :  { %13 = vsyncpa [#allocation11], 0 }
   0x3   :  { %14 = vsyncpa [#allocation6], 0  ;;  %s4266_s18 = smov [#allocation7]   ;;  %s4267_s20 = smov [#allocation4]  }
   0x4   :  { %s32_s19 = sshll.u32 %s4266_s18, 4  ;;  %s20_s21 = sshll.u32 %s4267_s20, 4  ;;  %s33_s19 = int_to_ptr.vmem [resolvable:$true] %s32_s19  ;;  %s4348_s21 = int_to_ptr.vmem [resolvable:$true] %s20_s21 }
   0x5   :  { %s4148_s24 = scalar_lea.hbm %s5382_s2, 1024 }
   0x6   :  { %p4149_p0 = scmp.ne.s32.totalorder %s5382_s2, %s4148_s24  ;;  %p4152_p1 = scmp.lt.u32.totalorder %s4148_s24, %s5382_s2 }
   0x8   :  { %p4154_p2 = pnand %p4152_p1, %p4149_p0 }
   0xa   :  { %4157 = shalt.err (!%p4154_p2)
}
   0xb   :  { %s4158_s29 = scalar_lea.vmem %s33_s19, 1024  ;;  %p4163_p4 = scmp.lt.s32.totalorder %s33_s19, %s33_s19 }
   0xc   :  { %p4159_p3 = scmp.ne.s32.totalorder %s33_s19, %s4158_s29  ;;  %p4164_p5 = scmp.lt.s32.totalorder %s4158_s29, %s4158_s29 }
   0xe   :  { %p4165_p6 = por %p4164_p5, %p4163_p4 }
  0x10   :  { %p4166_p7 = pnand %p4165_p6, %p4159_p3 }
  0x12   :  { %4169 = shalt.err (!%p4166_p7)
}
  0x13   :  { %s4268_s30 = smov 128   ;;  %s4269_s6 = smov 8  }
  0x14   :  { %38 = dma.hbm_to_vmem [thread:$0]  %s5382_s2, 1024, %s33_s19, [#allocation8], %s4268_s30, %s4268_s30, %s4269_s6  }
  0x15   :  { %s4170_s11 = scalar_lea.hbm %s5381_s1, 256 }
  0x16   :  { %p4171_p8 = scmp.ne.s32.totalorder %s5381_s1, %s4170_s11  ;;  %p4174_p9 = scmp.lt.u32.totalorder %s4170_s11, %s5381_s1 }
  0x18   :  { %p4176_p10 = pnand %p4174_p9, %p4171_p8 }
  0x1a   :  { %4179 = shalt.err (!%p4176_p10)
}
  0x1b   :  { %s4180_s16 = scalar_lea.vmem %s4348_s21, 256  ;;  %p4185_p12 = scmp.lt.s32.totalorder %s4348_s21, %s4348_s21 }
  0x1c   :  { %p4181_p11 = scmp.ne.s32.totalorder %s4348_s21, %s4180_s16  ;;  %p4186_p13 = scmp.lt.s32.totalorder %s4180_s16, %s4180_s16 }
  0x1e   :  { %p4187_p0 = por %p4186_p13, %p4185_p12 }
  0x20   :  { %p4188_p1 = pnand %p4187_p0, %p4181_p11 }
  0x22   :  { %4191 = shalt.err (!%p4188_p1)
}
  0x23   :  { %26 = dma.hbm_to_vmem [thread:$0]  %s5381_s1, 256, %s4348_s21, [#allocation5], %s4268_s30, %s4268_s30, %s4269_s6  }
  0x24   :  { %s4270_s18 = smov [#allocation9]   ;;  %s4192_s23 = scalar_lea.hbm %s5383_s3, 1536 }
  0x25   :  { %s44_s19 = sshll.u32 %s4270_s18, 4  ;;  %p4193_p2 = scmp.ne.s32.totalorder %s5383_s3, %s4192_s23  ;;  %s45_s19 = int_to_ptr.vmem [resolvable:$true] %s44_s19 }
  0x26   :  { %p4196_p3 = scmp.lt.u32.totalorder %s4192_s23, %s5383_s3 }
  0x28   :  { %p4198_p4 = pnand %p4196_p3, %p4193_p2 }
  0x2a   :  { %4201 = shalt.err (!%p4198_p4)
}
  0x2b   :  { %s4202_s28 = scalar_lea.vmem %s45_s19, 1536  ;;  %p4207_p6 = scmp.lt.s32.totalorder %s45_s19, %s45_s19 }
  0x2c   :  { %p4203_p5 = scmp.ne.s32.totalorder %s45_s19, %s4202_s28  ;;  %p4208_p7 = scmp.lt.s32.totalorder %s4202_s28, %s4202_s28 }
  0x2e   :  { %p4209_p8 = por %p4208_p7, %p4207_p6 }
  0x30   :  { %p4210_p9 = pnand %p4209_p8, %p4203_p5 }
  0x32   :  { %4213 = shalt.err (!%p4210_p9)
}
  0x33   :  { %s4271_s1 = smov 64   ;;  %s4272_s21 = smov 4  }
  0x34   :  { %50 = dma.hbm_to_vmem [thread:$0]  %s5383_s3, 1536, %s45_s19, [#allocation8], %s4271_s1, %s4271_s1, %s4272_s21  }
  0x35   :  { %s4273_s8 = smov [#allocation10]   ;;  %s4214_s12 = scalar_lea.hbm %s5384_s4, 512 }
  0x36   :  { %s56_s9 = sshll.u32 %s4273_s8, 4  ;;  %p4215_p10 = scmp.ne.s32.totalorder %s5384_s4, %s4214_s12  ;;  %s57_s9 = int_to_ptr.vmem [resolvable:$true] %s56_s9 }
  0x37   :  { %p4218_p11 = scmp.lt.u32.totalorder %s4214_s12, %s5384_s4 }
  0x39   :  { %p4220_p12 = pnand %p4218_p11, %p4215_p10 }
  0x3b   :  { %4223 = shalt.err (!%p4220_p12)
}
  0x3c   :  { %s4224_s2 = scalar_lea.vmem %s57_s9, 512  ;;  %p4229_p0 = scmp.lt.s32.totalorder %s57_s9, %s57_s9 }
  0x3d   :  { %p4225_p13 = scmp.ne.s32.totalorder %s57_s9, %s4224_s2  ;;  %p4230_p1 = scmp.lt.s32.totalorder %s4224_s2, %s4224_s2 }
  0x3f   :  { %p4231_p2 = por %p4230_p1, %p4229_p0 }
  0x41   :  { %p4232_p3 = pnand %p4231_p2, %p4225_p13 }
  0x43   :  { %4235 = shalt.err (!%p4232_p3)
}
  0x44   :  { %62 = dma.hbm_to_vmem [thread:$0]  %s5384_s4, 512, %s57_s9, [#allocation11], %s4268_s30, %s4268_s30, %s4269_s6  }
  0x45   :  { %4258 = dma.done.wait [#allocation5], 256  }
  0x46   :  { %4259 = vsyncadd [#allocation5], 4294967040 }
  0x47   :  { %4260 = dma.done.wait [#allocation8], 2560  }
  0x48   :  { %4261 = vsyncadd [#allocation8], 4294964736 }
  0x49   :  { %4262 = dma.done.wait [#allocation11], 512  }
  0x4a   :  { %4263 = vsyncadd [#allocation11], 4294966784  ;;  %p3594_p4 = scmp.lt.s32.totalorder %s5380_s0, 128 }
  0x4b   :  { %v83_v0 = vld [vmem:[#allocation4] sm:$0xff] (!%p3594_p4)  ;;  %v84_v1 = vld [vmem:[#allocation4 + $0x8] sm:$0xff] (!%p3594_p4)  ;;  %v4274_v2 = vmov (!%p3594_p4), 0   ;;  %vm394_vm0 = vcmask (!%p3594_p4), 261120   ;;  %v3931_v15 = vld [vmem:[#allocation7 + $0x4] ss:$8 sps:$4 sm:$0xff] (!%p3594_p4)  }
  0x4c   :  { %82 = sbr.rel (%p3594_p4) target bundleno = 4354 (0x1102), region = 37  ;;  %407 = vmatprep.subr.bf16.mxu0 (!%p3594_p4), %v4274_v2  ;;  %v4416_v3 = vmul.f32 (!%p3594_p4), 3.1415927, %v83_v0  ;;  %v4418_v4 = vmul.f32 (!%p3594_p4), 3.1415927, %v84_v1  ;;  %3897 = vset.pattern.permute.xlu0 (!%p3594_p4), %v4274_v2  ;;  %s4281_s4 = smov (!%p3594_p4), 1  }
  0x4d   :  { %3898 = vset.pattern.permute.xlu1 (!%p3594_p4), %v4274_v2  ;;  %3611 = vmatprep.mubr.msk.bf16.mxu0 (!%p3594_p4), %vm394_vm0, %v3931_v15  ;;  %v4275_v29 = vmov (!%p3594_p4), 683565275   ;;  %v4276_v31 = vmov (!%p3594_p4), 2475754826   ;;  %v4277_v33 = vmov (!%p3594_p4), 2131351028  }
  0x4e   :  { %v87_v5 = vand.u32 (!%p3594_p4), 2147483647, %v4416_v3  ;;  %v90_v6 = vand.u32 (!%p3594_p4), 2139095040, %v4416_v3  ;;  %v191_v7 = vand.u32 (!%p3594_p4), 2147483647, %v4418_v4  ;;  %v194_v8 = vand.u32 (!%p3594_p4), 2139095040, %v4418_v4 }
  0x4f   :  { %v4278_v35 = vmov (!%p3594_p4), 2102212464   ;;  %v4279_v37 = vmov (!%p3594_p4), 920167782   ;;  %v4280_v44 = vmov (!%p3594_p4), 1326507024  }
  0x50   :  { %v91_v9 = vshrl.u32 (!%p3594_p4), %v90_v6, 23  ;;  %v94_v10 = vand.u32 (!%p3594_p4), 8388607, %v87_v5  ;;  %v195_v11 = vshrl.u32 (!%p3594_p4), %v194_v8, 23  ;;  %v198_v12 = vand.u32 (!%p3594_p4), 8388607, %v191_v7 }
  0x51   :  { %vm89_vm15 = vcmp.lt.s32.totalorder (!%p3594_p4), %v4416_v3, 0 }
  0x52   :  { %v3595_v13 = vadd.s32 (!%p3594_p4), 4294967169, %v91_v9  ;;  %v95_v14 = vor.u32 (!%p3594_p4), 8388608, %v94_v10  ;;  %v3599_v16 = vadd.s32 (!%p3594_p4), 4294967169, %v195_v11  ;;  %v199_v18 = vor.u32 (!%p3594_p4), 8388608, %v198_v12 }
  0x54   :  { %v97_v17 = vadd.s32 1, %v3595_v13  ;;  %v201_v19 = vadd.s32 1, %v3599_v16  ;;  %v4431_v20 = vshll.u32 %v95_v14, 8  ;;  %v4433_v25 = vshll.u32 %v199_v18, 8 }
  0x56   :  { %vm98_vm1 = vcmp.gt.s32.totalorder %v97_v17, 0  ;;  %vm202_vm2 = vcmp.gt.s32.totalorder %v201_v19, 0 }
  0x57   :  { %v99_v21 = vsel %vm98_vm1, %v97_v17, 0  ;;  %v203_v24 = vsel %vm202_vm2, %v201_v19, 0  ;;  %vm88_vm1 = vcmp.le.f32.partialorder %v87_v5, 0.7853982  ;;  %vm193_vm2 = vcmp.lt.s32.totalorder %v4418_v4, 0 }
  0x58   :  { %v100_v22 = vshrl.u32 %v99_v21, 5  ;;  %v101_v23 = vand.u32 31, %v99_v21  ;;  %v4435_v26 = vshrl.u32 %v203_v24, 5  ;;  %v205_v27 = vand.u32 31, %v203_v24 }
  0x5a   :  { %v102_v28 = vsub.s32 32, %v101_v23  ;;  %v104_v30 = vshll.u32 %v4275_v29, %v101_v23  ;;  %v107_v32 = vshll.u32 %v4276_v31, %v101_v23  ;;  %v110_v34 = vshll.u32 %v4277_v33, %v101_v23 }
  0x5b   :  { %v113_v36 = vshll.u32 %v4278_v35, %v101_v23  ;;  %v116_v38 = vshll.u32 %v4279_v37, %v101_v23  ;;  %vm119_vm3 = vcmp.lt.s32.totalorder %v100_v22, 1  ;;  %vm120_vm4 = vcmp.lt.s32.totalorder %v100_v22, 2 }
  0x5c   :  { %v103_v39 = vshrl.u32 %v4275_v29, %v102_v28  ;;  %v105_v40 = vshrl.u32 %v4276_v31, %v102_v28  ;;  %v108_v41 = vshrl.u32 %v4277_v33, %v102_v28  ;;  %v111_v42 = vshrl.u32 %v4278_v35, %v102_v28 }
  0x5d   :  { %v114_v43 = vshrl.u32 %v4279_v37, %v102_v28  ;;  %v117_v45 = vshrl.u32 %v4280_v44, %v102_v28  ;;  %vm121_vm5 = vcmp.lt.s32.totalorder %v100_v22, 3  ;;  %vm122_vm6 = vcmp.lt.s32.totalorder %v100_v22, 4 }
  0x5e   :  { %v106_v46 = vor.u32 %v105_v40, %v104_v30  ;;  %v109_v47 = vor.u32 %v108_v41, %v107_v32  ;;  %v112_v48 = vor.u32 %v111_v42, %v110_v34  ;;  %v206_v49 = vsub.s32 32, %v205_v27 }
  0x5f   :  { %v115_v50 = vor.u32 %v114_v43, %v113_v36  ;;  %v118_v51 = vor.u32 %v117_v45, %v116_v38  ;;  %v208_v52 = vshll.u32 %v4275_v29, %v205_v27  ;;  %v211_v60 = vshll.u32 %v4276_v31, %v205_v27 }
  0x60   :  { %v123_v53 = vsel %vm119_vm3, %v103_v39, %v106_v46  ;;  %v124_v54 = vsel %vm122_vm6, %v112_v48, 2102212464  ;;  %v127_v55 = vsel %vm119_vm3, %v106_v46, %v109_v47  ;;  %v131_v56 = vsel %vm119_vm3, %v109_v47, %v112_v48 }
  0x61   :  { %v125_v57 = vsel %vm121_vm5, %v109_v47, %v124_v54  ;;  %v128_v58 = vsel %vm122_vm6, %v115_v50, 920167782  ;;  %v132_v59 = vsel %vm122_vm6, %v118_v51, 1326507024  ;;  %v207_v63 = vshrl.u32 %v4275_v29, %v206_v49 }
  0x62   :  { %v129_v61 = vsel %vm121_vm5, %v112_v48, %v128_v58  ;;  %v133_v62 = vsel %vm121_vm5, %v115_v50, %v132_v59  ;;  %v209_v0 = vshrl.u32 %v4276_v31, %v206_v49  ;;  %v126_v1 = vsel %vm120_vm4, %v123_v53, %v125_v57 }
  0x63   :  { %v130_v6 = vsel %vm120_vm4, %v127_v55, %v129_v61  ;;  %v134_v8 = vsel %vm120_vm4, %v131_v56, %v133_v62  ;;  %v212_v9 = vshrl.u32 %v4277_v33, %v206_v49  ;;  %v214_v16 = vshll.u32 %v4277_v33, %v205_v27 }
  0x64   :  { %v4447_v10 = vmul.u32.u64.low %v4431_v20, %v134_v8  ;;  %v4448_v11 = vmul.u32.u64.high %v4431_v20, %v134_v8, %v4447_v10  ;;  %v4451_v12 = vmul.u32.u64.low %v4431_v20, %v130_v6  ;;  %v4452_v13 = vmul.u32.u64.high %v4431_v20, %v130_v6, %v4451_v12 }
  0x65   :  { %v210_v14 = vor.u32 %v209_v0, %v208_v52  ;;  %v213_v15 = vor.u32 %v212_v9, %v211_v60  ;;  %v215_v17 = vshrl.u32 %v4278_v35, %v206_v49  ;;  %v217_v18 = vshll.u32 %v4278_v35, %v205_v27 }
  0x66   :  { %v218_v19 = vshrl.u32 %v4279_v37, %v206_v49  ;;  %v220_v21 = vshll.u32 %v4279_v37, %v205_v27  ;;  %v221_v23 = vshrl.u32 %v4280_v44, %v206_v49  ;;  %v142_v22 = vmul.u32 %v4431_v20, %v126_v1 }
  0x67   :  { %v216_v24 = vor.u32 %v215_v17, %v214_v16  ;;  %vm223_vm7 = vcmp.lt.s32.totalorder %v4435_v26, 1  ;;  %vm224_vm8 = vcmp.lt.s32.totalorder %v4435_v26, 2  ;;  %vm144_vm9 = vc.u32 %v4448_v11, %v4451_v12 }
  0x68   :  { %v145_v28 = vadd.s32 1, %v4452_v13  ;;  %v219_v29 = vor.u32 %v218_v19, %v217_v18  ;;  %vm225_vm10 = vcmp.lt.s32.totalorder %v4435_v26, 3  ;;  %v222_v30 = vor.u32 %v221_v23, %v220_v21 }
  0x69   :  { %vm226_vm11 = vcmp.lt.s32.totalorder %v4435_v26, 4  ;;  %v227_v31 = vsel %vm223_vm7, %v207_v63, %v210_v14  ;;  %v231_v27 = vsel %vm223_vm7, %v210_v14, %v213_v15  ;;  %v235_v34 = vsel %vm223_vm7, %v213_v15, %v216_v24 }
  0x6a   :  { %v146_v32 = vsel %vm144_vm9, %v145_v28, %v4452_v13  ;;  %v228_v20 = vsel %vm226_vm11, %v216_v24, 2102212464  ;;  %v232_v33 = vsel %vm226_vm11, %v219_v29, 920167782  ;;  %v236_v38 = vsel %vm226_vm11, %v222_v30, 1326507024 }
  0x6b   :  { %v147_v35 = vadd.s32 %v146_v32, %v142_v22  ;;  %v229_v36 = vsel %vm225_vm10, %v213_v15, %v228_v20  ;;  %v233_v37 = vsel %vm225_vm10, %v216_v24, %v232_v33  ;;  %v237_v41 = vsel %vm225_vm10, %v219_v29, %v236_v38 }
  0x6c   :  { %v230_v39 = vsel %vm224_vm8, %v227_v31, %v229_v36  ;;  %v234_v40 = vsel %vm224_vm8, %v231_v27, %v233_v37  ;;  %v238_v43 = vsel %vm224_vm8, %v235_v34, %v237_v41  ;;  %v143_v62 = vadd.s32 %v4451_v12, %v4448_v11 }
  0x6d   :  { %v148_v42 = vadd.s32 536870912, %v147_v35  ;;  %v4469_v44 = vmul.u32.u64.low %v4433_v25, %v234_v40  ;;  %v4470_v45 = vmul.u32.u64.high %v4433_v25, %v234_v40, %v4469_v44  ;;  %v246_v49 = vmul.u32 %v4433_v25, %v230_v39 }
  0x6e   :  { %v4473_v46 = vmul.u32.u64.low %v4433_v25, %v238_v43  ;;  %v4474_v47 = vmul.u32.u64.high %v4433_v25, %v238_v43, %v4473_v46  ;;  %vm192_vm3 = vcmp.le.f32.partialorder %v191_v7, 0.7853982  ;;  %vm179_vm7 = vweird.f32 %v4416_v3 }
  0x6f   :  { %v149_v48 = vshrl.u32 %v148_v42, 30  ;;  %v249_v51 = vadd.s32 1, %v4470_v45  ;;  %vm283_vm11 = vweird.f32 %v4418_v4 }
  0x70   :  { %vm248_vm12 = vc.u32 %v4474_v47, %v4469_v44  ;;  %v247_v19 = vadd.s32 %v4469_v44, %v4474_v47 }
  0x71   :  { %v150_v50 = vshll.u32 %v149_v48, 30  ;;  %v250_v26 = vsel %vm248_vm12, %v249_v51, %v4470_v45  ;;  %v173_v11 = vsub.s32 4, %v149_v48 }
  0x72   :  { %v251_v53 = vadd.s32 %v250_v26, %v246_v49 }
  0x73   :  { %v151_v52 = vsub.s32 %v147_v35, %v150_v50  ;;  %v174_v27 = vsel %vm89_vm15, %v173_v11, %v149_v48 }
  0x74   :  { %v252_v55 = vadd.s32 536870912, %v251_v53  ;;  %v176_v35 = vsel %vm88_vm1, 0, %v174_v27 }
  0x75   :  { %v153_v54 = vsub.s32 0, %v151_v52  ;;  %v180_v40 = vadd.s32 3, %v176_v35 }
  0x76   :  { %v253_v57 = vshrl.u32 %v252_v55, 30 }
  0x77   :  { %v3596_v56 = vmin.u32 %v153_v54, %v151_v52  ;;  %v181_v43 = vand.u32 3, %v180_v40 }
  0x78   :  { %v254_v59 = vshll.u32 %v253_v57, 30  ;;  %v277_v39 = vsub.s32 4, %v253_v57 }
  0x79   :  { %v155_v58 = vclz %v3596_v56  ;;  %vm186_vm4 = vcmp.eq.s32.totalorder %v181_v43, 2  ;;  %vm183_vm5 = vcmp.eq.s32.totalorder %v181_v43, 0  ;;  %vm182_vm6 = vcmp.lt.s32.totalorder %v181_v43, 2 }
  0x7a   :  { %v255_v61 = vsub.s32 %v251_v53, %v254_v59  ;;  %v278_v42 = vsel %vm193_vm2, %v277_v39, %v253_v57 }
  0x7b   :  { %v3597_v60 = vadd.s32 4294967294, %v155_v58  ;;  %v280_v46 = vsel %vm192_vm3, 0, %v278_v42 }
  0x7c   :  { %v257_v63 = vsub.s32 0, %v255_v61  ;;  %v284_v50 = vadd.s32 3, %v280_v46 }
  0x7d   :  { %vm3598_vm13 = vcmp.lt.s32.totalorder %v3597_v60, 0 }
  0x7e   :  { %v158_v25 = vsel %vm3598_vm13, 0, %v3597_v60  ;;  %v3600_v8 = vmin.u32 %v257_v63, %v255_v61  ;;  %v285_v7 = vand.u32 3, %v284_v50 }
  0x7f   :  { %v159_v0 = vsub.s32 32, %v158_v25  ;;  %v160_v1 = vshll.u32 %v151_v52, %v158_v25  ;;  %v163_v6 = vsub.s32 4294967266, %v158_v25 }
  0x80   :  { %v259_v13 = vclz %v3600_v8  ;;  %vm290_vm8 = vcmp.eq.s32.totalorder %v285_v7, 2  ;;  %vm287_vm9 = vcmp.eq.s32.totalorder %v285_v7, 0  ;;  %vm286_vm10 = vcmp.lt.s32.totalorder %v285_v7, 2 }
  0x81   :  { %v161_v9 = vshrl.u32 %v143_v62, %v159_v0  ;;  %v164_v10 = vadd.s32 127, %v163_v6 }
  0x82   :  { %v3601_v16 = vadd.s32 4294967294, %v259_v13 }
  0x83   :  { %v162_v14 = vor.u32 %v161_v9, %v160_v1  ;;  %v165_v15 = vshll.u32 %v164_v10, 23 }
  0x84   :  { %vm3602_vm14 = vcmp.lt.s32.totalorder %v3601_v16, 0 }
  0x85   :  { %v166_v17 = vor.u32 4788187, %v165_v15  ;;  %v169_v18 = vcvt.s32.f32 %v162_v14  ;;  %v262_v12 = vsel %vm3602_vm14, 0, %v3601_v16 }
  0x86   :  { %v263_v23 = vsub.s32 32, %v262_v12  ;;  %v264_v22 = vshll.u32 %v255_v61, %v262_v12  ;;  %v267_v24 = vsub.s32 4294967266, %v262_v12 }
  0x87   :  { %v167_v21 = vand.u32 2147483647, %v166_v17 }
  0x88   :  { %v265_v29 = vshrl.u32 %v247_v19, %v263_v23  ;;  %v268_v30 = vadd.s32 127, %v267_v24 }
  0x89   :  { %v170_v28 = vmul.f32 %v169_v18, %v167_v21 }
  0x8a   :  { %v266_v32 = vor.u32 %v265_v29, %v264_v22  ;;  %v269_v20 = vshll.u32 %v268_v30, 23 }
  0x8b   :  { %v171_v31 = vxor.u32 2147483648, %v170_v28 }
  0x8c   :  { %v270_v36 = vor.u32 4788187, %v269_v20  ;;  %v273_v37 = vcvt.s32.f32 %v266_v32 }
  0x8d   :  { %v172_v33 = vsel %vm89_vm15, %v171_v31, %v170_v28 }
  0x8e   :  { %v175_v34 = vsel %vm88_vm1, %v4416_v3, %v172_v33  ;;  %v271_v38 = vand.u32 2147483647, %v270_v36 }
  0x8f   :  { %3953 = vcosq.f32 %v175_v34 }
  0x90   :  { %3955 = vsinq.f32 %v175_v34  ;;  %v274_v41 = vmul.f32 %v273_v37, %v271_v38 }
  0x92   :  { %v275_v5 = vxor.u32 2147483648, %v274_v41 }
  0x94   :  { %v276_v44 = vsel %vm193_vm2, %v275_v5, %v274_v41 }
  0x95   :  { %v279_v45 = vsel %vm192_vm3, %v4418_v4, %v276_v44 }
  0x96   :  { %3957 = vcosq.f32 %v279_v45 }
  0x97   :  { %3959 = vsinq.f32 %v279_v45 }
  0x99   :  { %v3954_v47 = vpop.eup %3953 }
  0x9a   :  { %v3956_v48 = vpop.eup %3955  ;;  %v187_v49 = vxor.u32 2147483648, %v3954_v47 }
  0x9b   :  { %v184_v51 = vxor.u32 2147483648, %v3956_v48 }
  0x9c   :  { %v188_v52 = vsel %vm186_vm4, %v187_v49, %v3956_v48 }
  0x9d   :  { %v185_v26 = vsel %vm183_vm5, %v3954_v47, %v184_v51 }
  0x9e   :  { %v189_v53 = vsel %vm182_vm6, %v185_v26, %v188_v52 }
  0x9f   :  { %v190_v55 = vsel %vm179_vm7, nan, %v189_v53 }
  0xa0   :  { %v3958_v54 = vpop.eup %3957  ;;  %v295_v60 = vmul.f32 2.0, %v190_v55 }
  0xa1   :  { %v3960_v56 = vpop.eup %3959  ;;  %v291_v57 = vxor.u32 2147483648, %v3958_v54 }
  0xa2   :  { %v288_v58 = vxor.u32 2147483648, %v3960_v56 }
  0xa3   :  { %v292_v59 = vsel %vm290_vm8, %v291_v57, %v3960_v56  ;;  %v3932_v56 = vld [vmem:[#allocation7 + $0x14] ss:$8 sps:$4 sm:$0xff]   ;;  %v3934_v57 = vld [vmem:[#allocation7 + $0x10] ss:$8 sps:$4 sm:$0xff]  }
  0xa4   :  { %v289_v61 = vsel %vm287_vm9, %v3958_v54, %v288_v58 }
  0xa5   :  { %v293_v62 = vsel %vm286_vm10, %v289_v61, %v292_v59 }
  0xa6   :  { %v294_v25 = vsel %vm283_vm11, nan, %v293_v62 }
  0xa7   :  { %v296_v63 = vmul.f32 %v295_v60, %v294_v25  ;;  %v297_v0 = vsub.f32 %v294_v25, %v190_v55  ;;  %v298_v1 = vadd.f32 %v294_v25, %v190_v55  ;;  %v340_v3 = vpack.c.bf16 %v294_v25, %v190_v55  ;;  %v3929_v55 = vld [vmem:[#allocation7] ss:$8 sps:$4 sm:$0xff]  }
  0xa9   :  { %v299_v6 = vmul.f32 %v298_v1, %v297_v0  ;;  %408 = vmatpush1.bf16.msra.mxu0 %v340_v3  ;;  %v300_v8 = vmul.f32 2.0, %v296_v63 }
  0xaa   :  { %409 = vmatprep.subr.bf16.mxu0 %v4274_v2 }
  0xab   :  { %v341_v9 = vpack.c.bf16 %v299_v6, %v296_v63  ;;  %v301_v10 = vmul.f32 %v300_v8, %v299_v6  ;;  %v302_v13 = vsub.f32 %v299_v6, %v296_v63  ;;  %v303_v14 = vadd.f32 %v299_v6, %v296_v63 }
  0xad   :  { %410 = vmatpush1.bf16.msra.mxu0 %v341_v9  ;;  %v304_v4 = vmul.f32 %v303_v14, %v302_v13  ;;  %v305_v15 = vmul.f32 2.0, %v301_v10 }
  0xae   :  { %411 = vmatprep.subr.bf16.mxu0 %v4274_v2 }
  0xaf   :  { %v342_v16 = vpack.c.bf16 %v304_v4, %v301_v10  ;;  %v306_v17 = vmul.f32 %v305_v15, %v304_v4  ;;  %v307_v18 = vsub.f32 %v304_v4, %v301_v10  ;;  %v308_v19 = vadd.f32 %v304_v4, %v301_v10 }
  0xb1   :  { %412 = vmatpush1.bf16.msra.mxu0 %v342_v16  ;;  %v309_v21 = vmul.f32 %v308_v19, %v307_v18  ;;  %v310_v11 = vmul.f32 2.0, %v306_v17 }
  0xb2   :  { %413 = vmatprep.subr.bf16.mxu0 %v4274_v2 }
  0xb3   :  { %v343_v12 = vpack.c.bf16 %v309_v21, %v306_v17  ;;  %v311_v23 = vmul.f32 %v310_v11, %v309_v21  ;;  %v312_v22 = vsub.f32 %v309_v21, %v306_v17  ;;  %v313_v24 = vadd.f32 %v309_v21, %v306_v17 }
  0xb5   :  { %414 = vmatpush1.bf16.msra.mxu0 %v343_v12  ;;  %v314_v28 = vmul.f32 %v313_v24, %v312_v22  ;;  %v315_v29 = vmul.f32 2.0, %v311_v23 }
  0xb6   :  { %415 = vmatprep.subr.bf16.mxu0 %v4274_v2 }
  0xb7   :  { %v344_v30 = vpack.c.bf16 %v314_v28, %v311_v23  ;;  %v316_v31 = vmul.f32 %v315_v29, %v314_v28  ;;  %v317_v27 = vsub.f32 %v314_v28, %v311_v23  ;;  %v318_v32 = vadd.f32 %v314_v28, %v311_v23 }
  0xb9   :  { %416 = vmatpush1.bf16.msra.mxu0 %v344_v30  ;;  %v319_v20 = vmul.f32 %v318_v32, %v317_v27  ;;  %v320_v33 = vmul.f32 2.0, %v316_v31 }
  0xba   :  { %417 = vmatprep.subr.bf16.mxu0 %v4274_v2 }
  0xbb   :  { %v345_v34 = vpack.c.bf16 %v319_v20, %v316_v31  ;;  %v321_v35 = vmul.f32 %v320_v33, %v319_v20  ;;  %v322_v36 = vsub.f32 %v319_v20, %v316_v31  ;;  %v323_v37 = vadd.f32 %v319_v20, %v316_v31 }
  0xbd   :  { %418 = vmatpush1.bf16.msra.mxu0 %v345_v34  ;;  %v324_v38 = vmul.f32 %v323_v37, %v322_v36  ;;  %v325_v39 = vmul.f32 2.0, %v321_v35 }
  0xbe   :  { %419 = vmatprep.subr.bf16.mxu0 %v4274_v2 }
  0xbf   :  { %v346_v40 = vpack.c.bf16 %v324_v38, %v321_v35  ;;  %v326_v41 = vmul.f32 %v325_v39, %v324_v38  ;;  %v327_v5 = vsub.f32 %v324_v38, %v321_v35  ;;  %v328_v42 = vadd.f32 %v324_v38, %v321_v35 }
  0xc1   :  { %420 = vmatpush1.bf16.msra.mxu0 %v346_v40  ;;  %v329_v43 = vmul.f32 %v328_v42, %v327_v5  ;;  %v330_v44 = vmul.f32 2.0, %v326_v41  ;;  %v4522_v40 = vld [vmem:[#allocation10] sm:$0xff] }
  0xc2   :  { %421 = vmatprep.subr.bf16.mxu0 %v4274_v2 }
  0xc3   :  { %v347_v45 = vpack.c.bf16 %v329_v43, %v326_v41  ;;  %v331_v46 = vmul.f32 %v330_v44, %v329_v43  ;;  %v332_v47 = vsub.f32 %v329_v43, %v326_v41  ;;  %v333_v48 = vadd.f32 %v329_v43, %v326_v41  ;;  %v4525_v43 = vld [vmem:[#allocation10 + $0x8] sm:$0xff] }
  0xc5   :  { %422 = vmatpush1.bf16.msra.mxu0 %v347_v45  ;;  %v334_v49 = vmul.f32 %v333_v48, %v332_v47  ;;  %v335_v50 = vmul.f32 2.0, %v331_v46  ;;  %v4529_v48 = vld [vmem:[#allocation10 + $0x10] sm:$0xff] }
  0xc6   :  { %423 = vmatprep.subr.bf16.mxu0 %v4274_v2 }
  0xc7   :  { %v348_v51 = vpack.c.bf16 %v334_v49, %v331_v46  ;;  %v336_v52 = vmul.f32 %v335_v50, %v334_v49  ;;  %v337_v26 = vsub.f32 %v334_v49, %v331_v46  ;;  %v338_v7 = vadd.f32 %v334_v49, %v331_v46  ;;  %v4532_v50 = vld [vmem:[#allocation10 + $0x18] sm:$0xff] }
  0xc9   :  { %424 = vmatpush1.bf16.msra.mxu0 %v348_v51  ;;  %v339_v53 = vmul.f32 %v338_v7, %v337_v26 }
  0xca   :  { %425 = vmatprep.subr.bf16.mxu0 %v4274_v2 }
  0xcb   :  { %v349_v54 = vpack.c.bf16 %v339_v53, %v336_v52  ;;  %v4282_v53 = vmov 1  }
  0xcd   :  { %426 = vmatpush1.bf16.msra.mxu0 %v349_v54 }
  0xd0   :  { %440 = vmatmul.mubr.bf16.vlgmr.msra.gmra.mrb[0].mxu0 %v3929_v55  ;;  %v3935_v55 = vld [vmem:[#allocation7 + $0x24] ss:$8 sps:$4 sm:$0xff]  }
  0xd1   :  { %3612 = vmatprep.mubr.msk.bf16.mxu0 %vm394_vm0, %v3932_v56  ;;  %v3937_v56 = vld [vmem:[#allocation7 + $0x20] ss:$8 sps:$4 sm:$0xff]  }
  0xd8   :  { %448 = vmatmul.mubr.bf16.gmra.mrb[4].mxu0 %v3934_v57 }
  0xd9   :  { %3613 = vmatprep.mubr.msk.bf16.mxu0 %vm394_vm0, %v3935_v55 }
  0xe0   :  { %456 = vmatmul.mubr.bf16.gmra.mrb[8].mxu0 %v3937_v56 }
 0x1a3   :  { %v4502_v58 = vpop.f32.mrb[0].mxu0 }
 0x1a4   :  { %476 = vadd.xlane.f32.xlu0 %v4502_v58  ;;  %v443_v59 = vpop.f32.mrb[1].mxu0  ;;  %v484_v60 = vmul.f32 %v4502_v58, %v4502_v58 }
 0x1a5   :  { %v4507_v61 = vpop.f32.mrb[2].mxu0 }
 0x1a6   :  { %488 = vadd.xlane.f32.xlu1 %v484_v60  ;;  %v446_v2 = vpop.f32.mrb[3].mxu0  ;;  %v485_v62 = vmul.f32 %v4507_v61, %v4507_v61 }
 0x1a8   :  { %478 = vadd.xlane.f32.xlu0 %v4507_v61 }
 0x1aa   :  { %490 = vadd.xlane.f32.xlu1 %v485_v62 }
 0x1ab   :  { %v4512_v25 = vpop.f32.mrb[4].mxu0 }
 0x1ac   :  { %480 = vadd.xlane.f32.xlu0 %v4512_v25  ;;  %v451_v63 = vpop.f32.mrb[5].mxu0  ;;  %v486_v3 = vmul.f32 %v4512_v25, %v4512_v25 }
 0x1ad   :  { %v4515_v0 = vpop.f32.mrb[6].mxu0 }
 0x1ae   :  { %482 = vadd.xlane.f32.xlu1 %v4515_v0  ;;  %v454_v1 = vpop.f32.mrb[7].mxu0  ;;  %v487_v6 = vmul.f32 %v4515_v0, %v4515_v0 }
 0x1b0   :  { %492 = vadd.xlane.f32.xlu0 %v486_v3 }
 0x1b2   :  { %494 = vadd.xlane.f32.xlu1 %v487_v6  ;;  %v3938_v6 = vld [vmem:[#allocation7 + $0x34] ss:$8 sps:$4 sm:$0xff]  }
 0x1b3   :  { %3614 = vmatprep.mubr.msk.bf16.mxu0 %vm394_vm0, %v3938_v6 }
 0x231   :  { %v477_v8 = vpop.xlane.xlu0 %476 }
 0x232   :  { %v496_v9 = vmul.f32 0.0078125, %v477_v8  ;;  %v3940_v8 = vld [vmem:[#allocation7 + $0x30] ss:$8 sps:$4 sm:$0xff]  }
 0x233   :  { %v489_v10 = vpop.xlane.xlu1 %488  ;;  %464 = vmatmul.mubr.bf16.gmra.mrb[12].mxu0 %v3940_v8 }
 0x234   :  { %v504_v13 = vmul.f32 %v496_v9, %v496_v9  ;;  %v500_v14 = vmul.f32 0.0078125, %v489_v10 }
 0x235   :  { %v479_v4 = vpop.xlane.xlu0 %478 }
 0x236   :  { %v508_v15 = vsub.f32 %v500_v14, %v504_v13  ;;  %v497_v16 = vmul.f32 0.0078125, %v479_v4  ;;  %v4545_v4 = vpop.f32.mrb[8].mxu0 }
 0x237   :  { %v491_v17 = vpop.xlane.xlu1 %490 }
 0x238   :  { %v512_v18 = vmax.f32 %v508_v15, 0.0  ;;  %v505_v19 = vmul.f32 %v497_v16, %v497_v16  ;;  %v501_v21 = vmul.f32 0.0078125, %v491_v17  ;;  %v459_v15 = vpop.f32.mrb[9].mxu0 }
 0x239   :  { %v481_v11 = vpop.xlane.xlu0 %480  ;;  %v4548_v17 = vpop.f32.mrb[10].mxu0 }
 0x23a   :  { %v516_v12 = vadd.f32 1e-05, %v512_v18  ;;  %v509_v23 = vsub.f32 %v501_v21, %v505_v19  ;;  %v498_v22 = vmul.f32 0.0078125, %v481_v11  ;;  %v808_v18 = vmul.f32 %v4548_v17, %v4548_v17  ;;  %v462_v19 = vpop.f32.mrb[11].mxu0 }
 0x23b   :  { %v483_v24 = vpop.xlane.xlu1 %482  ;;  %v4284_v19 = vmov 2  }
 0x23c   :  { %3961 = vrsqrt.f32 %v516_v12  ;;  %v513_v28 = vmax.f32 %v509_v23, 0.0  ;;  %v499_v29 = vmul.f32 0.0078125, %v483_v24  ;;  %v506_v27 = vmul.f32 %v498_v22, %v498_v22 }
 0x23d   :  { %v493_v30 = vpop.xlane.xlu0 %492  ;;  %v807_v12 = vmul.f32 %v4545_v4, %v4545_v4 }
 0x23e   :  { %v517_v31 = vadd.f32 1e-05, %v513_v28  ;;  %v502_v32 = vmul.f32 0.0078125, %v493_v30  ;;  %v507_v33 = vmul.f32 %v499_v29, %v499_v29 }
 0x23f   :  { %v495_v20 = vpop.xlane.xlu1 %494 }
 0x240   :  { %3963 = vrsqrt.f32 %v517_v31  ;;  %v510_v34 = vsub.f32 %v502_v32, %v506_v27  ;;  %v503_v35 = vmul.f32 0.0078125, %v495_v20 }
 0x242   :  { %v514_v36 = vmax.f32 %v510_v34, 0.0  ;;  %v511_v37 = vsub.f32 %v503_v35, %v507_v33 }
 0x244   :  { %v518_v38 = vadd.f32 1e-05, %v514_v36  ;;  %v515_v39 = vmax.f32 %v511_v37, 0.0  ;;  %v3942_v37 = vld [vmem:[#allocation9 + $0x8] sm:$0xff]  }
 0x246   :  { %v3962_v41 = vpop.eup %3961  ;;  %3965 = vrsqrt.f32 %v518_v38  ;;  %v519_v5 = vadd.f32 1e-05, %v515_v39 }
 0x247   :  { %v524_v42 = vmul.f32 %v3962_v41, %v4522_v40 }
 0x248   :  { %3967 = vrsqrt.f32 %v519_v5 }
 0x249   :  { %v552_v44 = vmul.f32 %v524_v42, %v496_v9  ;;  %v3941_v9 = vld [vmem:[#allocation9] sm:$0xff]  }
 0x24a   :  { %v3964_v45 = vpop.eup %3963  ;;  %3737 = vmatprep.mubr.msk.bf16.mxu1 %vm394_vm0, %v3941_v9 }
 0x24b   :  { %560 = vrot.lane.b32.xlu0 %v552_v44, %s4281_s4  ;;  %v525_v46 = vmul.f32 %v3964_v45, %v4525_v43 }
 0x24d   :  { %v553_v47 = vmul.f32 %v525_v46, %v497_v16 }
 0x24f   :  { %530 = vperm.xlu0 %3897, %v524_v42   ;;  %562 = vrot.lane.b32.xlu1 %v553_v47, %s4281_s4 }
 0x250   :  { %v3966_v49 = vpop.eup %3965 }
 0x251   :  { %v526_v51 = vmul.f32 %v3966_v49, %v4529_v48 }
 0x252   :  { %v3968_v52 = vpop.eup %3967 }
 0x253   :  { %v554_v26 = vmul.f32 %v526_v51, %v498_v22  ;;  %v527_v7 = vmul.f32 %v3968_v52, %v4532_v50  ;;  %3900 = vset.pattern.permute.xlu0 %v4282_v53 }
 0x255   :  { %564 = vrot.lane.b32.xlu1 %v554_v26, %s4281_s4  ;;  %v555_v54 = vmul.f32 %v527_v7, %v499_v29 }
 0x259   :  { %566 = vrot.lane.b32.xlu1 %v555_v54, %s4281_s4 }
 0x25d   :  { %535 = vperm.xlu1 %3898, %v525_v46  }
 0x261   :  { %540 = vperm.xlu1 %3898, %v526_v51  }
 0x265   :  { %545 = vperm.xlu1 %3898, %v527_v7  }
 0x269   :  { %3899 = vset.pattern.permute.xlu1 %v4282_v53 }
 0x2bd   :  { %v561_v57 = vpop.permute.xlu0 %560 }
 0x2be   :  { %v572_v59 = vsub.f32 %v4522_v40, %v561_v57 }
 0x2c0   :  { %578 = vperm.xlu1 %3899, %v572_v59  }
 0x2c1   :  { %v563_v60 = vpop.permute.xlu1 %562 }
 0x2c2   :  { %v573_v2 = vsub.f32 %v4525_v43, %v563_v60 }
 0x2c4   :  { %583 = vperm.xlu0 %3900, %v573_v2  }
 0x2c7   :  { %v565_v62 = vpop.permute.xlu1 %564 }
 0x2c8   :  { %v574_v63 = vsub.f32 %v4529_v48, %v565_v62 }
 0x2ca   :  { %588 = vperm.xlu0 %3900, %v574_v63  }
 0x2cb   :  { %v567_v1 = vpop.permute.xlu1 %566 }
 0x2cc   :  { %v575_v3 = vsub.f32 %v4532_v50, %v567_v1 }
 0x2ce   :  { %593 = vperm.xlu1 %3899, %v575_v3   ;;  %v531_v16 = vpop.permute.xlu0 %530 }
 0x2cf   :  { %v548_v11 = vmul.f32 %v531_v16, %v4502_v58 }
 0x2d2   :  { %3901 = vset.pattern.permute.xlu1 %v4284_v19 }
 0x2dc   :  { %v536_v10 = vpop.permute.xlu1 %535 }
 0x2dd   :  { %v549_v23 = vmul.f32 %v536_v10, %v4507_v61 }
 0x2e0   :  { %v541_v13 = vpop.permute.xlu1 %540 }
 0x2e1   :  { %v550_v32 = vmul.f32 %v541_v13, %v4512_v25 }
 0x2e4   :  { %v546_v14 = vpop.permute.xlu1 %545 }
 0x2e5   :  { %v551_v58 = vmul.f32 %v546_v14, %v4515_v0 }
 0x2e9   :  { %799 = vadd.xlane.f32.xlu0 %v4545_v4 }
 0x2ed   :  { %801 = vadd.xlane.f32.xlu0 %v4548_v17 }
 0x2f1   :  { %811 = vadd.xlane.f32.xlu0 %v807_v12 }
 0x2f2   :  { %813 = vadd.xlane.f32.xlu1 %v808_v18  ;;  %v4283_v18 = vmov 4  }
 0x2f3   :  { %3903 = vset.pattern.permute.xlu0 %v4283_v18 }
 0x306   :  { %v4560_v38 = vpop.f32.mrb[12].mxu0 }
 0x307   :  { %v467_v39 = vpop.f32.mrb[13].mxu0  ;;  %803 = vadd.xlane.f32.xlu0 %v4560_v38  ;;  %v809_v3 = vmul.f32 %v4560_v38, %v4560_v38 }
 0x308   :  { %v4563_v25 = vpop.f32.mrb[14].mxu0 }
 0x309   :  { %v470_v41 = vpop.f32.mrb[15].mxu0  ;;  %805 = vadd.xlane.f32.xlu1 %v4563_v25  ;;  %v810_v8 = vmul.f32 %v4563_v25, %v4563_v25 }
 0x33f   :  { %v579_v21 = vpop.permute.xlu1 %578 }
 0x340   :  { %v596_v22 = vadd.f32 %v579_v21, %v548_v11 }
 0x342   :  { %v600_v29 = vmax.f32 %v596_v22, 0.0 }
 0x343   :  { %v584_v24 = vpop.permute.xlu0 %583 }
 0x344   :  { %v597_v28 = vadd.f32 %v584_v24, %v549_v23 }
 0x346   :  { %v601_v30 = vmax.f32 %v597_v28, 0.0 }
 0x348   :  { %v608_v31 = vpack.c.bf16 %v601_v30, %v600_v29 }
 0x349   :  { %v589_v27 = vpop.permute.xlu0 %588 }
 0x34a   :  { %3733 = vmatprep.subr.bf16.mxu1 %v608_v31  ;;  %v598_v20 = vadd.f32 %v589_v27, %v550_v32 }
 0x34b   :  { %3734 = vmatpush3.bf16.msra.mxu1 %v608_v31 }
 0x34c   :  { %v602_v35 = vmax.f32 %v598_v20, 0.0 }
 0x34d   :  { %v594_v33 = vpop.permute.xlu1 %593 }
 0x34e   :  { %v599_v34 = vadd.f32 %v594_v33, %v551_v58 }
 0x350   :  { %v603_v36 = vmax.f32 %v599_v34, 0.0 }
 0x352   :  { %v609_v61 = vpack.c.bf16 %v603_v36, %v602_v35 }
 0x354   :  { %3735 = vmatprep.subr.bf16.mxu1 %v609_v61 }
 0x355   :  { %3736 = vmatpush3.bf16.msra.mxu1 %v609_v61 }
 0x358   :  { %3738 = vmatmul.mubr.msk.bf16.vlgmr.msra.gmra.mrb[0].mxu1 %vm394_vm0, %v3942_v37 }
 0x376   :  { %v800_v0 = vpop.xlane.xlu0 %799 }
 0x377   :  { %v819_v42 = vmul.f32 0.0078125, %v800_v0 }
 0x379   :  { %v827_v45 = vmul.f32 %v819_v42, %v819_v42 }
 0x37a   :  { %v802_v5 = vpop.xlane.xlu0 %801 }
 0x37b   :  { %v820_v46 = vmul.f32 0.0078125, %v802_v5 }
 0x37d   :  { %v828_v53 = vmul.f32 %v820_v46, %v820_v46 }
 0x37e   :  { %v812_v44 = vpop.xlane.xlu0 %811 }
 0x37f   :  { %v823_v47 = vmul.f32 0.0078125, %v812_v44  ;;  %v814_v51 = vpop.xlane.xlu1 %813 }
 0x380   :  { %v824_v55 = vmul.f32 0.0078125, %v814_v51 }
 0x381   :  { %v831_v54 = vsub.f32 %v823_v47, %v827_v45 }
 0x382   :  { %v832_v59 = vsub.f32 %v824_v55, %v828_v53 }
 0x383   :  { %v835_v57 = vmax.f32 %v831_v54, 0.0 }
 0x384   :  { %v836_v63 = vmax.f32 %v832_v59, 0.0 }
 0x385   :  { %v839_v62 = vadd.f32 1e-05, %v835_v57 }
 0x386   :  { %v840_v6 = vadd.f32 1e-05, %v836_v63 }
 0x387   :  { %3969 = vrsqrt.f32 %v839_v62 }
 0x388   :  { %3971 = vrsqrt.f32 %v840_v6 }
 0x391   :  { %v3970_v9 = vpop.eup %3969 }
 0x392   :  { %v4591_v10 = vmul.f32 %v3970_v9, %v4522_v40  ;;  %v3972_v13 = vpop.eup %3971 }
 0x393   :  { %v4595_v15 = vmul.f32 %v3972_v13, %v4525_v43 }
 0x394   :  { %v875_v14 = vmul.f32 %v4591_v10, %v819_v42  ;;  %v804_v21 = vpop.xlane.xlu0 %803 }
 0x395   :  { %v876_v16 = vmul.f32 %v4595_v15, %v820_v46  ;;  %v821_v0 = vmul.f32 0.0078125, %v804_v21 }
 0x396   :  { %v806_v11 = vpop.xlane.xlu1 %805 }
 0x397   :  { %v822_v5 = vmul.f32 0.0078125, %v806_v11  ;;  %v829_v57 = vmul.f32 %v821_v0, %v821_v0 }
 0x399   :  { %v830_v59 = vmul.f32 %v822_v5, %v822_v5 }
 0x42b   :  { %v4566_v49 = vpop.f32.mrb[0].mxu1 }
 0x42c   :  { %v4568_v52 = vpop.f32.mrb[1].mxu1  ;;  %679 = vadd.xlane.f32.xlu0 %v4566_v49  ;;  %v685_v56 = vmul.f32 %v4566_v49, %v4566_v49 }
 0x42d   :  { %v4571_v26 = vpop.f32.mrb[2].mxu1  ;;  %v683_v2 = vmul.f32 %v4568_v52, %v4568_v52 }
 0x42e   :  { %v4573_v7 = vpop.f32.mrb[3].mxu1  ;;  %681 = vadd.xlane.f32.xlu1 %v4571_v26  ;;  %v686_v60 = vmul.f32 %v4571_v26, %v4571_v26 }
 0x42f   :  { %v684_v1 = vmul.f32 %v4573_v7, %v4573_v7 }
 0x430   :  { %675 = vadd.xlane.f32.xlu0 %v4568_v52 }
 0x432   :  { %677 = vadd.xlane.f32.xlu1 %v4573_v7 }
 0x434   :  { %691 = vadd.xlane.f32.xlu0 %v685_v56 }
 0x436   :  { %693 = vadd.xlane.f32.xlu1 %v686_v60 }
 0x438   :  { %687 = vadd.xlane.f32.xlu0 %v683_v2 }
 0x43a   :  { %689 = vadd.xlane.f32.xlu1 %v684_v1 }
 0x43c   :  { %815 = vadd.xlane.f32.xlu0 %v809_v3 }
 0x43e   :  { %817 = vadd.xlane.f32.xlu1 %v810_v8 }
 0x44f   :  { %883 = vrot.lane.b32.xlu1 %v875_v14, %s4281_s4 }
 0x453   :  { %885 = vrot.lane.b32.xlu1 %v876_v16, %s4281_s4 }
 0x4b9   :  { %v680_v12 = vpop.xlane.xlu0 %679 }
 0x4ba   :  { %v697_v24 = vmul.f32 0.0078125, %v680_v12 }
 0x4bb   :  { %v682_v23 = vpop.xlane.xlu1 %681 }
 0x4bc   :  { %v698_v29 = vmul.f32 0.0078125, %v682_v23  ;;  %v705_v31 = vmul.f32 %v697_v24, %v697_v24 }
 0x4bd   :  { %v676_v22 = vpop.xlane.xlu0 %675 }
 0x4be   :  { %v695_v27 = vmul.f32 0.0078125, %v676_v22  ;;  %v706_v33 = vmul.f32 %v698_v29, %v698_v29 }
 0x4bf   :  { %v678_v28 = vpop.xlane.xlu1 %677 }
 0x4c0   :  { %v696_v58 = vmul.f32 0.0078125, %v678_v28  ;;  %v703_v61 = vmul.f32 %v695_v27, %v695_v27 }
 0x4c1   :  { %v692_v30 = vpop.xlane.xlu0 %691 }
 0x4c2   :  { %v701_v32 = vmul.f32 0.0078125, %v692_v30  ;;  %v704_v42 = vmul.f32 %v696_v58, %v696_v58 }
 0x4c3   :  { %v694_v20 = vpop.xlane.xlu1 %693 }
 0x4c4   :  { %v709_v34 = vsub.f32 %v701_v32, %v705_v31  ;;  %v702_v35 = vmul.f32 0.0078125, %v694_v20 }
 0x4c5   :  { %v688_v36 = vpop.xlane.xlu0 %687 }
 0x4c6   :  { %v713_v37 = vmax.f32 %v709_v34, 0.0  ;;  %v710_v39 = vsub.f32 %v702_v35, %v706_v33  ;;  %v699_v41 = vmul.f32 0.0078125, %v688_v36 }
 0x4c7   :  { %v690_v44 = vpop.xlane.xlu1 %689 }
 0x4c8   :  { %v717_v45 = vadd.f32 1e-05, %v713_v37  ;;  %v714_v46 = vmax.f32 %v710_v39, 0.0  ;;  %v707_v47 = vsub.f32 %v699_v41, %v703_v61  ;;  %v700_v51 = vmul.f32 0.0078125, %v690_v44 }
 0x4c9   :  { %v816_v53 = vpop.xlane.xlu0 %815 }
 0x4ca   :  { %3973 = vrsqrt.f32 %v717_v45  ;;  %v718_v54 = vadd.f32 1e-05, %v714_v46  ;;  %v711_v55 = vmax.f32 %v707_v47, 0.0  ;;  %v708_v56 = vsub.f32 %v700_v51, %v704_v42 }
 0x4cb   :  { %v825_v60 = vmul.f32 0.0078125, %v816_v53  ;;  %v818_v2 = vpop.xlane.xlu1 %817 }
 0x4cc   :  { %3975 = vrsqrt.f32 %v718_v54  ;;  %v715_v62 = vadd.f32 1e-05, %v711_v55  ;;  %v712_v63 = vmax.f32 %v708_v56, 0.0  ;;  %v826_v1 = vmul.f32 0.0078125, %v818_v2  ;;  %v3943_v55 = vld [vmem:[#allocation9 + $0x10] sm:$0xff]  }
 0x4cd   :  { %v833_v3 = vsub.f32 %v825_v60, %v829_v57  ;;  %3745 = vmatprep.mubr.msk.bf16.mxu1 %vm394_vm0, %v3943_v55 }
 0x4ce   :  { %3977 = vrsqrt.f32 %v715_v62  ;;  %v716_v6 = vadd.f32 1e-05, %v712_v63  ;;  %v834_v8 = vsub.f32 %v826_v1, %v830_v59 }
 0x4cf   :  { %v837_v9 = vmax.f32 %v833_v3, 0.0 }
 0x4d0   :  { %3979 = vrsqrt.f32 %v716_v6  ;;  %v838_v13 = vmax.f32 %v834_v8, 0.0 }
 0x4d1   :  { %v841_v14 = vadd.f32 1e-05, %v837_v9 }
 0x4d2   :  { %v842_v16 = vadd.f32 1e-05, %v838_v13 }
 0x4d3   :  { %3981 = vrsqrt.f32 %v841_v14 }
 0x4d4   :  { %v3974_v21 = vpop.eup %3973  ;;  %3983 = vrsqrt.f32 %v842_v16 }
 0x4d5   :  { %v725_v11 = vmul.f32 %v3974_v21, %v4529_v48 }
 0x4d6   :  { %v3976_v12 = vpop.eup %3975 }
 0x4d7   :  { %v753_v23 = vmul.f32 %v725_v11, %v697_v24  ;;  %v726_v22 = vmul.f32 %v3976_v12, %v4532_v50 }
 0x4d8   :  { %v3978_v28 = vpop.eup %3977 }
 0x4d9   :  { %763 = vrot.lane.b32.xlu0 %v753_v23, %s4281_s4  ;;  %v754_v30 = vmul.f32 %v726_v22, %v698_v29  ;;  %v723_v31 = vmul.f32 %v3978_v28, %v4522_v40 }
 0x4da   :  { %v3980_v32 = vpop.eup %3979 }
 0x4db   :  { %765 = vrot.lane.b32.xlu1 %v754_v30, %s4281_s4  ;;  %v751_v20 = vmul.f32 %v723_v31, %v695_v27  ;;  %v724_v33 = vmul.f32 %v3980_v32, %v4525_v43  ;;  %v884_v27 = vpop.permute.xlu1 %883 }
 0x4dc   :  { %v895_v39 = vsub.f32 %v4522_v40, %v884_v27 }
 0x4dd   :  { %v3982_v34 = vpop.eup %3981  ;;  %759 = vrot.lane.b32.xlu0 %v751_v20, %s4281_s4  ;;  %v752_v35 = vmul.f32 %v724_v33, %v696_v58  ;;  %v4285_v58 = vmov 5  }
 0x4de   :  { %v3984_v36 = vpop.eup %3983  ;;  %v849_v24 = vmul.f32 %v3982_v34, %v4529_v48 }
 0x4df   :  { %761 = vrot.lane.b32.xlu1 %v752_v35, %s4281_s4  ;;  %v850_v61 = vmul.f32 %v3984_v36, %v4532_v50  ;;  %v886_v41 = vpop.permute.xlu1 %885 }
 0x4e0   :  { %v877_v29 = vmul.f32 %v849_v24, %v821_v0  ;;  %v896_v0 = vsub.f32 %v4525_v43, %v886_v41 }
 0x4e1   :  { %v878_v37 = vmul.f32 %v850_v61, %v822_v5 }
 0x4e2   :  { %887 = vrot.lane.b32.xlu0 %v877_v29, %s4281_s4 }
 0x4e3   :  { %889 = vrot.lane.b32.xlu1 %v878_v37, %s4281_s4 }
 0x4e6   :  { %858 = vperm.xlu0 %3903, %v4595_v15   ;;  %v4286_v15 = vmov 3  }
 0x4e7   :  { %734 = vperm.xlu1 %3901, %v724_v33  }
 0x4ea   :  { %3904 = vset.pattern.permute.xlu0 %v4285_v58 }
 0x4eb   :  { %901 = vperm.xlu0 %3904, %v895_v39   ;;  %3902 = vset.pattern.permute.xlu1 %v4283_v18  ;;  %v3944_v39 = vld [vmem:[#allocation9 + $0x18] sm:$0xff]  }
 0x4ec   :  { %853 = vperm.xlu1 %3902, %v4591_v10  }
 0x4ef   :  { %3905 = vset.pattern.permute.xlu0 %v4284_v19 }
 0x4f0   :  { %729 = vperm.xlu0 %3905, %v723_v31   ;;  %3906 = vset.pattern.permute.xlu1 %v4285_v58 }
 0x4f1   :  { %906 = vperm.xlu1 %3906, %v896_v0  }
 0x4f4   :  { %744 = vperm.xlu0 %3905, %v726_v22  }
 0x4f5   :  { %3907 = vset.pattern.permute.xlu1 %v4284_v19 }
 0x4f6   :  { %739 = vperm.xlu1 %3907, %v725_v11  }
 0x4f8   :  { %3909 = vset.pattern.permute.xlu0 %v4286_v15 }
 0x4fa   :  { %3908 = vset.pattern.permute.xlu1 %v4283_v18 }
 0x4fb   :  { %863 = vperm.xlu1 %3908, %v849_v24  }
 0x4ff   :  { %868 = vperm.xlu1 %3908, %v850_v61  }
 0x503   :  { %3910 = vset.pattern.permute.xlu1 %v4286_v15 }
 0x54b   :  { %v764_v5 = vpop.permute.xlu0 %763 }
 0x54c   :  { %v773_v10 = vsub.f32 %v4529_v48, %v764_v5 }
 0x54d   :  { %v766_v42 = vpop.permute.xlu1 %765 }
 0x54e   :  { %787 = vperm.xlu0 %3909, %v773_v10   ;;  %v774_v19 = vsub.f32 %v4532_v50, %v766_v42 }
 0x54f   :  { %v760_v44 = vpop.permute.xlu0 %759 }
 0x550   :  { %v771_v45 = vsub.f32 %v4522_v40, %v760_v44 }
 0x551   :  { %v762_v46 = vpop.permute.xlu1 %761 }
 0x552   :  { %777 = vperm.xlu1 %3910, %v771_v45   ;;  %3912 = vset.pattern.permute.xlu0 %v4285_v58  ;;  %v772_v18 = vsub.f32 %v4525_v43, %v762_v46  ;;  %v4287_v45 = vmov 6  }
 0x554   :  { %v888_v53 = vpop.permute.xlu0 %887 }
 0x555   :  { %v890_v47 = vpop.permute.xlu1 %889  ;;  %v897_v54 = vsub.f32 %v4529_v48, %v888_v53 }
 0x556   :  { %v898_v51 = vsub.f32 %v4532_v50, %v890_v47  ;;  %792 = vperm.xlu1 %3910, %v774_v19  }
 0x558   :  { %916 = vperm.xlu0 %3912, %v898_v51  }
 0x55a   :  { %782 = vperm.xlu1 %3910, %v772_v18  }
 0x55c   :  { %3913 = vset.pattern.permute.xlu0 %v4287_v45 }
 0x55e   :  { %3911 = vset.pattern.permute.xlu1 %v4285_v58 }
 0x55f   :  { %911 = vperm.xlu1 %3911, %v897_v54  }
 0x563   :  { %3914 = vset.pattern.permute.xlu1 %v4287_v45 }
 0x565   :  { %v859_v60 = vpop.permute.xlu0 %858 }
 0x566   :  { %v735_v56 = vpop.permute.xlu1 %734  ;;  %v872_v30 = vmul.f32 %v859_v60, %v4548_v17 }
 0x567   :  { %v748_v31 = vmul.f32 %v735_v56, %v4573_v7 }
 0x56a   :  { %v902_v62 = vpop.permute.xlu0 %901 }
 0x56b   :  { %v854_v57 = vpop.permute.xlu1 %853 }
 0x56c   :  { %v871_v6 = vmul.f32 %v854_v57, %v4545_v4 }
 0x56e   :  { %v919_v14 = vadd.f32 %v902_v62, %v871_v6 }
 0x56f   :  { %v730_v1 = vpop.permute.xlu0 %729 }
 0x570   :  { %v907_v59 = vpop.permute.xlu1 %906  ;;  %v747_v9 = vmul.f32 %v730_v1, %v4568_v52 }
 0x571   :  { %v920_v52 = vadd.f32 %v907_v59, %v872_v30 }
 0x573   :  { %v745_v8 = vpop.permute.xlu0 %744 }
 0x574   :  { %v750_v23 = vmul.f32 %v4571_v26, %v745_v8 }
 0x575   :  { %v740_v2 = vpop.permute.xlu1 %739 }
 0x576   :  { %v749_v36 = vmul.f32 %v4566_v49, %v740_v2 }
 0x57a   :  { %v864_v63 = vpop.permute.xlu1 %863 }
 0x57b   :  { %v873_v26 = vmul.f32 %v864_v63, %v4560_v38 }
 0x57e   :  { %v869_v3 = vpop.permute.xlu1 %868 }
 0x57f   :  { %v874_v22 = vmul.f32 %v869_v3, %v4563_v25 }
 0x5cd   :  { %v788_v21 = vpop.permute.xlu0 %787 }
 0x5ce   :  { %v797_v61 = vadd.f32 %v788_v21, %v749_v36 }
 0x5d1   :  { %v778_v13 = vpop.permute.xlu1 %777 }
 0x5d2   :  { %v795_v16 = vadd.f32 %v778_v13, %v747_v9 }
 0x5d4   :  { %v4631_v11 = vadd.f32 %v919_v14, %v795_v16 }
 0x5d5   :  { %v793_v12 = vpop.permute.xlu1 %792 }
 0x5d6   :  { %v798_v4 = vadd.f32 %v793_v12, %v750_v23  ;;  %v927_v25 = vmax.f32 %v4631_v11, 0.0 }
 0x5d7   :  { %v917_v28 = vpop.permute.xlu0 %916 }
 0x5d8   :  { %v922_v32 = vadd.f32 %v917_v28, %v874_v22 }
 0x5d9   :  { %v783_v20 = vpop.permute.xlu1 %782 }
 0x5da   :  { %v4637_v33 = vadd.f32 %v922_v32, %v798_v4  ;;  %v796_v34 = vadd.f32 %v783_v20, %v748_v31 }
 0x5dc   :  { %v4639_v35 = vadd.f32 %v920_v52, %v796_v34  ;;  %v930_v27 = vmax.f32 %v4637_v33, 0.0 }
 0x5de   :  { %v928_v24 = vmax.f32 %v4639_v35, 0.0  ;;  %v912_v17 = vpop.permute.xlu1 %911 }
 0x5df   :  { %v921_v7 = vadd.f32 %v912_v17, %v873_v26 }
 0x5e0   :  { %v936_v29 = vpack.c.bf16 %v928_v24, %v927_v25 }
 0x5e1   :  { %v4649_v37 = vadd.f32 %v921_v7, %v797_v61 }
 0x5e2   :  { %3741 = vmatprep.subr.bf16.mxu1 %v936_v29 }
 0x5e3   :  { %v929_v49 = vmax.f32 %v4649_v37, 0.0  ;;  %3742 = vmatpush3.bf16.msra.mxu1 %v936_v29  ;;  %v3948_v37 = vld [vmem:[#allocation9 + $0x38] sm:$0xff]  }
 0x5e5   :  { %v937_v38 = vpack.c.bf16 %v930_v27, %v929_v49 }
 0x5e7   :  { %3743 = vmatprep.subr.bf16.mxu1 %v937_v38 }
 0x5e8   :  { %3744 = vmatpush3.bf16.msra.mxu1 %v937_v38 }
 0x5eb   :  { %3746 = vmatmul.mubr.msk.bf16.vlgmr.msra.gmra.mrb[4].mxu1 %vm394_vm0, %v3944_v39 }
 0x6be   :  { %v4658_v58 = vpop.f32.mrb[4].mxu1 }
 0x6bf   :  { %1007 = vadd.xlane.f32.xlu0 %v4658_v58  ;;  %v4661_v41 = vpop.f32.mrb[5].mxu1  ;;  %v1013_v42 = vmul.f32 %v4658_v58, %v4658_v58 }
 0x6c0   :  { %1003 = vadd.xlane.f32.xlu1 %v4661_v41  ;;  %v4664_v0 = vpop.f32.mrb[6].mxu1  ;;  %v1011_v5 = vmul.f32 %v4661_v41, %v4661_v41 }
 0x6c1   :  { %v4666_v15 = vpop.f32.mrb[7].mxu1  ;;  %v1014_v44 = vmul.f32 %v4664_v0, %v4664_v0 }
 0x6c2   :  { %v1012_v10 = vmul.f32 %v4666_v15, %v4666_v15 }
 0x6c3   :  { %1005 = vadd.xlane.f32.xlu0 %v4666_v15 }
 0x6c4   :  { %1009 = vadd.xlane.f32.xlu1 %v4664_v0 }
 0x6c7   :  { %1015 = vadd.xlane.f32.xlu0 %v1011_v5  ;;  %v4288_v5 = vmov 7  }
 0x6c8   :  { %1017 = vadd.xlane.f32.xlu1 %v1012_v10 }
 0x6cb   :  { %1019 = vadd.xlane.f32.xlu0 %v1013_v42 }
 0x6cc   :  { %1021 = vadd.xlane.f32.xlu1 %v1014_v44 }
 0x74c   :  { %v1008_v46 = vpop.xlane.xlu0 %1007 }
 0x74d   :  { %v1004_v19 = vpop.xlane.xlu1 %1003  ;;  %v1025_v55 = vmul.f32 0.0078125, %v1008_v46 }
 0x74e   :  { %v1023_v51 = vmul.f32 0.0078125, %v1004_v19 }
 0x74f   :  { %v1033_v6 = vmul.f32 %v1025_v55, %v1025_v55 }
 0x750   :  { %v1006_v47 = vpop.xlane.xlu0 %1005  ;;  %v1031_v56 = vmul.f32 %v1023_v51, %v1023_v51 }
 0x751   :  { %v1010_v18 = vpop.xlane.xlu1 %1009  ;;  %v1024_v53 = vmul.f32 0.0078125, %v1006_v47 }
 0x752   :  { %v1026_v2 = vmul.f32 0.0078125, %v1010_v18 }
 0x753   :  { %v1032_v60 = vmul.f32 %v1024_v53, %v1024_v53 }
 0x754   :  { %v1016_v54 = vpop.xlane.xlu0 %1015  ;;  %v1034_v14 = vmul.f32 %v1026_v2, %v1026_v2 }
 0x755   :  { %v1027_v57 = vmul.f32 0.0078125, %v1016_v54  ;;  %v1018_v59 = vpop.xlane.xlu1 %1017 }
 0x756   :  { %v1028_v62 = vmul.f32 0.0078125, %v1018_v59 }
 0x757   :  { %v1035_v63 = vsub.f32 %v1027_v57, %v1031_v56 }
 0x758   :  { %v1036_v1 = vsub.f32 %v1028_v62, %v1032_v60  ;;  %v1020_v3 = vpop.xlane.xlu0 %1019 }
 0x759   :  { %v1039_v8 = vmax.f32 %v1035_v63, 0.0  ;;  %v1029_v9 = vmul.f32 0.0078125, %v1020_v3  ;;  %v1022_v13 = vpop.xlane.xlu1 %1021 }
 0x75a   :  { %v1040_v16 = vmax.f32 %v1036_v1, 0.0  ;;  %v1030_v21 = vmul.f32 0.0078125, %v1022_v13 }
 0x75b   :  { %v1043_v12 = vadd.f32 1e-05, %v1039_v8  ;;  %v1037_v23 = vsub.f32 %v1029_v9, %v1033_v6 }
 0x75c   :  { %v1044_v22 = vadd.f32 1e-05, %v1040_v16  ;;  %v1038_v28 = vsub.f32 %v1030_v21, %v1034_v14 }
 0x75d   :  { %3985 = vrsqrt.f32 %v1043_v12  ;;  %v1041_v30 = vmax.f32 %v1037_v23, 0.0 }
 0x75e   :  { %v1042_v31 = vmax.f32 %v1038_v28, 0.0  ;;  %3987 = vrsqrt.f32 %v1044_v22 }
 0x75f   :  { %v1045_v4 = vadd.f32 1e-05, %v1041_v30 }
 0x760   :  { %v1046_v32 = vadd.f32 1e-05, %v1042_v31 }
 0x761   :  { %3989 = vrsqrt.f32 %v1045_v4 }
 0x762   :  { %3991 = vrsqrt.f32 %v1046_v32 }
 0x767   :  { %v3986_v20 = vpop.eup %3985 }
 0x768   :  { %v1051_v52 = vmul.f32 %v3986_v20, %v4522_v40  ;;  %v3988_v34 = vpop.eup %3987 }
 0x769   :  { %v1052_v7 = vmul.f32 %v3988_v34, %v4525_v43 }
 0x76a   :  { %v1079_v36 = vmul.f32 %v1051_v52, %v1023_v51 }
 0x76b   :  { %v3990_v26 = vpop.eup %3989  ;;  %v1080_v38 = vmul.f32 %v1052_v7, %v1024_v53  ;;  %v3945_v53 = vld [vmem:[#allocation9 + $0x20] sm:$0xff]  }
 0x76c   :  { %1087 = vrot.lane.b32.xlu0 %v1079_v36, %s4281_s4  ;;  %v1053_v17 = vmul.f32 %v3990_v26, %v4529_v48  ;;  %v3992_v29 = vpop.eup %3991  ;;  %3753 = vmatprep.mubr.msk.bf16.mxu1 %vm394_vm0, %v3945_v53 }
 0x76d   :  { %v1054_v39 = vmul.f32 %v3992_v29, %v4532_v50 }
 0x76e   :  { %v1081_v61 = vmul.f32 %v1053_v17, %v1025_v55 }
 0x76f   :  { %v1082_v10 = vmul.f32 %v1054_v39, %v1026_v2 }
 0x770   :  { %1057 = vperm.xlu0 %3913, %v1051_v52   ;;  %1091 = vrot.lane.b32.xlu1 %v1081_v61, %s4281_s4  ;;  %v4289_v52 = vmov 8  }
 0x774   :  { %1089 = vrot.lane.b32.xlu1 %v1080_v38, %s4281_s4  ;;  %3916 = vset.pattern.permute.xlu0 %v4288_v5 }
 0x778   :  { %1093 = vrot.lane.b32.xlu1 %v1082_v10, %s4281_s4 }
 0x77c   :  { %1062 = vperm.xlu1 %3914, %v1052_v7  }
 0x780   :  { %1067 = vperm.xlu1 %3914, %v1053_v17  }
 0x784   :  { %1072 = vperm.xlu1 %3914, %v1054_v39  }
 0x788   :  { %3915 = vset.pattern.permute.xlu1 %v4288_v5 }
 0x7de   :  { %v1088_v42 = vpop.permute.xlu0 %1087 }
 0x7df   :  { %v1099_v44 = vsub.f32 %v4522_v40, %v1088_v42 }
 0x7e1   :  { %1105 = vperm.xlu1 %3915, %v1099_v44  }
 0x7e2   :  { %v1092_v45 = vpop.permute.xlu1 %1091 }
 0x7e3   :  { %v1101_v51 = vsub.f32 %v4529_v48, %v1092_v45 }
 0x7e6   :  { %v1090_v46 = vpop.permute.xlu1 %1089 }
 0x7e7   :  { %v1100_v19 = vsub.f32 %v4525_v43, %v1090_v46 }
 0x7e9   :  { %1110 = vperm.xlu0 %3916, %v1100_v19  }
 0x7ea   :  { %v1094_v47 = vpop.permute.xlu1 %1093 }
 0x7eb   :  { %v1102_v18 = vsub.f32 %v4532_v50, %v1094_v47 }
 0x7ed   :  { %1115 = vperm.xlu0 %3916, %v1101_v51   ;;  %1120 = vperm.xlu1 %3915, %v1102_v18  }
 0x7ef   :  { %v1058_v57 = vpop.permute.xlu0 %1057 }
 0x7f0   :  { %v1075_v60 = vmul.f32 %v1058_v57, %v4661_v41 }
 0x7f1   :  { %3917 = vset.pattern.permute.xlu0 %v4289_v52  ;;  %3918 = vset.pattern.permute.xlu1 %v4289_v52  ;;  %v4727_v52 = vld [vmem:[#allocation10 + $0x8] sm:$0xff] }
 0x7fb   :  { %v1063_v54 = vpop.permute.xlu1 %1062 }
 0x7fc   :  { %v1076_v2 = vmul.f32 %v1063_v54, %v4666_v15  ;;  %v3946_v15 = vld [vmem:[#allocation9 + $0x28] sm:$0xff]  }
 0x7ff   :  { %v1068_v55 = vpop.permute.xlu1 %1067 }
 0x800   :  { %v1077_v3 = vmul.f32 %v4658_v58, %v1068_v55 }
 0x803   :  { %v1073_v56 = vpop.permute.xlu1 %1072 }
 0x804   :  { %v1078_v6 = vmul.f32 %v4664_v0, %v1073_v56 }
 0x860   :  { %v1106_v59 = vpop.permute.xlu1 %1105 }
 0x861   :  { %v1123_v62 = vadd.f32 %v1106_v59, %v1075_v60 }
 0x863   :  { %v1127_v8 = vmax.f32 %v1123_v62, 0.0 }
 0x868   :  { %v1111_v63 = vpop.permute.xlu0 %1110 }
 0x869   :  { %v1124_v1 = vadd.f32 %v1111_v63, %v1076_v2 }
 0x86b   :  { %v1128_v9 = vmax.f32 %v1124_v1, 0.0 }
 0x86c   :  { %v1116_v13 = vpop.permute.xlu0 %1115  ;;  %v1121_v14 = vpop.permute.xlu1 %1120 }
 0x86d   :  { %v1136_v16 = vpack.c.bf16 %v1128_v9, %v1127_v8  ;;  %v1125_v21 = vadd.f32 %v1116_v13, %v1077_v3  ;;  %v1126_v12 = vadd.f32 %v1121_v14, %v1078_v6 }
 0x86f   :  { %v1129_v23 = vmax.f32 %v1125_v21, 0.0  ;;  %v1130_v22 = vmax.f32 %v1126_v12, 0.0  ;;  %3749 = vmatprep.subr.bf16.mxu1 %v1136_v16 }
 0x870   :  { %3750 = vmatpush3.bf16.msra.mxu1 %v1136_v16 }
 0x871   :  { %v1137_v41 = vpack.c.bf16 %v1130_v22, %v1129_v23 }
 0x873   :  { %3751 = vmatprep.subr.bf16.mxu1 %v1137_v41 }
 0x874   :  { %3752 = vmatpush3.bf16.msra.mxu1 %v1137_v41  ;;  %v4290_v41 = vmov 9  }
 0x877   :  { %3754 = vmatmul.mubr.msk.bf16.vlgmr.msra.gmra.mrb[8].mxu1 %vm394_vm0, %v3946_v15 }
 0x94a   :  { %v4696_v58 = vpop.f32.mrb[8].mxu1 }
 0x94b   :  { %1207 = vadd.xlane.f32.xlu0 %v4696_v58  ;;  %v4699_v0 = vpop.f32.mrb[9].mxu1  ;;  %v1213_v20 = vmul.f32 %v4696_v58, %v4696_v58 }
 0x94c   :  { %v4701_v28 = vpop.f32.mrb[10].mxu1  ;;  %v1211_v31 = vmul.f32 %v4699_v0, %v4699_v0 }
 0x94d   :  { %v4703_v30 = vpop.f32.mrb[11].mxu1  ;;  %v1214_v4 = vmul.f32 %v4701_v28, %v4701_v28 }
 0x94e   :  { %1205 = vadd.xlane.f32.xlu1 %v4703_v30  ;;  %v1212_v32 = vmul.f32 %v4703_v30, %v4703_v30 }
 0x94f   :  { %1203 = vadd.xlane.f32.xlu0 %v4699_v0 }
 0x952   :  { %1209 = vadd.xlane.f32.xlu1 %v4701_v28 }
 0x953   :  { %1215 = vadd.xlane.f32.xlu0 %v1211_v31 }
 0x956   :  { %1221 = vadd.xlane.f32.xlu1 %v1214_v4  ;;  %v4724_v4 = vld [vmem:[#allocation10] sm:$0xff] }
 0x957   :  { %1217 = vadd.xlane.f32.xlu0 %v1212_v32 }
 0x95b   :  { %1219 = vadd.xlane.f32.xlu0 %v1213_v20 }
 0x9d8   :  { %v1208_v34 = vpop.xlane.xlu0 %1207 }
 0x9d9   :  { %v1225_v44 = vmul.f32 0.0078125, %v1208_v34 }
 0x9db   :  { %v1206_v36 = vpop.xlane.xlu1 %1205  ;;  %v1233_v55 = vmul.f32 %v1225_v44, %v1225_v44 }
 0x9dc   :  { %v1204_v26 = vpop.xlane.xlu0 %1203  ;;  %v1224_v29 = vmul.f32 0.0078125, %v1206_v36 }
 0x9dd   :  { %v1223_v17 = vmul.f32 0.0078125, %v1204_v26  ;;  %v4730_v26 = vld [vmem:[#allocation10 + $0x10] sm:$0xff] }
 0x9de   :  { %v1232_v46 = vmul.f32 %v1224_v29, %v1224_v29 }
 0x9df   :  { %v1210_v61 = vpop.xlane.xlu1 %1209  ;;  %v1231_v38 = vmul.f32 %v1223_v17, %v1223_v17 }
 0x9e0   :  { %v1216_v7 = vpop.xlane.xlu0 %1215  ;;  %v1226_v5 = vmul.f32 0.0078125, %v1210_v61 }
 0x9e1   :  { %v1227_v39 = vmul.f32 0.0078125, %v1216_v7  ;;  %v3947_v7 = vld [vmem:[#allocation9 + $0x30] sm:$0xff]  }
 0x9e2   :  { %v1234_v18 = vmul.f32 %v1226_v5, %v1226_v5  ;;  %3761 = vmatprep.mubr.msk.bf16.mxu1 %vm394_vm0, %v3947_v7 }
 0x9e3   :  { %v1235_v10 = vsub.f32 %v1227_v39, %v1231_v38  ;;  %v1222_v42 = vpop.xlane.xlu1 %1221 }
 0x9e4   :  { %v1218_v45 = vpop.xlane.xlu0 %1217  ;;  %v1230_v47 = vmul.f32 0.0078125, %v1222_v42 }
 0x9e5   :  { %v1239_v19 = vmax.f32 %v1235_v10, 0.0  ;;  %v1228_v51 = vmul.f32 0.0078125, %v1218_v45 }
 0x9e6   :  { %v1238_v57 = vsub.f32 %v1230_v47, %v1234_v18 }
 0x9e7   :  { %v1243_v53 = vadd.f32 1e-05, %v1239_v19  ;;  %v1236_v54 = vsub.f32 %v1228_v51, %v1232_v46 }
 0x9e8   :  { %v1220_v56 = vpop.xlane.xlu0 %1219  ;;  %v1242_v63 = vmax.f32 %v1238_v57, 0.0 }
 0x9e9   :  { %3993 = vrsqrt.f32 %v1243_v53  ;;  %v1240_v59 = vmax.f32 %v1236_v54, 0.0  ;;  %v1229_v60 = vmul.f32 0.0078125, %v1220_v56 }
 0x9ea   :  { %v1246_v6 = vadd.f32 1e-05, %v1242_v63  ;;  %v4291_v63 = vmov 10  }
 0x9eb   :  { %v1237_v2 = vsub.f32 %v1229_v60, %v1233_v55  ;;  %v1244_v62 = vadd.f32 1e-05, %v1240_v59 }
 0x9ed   :  { %v1241_v1 = vmax.f32 %v1237_v2, 0.0  ;;  %3995 = vrsqrt.f32 %v1244_v62 }
 0x9ef   :  { %v1245_v3 = vadd.f32 1e-05, %v1241_v1 }
 0x9f1   :  { %3997 = vrsqrt.f32 %v1245_v3 }
 0x9f2   :  { %3999 = vrsqrt.f32 %v1246_v6 }
 0x9f3   :  { %v3994_v8 = vpop.eup %3993 }
 0x9f4   :  { %v1251_v9 = vmul.f32 %v3994_v8, %v4522_v40 }
 0x9f6   :  { %v1279_v13 = vmul.f32 %v1251_v9, %v1223_v17 }
 0x9f7   :  { %v3996_v14 = vpop.eup %3995 }
 0x9f8   :  { %1287 = vrot.lane.b32.xlu0 %v1279_v13, %s4281_s4  ;;  %v1252_v23 = vmul.f32 %v3996_v14, %v4525_v43 }
 0x9fa   :  { %v1280_v15 = vmul.f32 %v1252_v23, %v1224_v29 }
 0x9fb   :  { %v3998_v16 = vpop.eup %3997 }
 0x9fc   :  { %1257 = vperm.xlu0 %3917, %v1251_v9   ;;  %v1253_v21 = vmul.f32 %v3998_v16, %v4529_v48  ;;  %v4000_v22 = vpop.eup %3999 }
 0x9fd   :  { %v1254_v40 = vmul.f32 %v4000_v22, %v4532_v50 }
 0x9fe   :  { %v1281_v12 = vmul.f32 %v1253_v21, %v1225_v44 }
 0x9ff   :  { %v1282_v31 = vmul.f32 %v1254_v40, %v1226_v5 }
 0xa00   :  { %1291 = vrot.lane.b32.xlu1 %v1281_v12, %s4281_s4  ;;  %3920 = vset.pattern.permute.xlu0 %v4290_v41 }
 0xa04   :  { %1289 = vrot.lane.b32.xlu1 %v1280_v15, %s4281_s4 }
 0xa08   :  { %1293 = vrot.lane.b32.xlu1 %v1282_v31, %s4281_s4 }
 0xa0c   :  { %1262 = vperm.xlu1 %3918, %v1252_v23  }
 0xa10   :  { %1267 = vperm.xlu1 %3918, %v1253_v21  }
 0xa14   :  { %1272 = vperm.xlu1 %3918, %v1254_v40  }
 0xa18   :  { %3919 = vset.pattern.permute.xlu1 %v4290_v41 }
 0xa6a   :  { %v1288_v48 = vpop.permute.xlu0 %1287 }
 0xa6b   :  { %v1299_v43 = vsub.f32 %v4724_v4, %v1288_v48 }
 0xa6d   :  { %1305 = vperm.xlu1 %3919, %v1299_v43  }
 0xa72   :  { %v1292_v32 = vpop.permute.xlu1 %1291 }
 0xa73   :  { %v1301_v17 = vsub.f32 %v4730_v26, %v1292_v32 }
 0xa76   :  { %v1290_v20 = vpop.permute.xlu1 %1289 }
 0xa77   :  { %v1300_v34 = vsub.f32 %v4727_v52, %v1290_v20 }
 0xa79   :  { %1310 = vperm.xlu0 %3920, %v1300_v34  }
 0xa7a   :  { %v1294_v36 = vpop.permute.xlu1 %1293 }
 0xa7b   :  { %v1302_v61 = vsub.f32 %v4532_v50, %v1294_v36  ;;  %v1258_v5 = vpop.permute.xlu0 %1257 }
 0xa7c   :  { %v1275_v42 = vmul.f32 %v1258_v5, %v4699_v0 }
 0xa7d   :  { %1315 = vperm.xlu0 %3920, %v1301_v17   ;;  %1320 = vperm.xlu1 %3919, %v1302_v61  }
 0xa81   :  { %3921 = vset.pattern.permute.xlu0 %v4291_v63  ;;  %3922 = vset.pattern.permute.xlu1 %v4291_v63 }
 0xa8b   :  { %v1263_v29 = vpop.permute.xlu1 %1262 }
 0xa8c   :  { %v1276_v45 = vmul.f32 %v1263_v29, %v4703_v30 }
 0xa8f   :  { %v1268_v38 = vpop.permute.xlu1 %1267 }
 0xa90   :  { %v1277_v47 = vmul.f32 %v4696_v58, %v1268_v38 }
 0xa93   :  { %v1273_v39 = vpop.permute.xlu1 %1272 }
 0xa94   :  { %v1278_v51 = vmul.f32 %v4701_v28, %v1273_v39 }
 0xaec   :  { %v1306_v10 = vpop.permute.xlu1 %1305 }
 0xaed   :  { %v1323_v44 = vadd.f32 %v1306_v10, %v1275_v42 }
 0xaef   :  { %v4739_v19 = vadd.f32 %v1323_v44, %v927_v25 }
 0xaf1   :  { %v1331_v0 = vmax.f32 %v4739_v19, 0.0 }
 0xaf8   :  { %v1311_v46 = vpop.permute.xlu0 %1310 }
 0xaf9   :  { %v1324_v50 = vadd.f32 %v1311_v46, %v1276_v45 }
 0xafb   :  { %v4745_v18 = vadd.f32 %v1324_v50, %v928_v24 }
 0xafc   :  { %v1321_v53 = vpop.permute.xlu1 %1320  ;;  %v1316_v54 = vpop.permute.xlu0 %1315 }
 0xafd   :  { %v1332_v30 = vmax.f32 %v4745_v18, 0.0  ;;  %v1326_v55 = vadd.f32 %v1321_v53, %v1278_v51  ;;  %v1325_v56 = vadd.f32 %v1316_v54, %v1277_v47  ;;  %v3952_v18 = vld [vmem:[#allocation9 + $0x58] sm:$0xff]  }
 0xaff   :  { %v4751_v11 = vadd.f32 %v1326_v55, %v930_v27  ;;  %v4755_v25 = vadd.f32 %v1325_v56, %v929_v49  ;;  %v1340_v35 = vpack.c.bf16 %v1332_v30, %v1331_v0 }
 0xb01   :  { %v1334_v24 = vmax.f32 %v4751_v11, 0.0  ;;  %v1333_v58 = vmax.f32 %v4755_v25, 0.0  ;;  %3757 = vmatprep.subr.bf16.mxu1 %v1340_v35 }
 0xb02   :  { %3758 = vmatpush3.bf16.msra.mxu1 %v1340_v35  ;;  %v4292_v35 = vmov 11  }
 0xb03   :  { %v1341_v33 = vpack.c.bf16 %v1334_v24, %v1333_v58 }
 0xb05   :  { %3759 = vmatprep.subr.bf16.mxu1 %v1341_v33 }
 0xb06   :  { %3760 = vmatpush3.bf16.msra.mxu1 %v1341_v33 }
 0xb09   :  { %3762 = vmatmul.mubr.msk.bf16.vlgmr.msra.gmra.mrb[12].mxu1 %vm394_vm0, %v3948_v37  ;;  %v4793_v37 = vld [vmem:[#allocation10 + $0x18] sm:$0xff] }
 0xbdc   :  { %v4768_v27 = vpop.f32.mrb[12].mxu1 }
 0xbdd   :  { %1411 = vadd.xlane.f32.xlu0 %v4768_v27  ;;  %v4771_v49 = vpop.f32.mrb[13].mxu1  ;;  %v1417_v62 = vmul.f32 %v4768_v27, %v4768_v27 }
 0xbde   :  { %v4773_v28 = vpop.f32.mrb[14].mxu1  ;;  %v1415_v59 = vmul.f32 %v4771_v49, %v4771_v49 }
 0xbdf   :  { %v4775_v57 = vpop.f32.mrb[15].mxu1  ;;  %v1418_v60 = vmul.f32 %v4773_v28, %v4773_v28 }
 0xbe0   :  { %1409 = vadd.xlane.f32.xlu1 %v4775_v57  ;;  %v1416_v2 = vmul.f32 %v4775_v57, %v4775_v57 }
 0xbe1   :  { %1407 = vadd.xlane.f32.xlu0 %v4771_v49 }
 0xbe4   :  { %1413 = vadd.xlane.f32.xlu1 %v4773_v28 }
 0xbe5   :  { %1419 = vadd.xlane.f32.xlu0 %v1415_v59 }
 0xbe8   :  { %1425 = vadd.xlane.f32.xlu1 %v1418_v60 }
 0xbe9   :  { %1421 = vadd.xlane.f32.xlu0 %v1416_v2 }
 0xbed   :  { %1423 = vadd.xlane.f32.xlu0 %v1417_v62 }
 0xc6a   :  { %v1412_v1 = vpop.xlane.xlu0 %1411 }
 0xc6b   :  { %v1429_v41 = vmul.f32 0.0078125, %v1412_v1 }
 0xc6d   :  { %v1410_v3 = vpop.xlane.xlu1 %1409  ;;  %v1437_v36 = vmul.f32 %v1429_v41, %v1429_v41 }
 0xc6e   :  { %v1408_v6 = vpop.xlane.xlu0 %1407  ;;  %v1428_v14 = vmul.f32 0.0078125, %v1410_v3 }
 0xc6f   :  { %v1427_v8 = vmul.f32 0.0078125, %v1408_v6 }
 0xc70   :  { %v1436_v40 = vmul.f32 %v1428_v14, %v1428_v14 }
 0xc71   :  { %v1414_v9 = vpop.xlane.xlu1 %1413  ;;  %v1435_v16 = vmul.f32 %v1427_v8, %v1427_v8 }
 0xc72   :  { %v1420_v13 = vpop.xlane.xlu0 %1419  ;;  %v1430_v12 = vmul.f32 0.0078125, %v1414_v9 }
 0xc73   :  { %v1431_v21 = vmul.f32 0.0078125, %v1420_v13  ;;  %v3949_v13 = vld [vmem:[#allocation9 + $0x40] sm:$0xff]  }
 0xc74   :  { %v1438_v32 = vmul.f32 %v1430_v12, %v1430_v12  ;;  %3769 = vmatprep.mubr.msk.bf16.mxu1 %vm394_vm0, %v3949_v13 }
 0xc75   :  { %v1439_v23 = vsub.f32 %v1431_v21, %v1435_v16  ;;  %v1426_v22 = vpop.xlane.xlu1 %1425 }
 0xc76   :  { %v1422_v15 = vpop.xlane.xlu0 %1421  ;;  %v1434_v48 = vmul.f32 0.0078125, %v1426_v22 }
 0xc77   :  { %v1443_v31 = vmax.f32 %v1439_v23, 0.0  ;;  %v1432_v43 = vmul.f32 0.0078125, %v1422_v15 }
 0xc78   :  { %v1442_v61 = vsub.f32 %v1434_v48, %v1438_v32 }
 0xc79   :  { %v1447_v20 = vadd.f32 1e-05, %v1443_v31  ;;  %v1440_v34 = vsub.f32 %v1432_v43, %v1436_v40 }
 0xc7a   :  { %v1424_v17 = vpop.xlane.xlu0 %1423  ;;  %v1446_v5 = vmax.f32 %v1442_v61, 0.0 }
 0xc7b   :  { %4001 = vrsqrt.f32 %v1447_v20  ;;  %v1444_v7 = vmax.f32 %v1440_v34, 0.0  ;;  %v1433_v29 = vmul.f32 0.0078125, %v1424_v17 }
 0xc7c   :  { %v1450_v44 = vadd.f32 1e-05, %v1446_v5 }
 0xc7d   :  { %v1441_v38 = vsub.f32 %v1433_v29, %v1437_v36  ;;  %v1448_v39 = vadd.f32 1e-05, %v1444_v7 }
 0xc7f   :  { %v1445_v10 = vmax.f32 %v1441_v38, 0.0  ;;  %4003 = vrsqrt.f32 %v1448_v39 }
 0xc81   :  { %v1449_v42 = vadd.f32 1e-05, %v1445_v10 }
 0xc83   :  { %4005 = vrsqrt.f32 %v1449_v42 }
 0xc84   :  { %4007 = vrsqrt.f32 %v1450_v44 }
 0xc85   :  { %v4002_v45 = vpop.eup %4001 }
 0xc86   :  { %v1455_v46 = vmul.f32 %v4724_v4, %v4002_v45 }
 0xc88   :  { %v1483_v50 = vmul.f32 %v1455_v46, %v1427_v8 }
 0xc89   :  { %v4004_v47 = vpop.eup %4003 }
 0xc8a   :  { %1491 = vrot.lane.b32.xlu0 %v1483_v50, %s4281_s4  ;;  %v1456_v55 = vmul.f32 %v4727_v52, %v4004_v47 }
 0xc8c   :  { %v1484_v33 = vmul.f32 %v1456_v55, %v1428_v14 }
 0xc8d   :  { %v4006_v51 = vpop.eup %4005 }
 0xc8e   :  { %1461 = vperm.xlu0 %3921, %v1455_v46   ;;  %v1457_v53 = vmul.f32 %v4730_v26, %v4006_v51  ;;  %v4008_v56 = vpop.eup %4007  ;;  %v4293_v46 = vmov 12  }
 0xc8f   :  { %v1458_v59 = vmul.f32 %v4793_v37, %v4008_v56 }
 0xc90   :  { %v1485_v54 = vmul.f32 %v1457_v53, %v1429_v41 }
 0xc91   :  { %v1486_v60 = vmul.f32 %v1458_v59, %v1430_v12 }
 0xc92   :  { %1495 = vrot.lane.b32.xlu1 %v1485_v54, %s4281_s4  ;;  %3924 = vset.pattern.permute.xlu0 %v4292_v35 }
 0xc96   :  { %1493 = vrot.lane.b32.xlu1 %v1484_v33, %s4281_s4 }
 0xc9a   :  { %1497 = vrot.lane.b32.xlu1 %v1486_v60, %s4281_s4 }
 0xc9e   :  { %1466 = vperm.xlu1 %3922, %v1456_v55  }
 0xca2   :  { %1471 = vperm.xlu1 %3922, %v1457_v53  }
 0xca6   :  { %1476 = vperm.xlu1 %3922, %v1458_v59  }
 0xcaa   :  { %3923 = vset.pattern.permute.xlu1 %v4292_v35 }
 0xcfc   :  { %v1492_v2 = vpop.permute.xlu0 %1491 }
 0xcfd   :  { %v1503_v62 = vsub.f32 %v4724_v4, %v1492_v2 }
 0xcff   :  { %1509 = vperm.xlu1 %3923, %v1503_v62  }
 0xd04   :  { %v1496_v63 = vpop.permute.xlu1 %1495 }
 0xd05   :  { %v1505_v8 = vsub.f32 %v4730_v26, %v1496_v63 }
 0xd08   :  { %v1494_v1 = vpop.permute.xlu1 %1493 }
 0xd09   :  { %v1504_v3 = vsub.f32 %v4727_v52, %v1494_v1 }
 0xd0b   :  { %1514 = vperm.xlu0 %3924, %v1504_v3  }
 0xd0c   :  { %v1498_v6 = vpop.permute.xlu1 %1497 }
 0xd0d   :  { %v1506_v9 = vsub.f32 %v4793_v37, %v1498_v6  ;;  %v1462_v12 = vpop.permute.xlu0 %1461 }
 0xd0e   :  { %v1479_v22 = vmul.f32 %v1462_v12, %v4771_v49 }
 0xd0f   :  { %1519 = vperm.xlu0 %3924, %v1505_v8   ;;  %1524 = vperm.xlu1 %3923, %v1506_v9  }
 0xd13   :  { %3925 = vset.pattern.permute.xlu0 %v4293_v46  ;;  %3926 = vset.pattern.permute.xlu1 %v4293_v46 }
 0xd1d   :  { %v1467_v14 = vpop.permute.xlu1 %1466 }
 0xd1e   :  { %v1480_v41 = vmul.f32 %v1467_v14, %v4775_v57  ;;  %v3950_v57 = vld [vmem:[#allocation9 + $0x48] sm:$0xff]  }
 0xd21   :  { %v1472_v16 = vpop.permute.xlu1 %1471 }
 0xd22   :  { %v1481_v48 = vmul.f32 %v4768_v27, %v1472_v16 }
 0xd25   :  { %v1477_v21 = vpop.permute.xlu1 %1476 }
 0xd26   :  { %v1482_v43 = vmul.f32 %v4773_v28, %v1477_v21 }
 0xd7e   :  { %v1510_v23 = vpop.permute.xlu1 %1509 }
 0xd7f   :  { %v1527_v15 = vadd.f32 %v1510_v23, %v1479_v22 }
 0xd81   :  { %v1531_v32 = vmax.f32 %v1527_v15, 0.0 }
 0xd8a   :  { %v1515_v40 = vpop.permute.xlu0 %1514 }
 0xd8b   :  { %v1528_v31 = vadd.f32 %v1515_v40, %v1480_v41 }
 0xd8d   :  { %v1532_v20 = vmax.f32 %v1528_v31, 0.0 }
 0xd8e   :  { %v1525_v34 = vpop.permute.xlu1 %1524  ;;  %v1520_v36 = vpop.permute.xlu0 %1519 }
 0xd8f   :  { %v1540_v17 = vpack.c.bf16 %v1532_v20, %v1531_v32  ;;  %v1530_v61 = vadd.f32 %v1525_v34, %v1482_v43  ;;  %v1529_v7 = vadd.f32 %v1520_v36, %v1481_v48 }
 0xd91   :  { %v1534_v29 = vmax.f32 %v1530_v61, 0.0  ;;  %v1533_v38 = vmax.f32 %v1529_v7, 0.0  ;;  %3765 = vmatprep.subr.bf16.mxu1 %v1540_v17 }
 0xd92   :  { %3766 = vmatpush3.bf16.msra.mxu1 %v1540_v17 }
 0xd93   :  { %v1541_v49 = vpack.c.bf16 %v1534_v29, %v1533_v38 }
 0xd95   :  { %3767 = vmatprep.subr.bf16.mxu1 %v1541_v49 }
 0xd96   :  { %3768 = vmatpush3.bf16.msra.mxu1 %v1541_v49  ;;  %v4294_v49 = vmov 13  }
 0xd99   :  { %3770 = vmatmul.mubr.msk.bf16.vlgmr.msra.gmra.mrb[16].mxu1 %vm394_vm0, %v3950_v57 }
 0xe6c   :  { %v4808_v27 = vpop.f32.mrb[16].mxu1 }
 0xe6d   :  { %1611 = vadd.xlane.f32.xlu0 %v4808_v27  ;;  %v4811_v28 = vpop.f32.mrb[17].mxu1  ;;  %v1617_v45 = vmul.f32 %v4808_v27, %v4808_v27 }
 0xe6e   :  { %v4813_v39 = vpop.f32.mrb[18].mxu1  ;;  %v1615_v10 = vmul.f32 %v4811_v28, %v4811_v28 }
 0xe6f   :  { %v4815_v5 = vpop.f32.mrb[19].mxu1  ;;  %v1618_v42 = vmul.f32 %v4813_v39, %v4813_v39 }
 0xe70   :  { %1609 = vadd.xlane.f32.xlu1 %v4815_v5  ;;  %v1616_v44 = vmul.f32 %v4815_v5, %v4815_v5 }
 0xe71   :  { %1607 = vadd.xlane.f32.xlu0 %v4811_v28 }
 0xe74   :  { %1613 = vadd.xlane.f32.xlu1 %v4813_v39 }
 0xe75   :  { %1619 = vadd.xlane.f32.xlu0 %v1615_v10 }
 0xe78   :  { %1625 = vadd.xlane.f32.xlu1 %v1618_v42 }
 0xe79   :  { %1621 = vadd.xlane.f32.xlu0 %v1616_v44 }
 0xe7d   :  { %1623 = vadd.xlane.f32.xlu0 %v1617_v45 }
 0xefa   :  { %v1612_v50 = vpop.xlane.xlu0 %1611 }
 0xefb   :  { %v1629_v62 = vmul.f32 0.0078125, %v1612_v50 }
 0xefd   :  { %v1610_v47 = vpop.xlane.xlu1 %1609  ;;  %v1637_v16 = vmul.f32 %v1629_v62, %v1629_v62 }
 0xefe   :  { %v1608_v51 = vpop.xlane.xlu0 %1607  ;;  %v1628_v56 = vmul.f32 0.0078125, %v1610_v47 }
 0xeff   :  { %v1627_v53 = vmul.f32 0.0078125, %v1608_v51 }
 0xf00   :  { %v1636_v1 = vmul.f32 %v1628_v56, %v1628_v56 }
 0xf01   :  { %v1614_v54 = vpop.xlane.xlu1 %1613  ;;  %v1635_v35 = vmul.f32 %v1627_v53, %v1627_v53 }
 0xf02   :  { %v1620_v55 = vpop.xlane.xlu0 %1619  ;;  %v1630_v59 = vmul.f32 0.0078125, %v1614_v54 }
 0xf03   :  { %v1631_v33 = vmul.f32 0.0078125, %v1620_v55  ;;  %v3951_v55 = vld [vmem:[#allocation9 + $0x50] sm:$0xff]  }
 0xf04   :  { %v1638_v9 = vmul.f32 %v1630_v59, %v1630_v59  ;;  %3777 = vmatprep.mubr.msk.bf16.mxu1 %vm394_vm0, %v3951_v55 }
 0xf05   :  { %v1639_v60 = vsub.f32 %v1631_v33, %v1635_v35  ;;  %v1626_v2 = vpop.xlane.xlu1 %1625 }
 0xf06   :  { %v1622_v63 = vpop.xlane.xlu0 %1621  ;;  %v1634_v6 = vmul.f32 0.0078125, %v1626_v2 }
 0xf07   :  { %v1643_v3 = vmax.f32 %v1639_v60, 0.0  ;;  %v1632_v8 = vmul.f32 0.0078125, %v1622_v63 }
 0xf08   :  { %v1642_v12 = vsub.f32 %v1634_v6, %v1638_v9 }
 0xf09   :  { %v1647_v13 = vadd.f32 1e-05, %v1643_v3  ;;  %v1640_v14 = vsub.f32 %v1632_v8, %v1636_v1 }
 0xf0a   :  { %v1624_v21 = vpop.xlane.xlu0 %1623  ;;  %v1646_v40 = vmax.f32 %v1642_v12, 0.0 }
 0xf0b   :  { %4009 = vrsqrt.f32 %v1647_v13  ;;  %v1644_v23 = vmax.f32 %v1640_v14, 0.0  ;;  %v1633_v22 = vmul.f32 0.0078125, %v1624_v21 }
 0xf0c   :  { %v1650_v43 = vadd.f32 1e-05, %v1646_v40 }
 0xf0d   :  { %v1641_v41 = vsub.f32 %v1633_v22, %v1637_v16  ;;  %v1648_v15 = vadd.f32 1e-05, %v1644_v23 }
 0xf0f   :  { %v1645_v31 = vmax.f32 %v1641_v41, 0.0  ;;  %4011 = vrsqrt.f32 %v1648_v15 }
 0xf11   :  { %v1649_v48 = vadd.f32 1e-05, %v1645_v31 }
 0xf13   :  { %4013 = vrsqrt.f32 %v1649_v48 }
 0xf14   :  { %4015 = vrsqrt.f32 %v1650_v43 }
 0xf15   :  { %v4010_v32 = vpop.eup %4009 }
 0xf16   :  { %v1655_v20 = vmul.f32 %v4724_v4, %v4010_v32 }
 0xf18   :  { %v1683_v34 = vmul.f32 %v1655_v20, %v1627_v53 }
 0xf19   :  { %v4012_v36 = vpop.eup %4011 }
 0xf1a   :  { %1691 = vrot.lane.b32.xlu0 %v1683_v34, %s4281_s4  ;;  %v1656_v29 = vmul.f32 %v4727_v52, %v4012_v36 }
 0xf1c   :  { %v1684_v57 = vmul.f32 %v1656_v29, %v1628_v56 }
 0xf1d   :  { %v4014_v17 = vpop.eup %4013 }
 0xf1e   :  { %1661 = vperm.xlu0 %3925, %v1655_v20   ;;  %v1657_v61 = vmul.f32 %v4730_v26, %v4014_v17  ;;  %v4016_v38 = vpop.eup %4015 }
 0xf1f   :  { %v1658_v10 = vmul.f32 %v4793_v37, %v4016_v38 }
 0xf20   :  { %v1685_v7 = vmul.f32 %v1657_v61, %v1629_v62 }
 0xf21   :  { %v1686_v42 = vmul.f32 %v1658_v10, %v1630_v59 }
 0xf22   :  { %1695 = vrot.lane.b32.xlu1 %v1685_v7, %s4281_s4  ;;  %3928 = vset.pattern.permute.xlu0 %v4294_v49 }
 0xf26   :  { %1693 = vrot.lane.b32.xlu1 %v1684_v57, %s4281_s4 }
 0xf2a   :  { %1697 = vrot.lane.b32.xlu1 %v1686_v42, %s4281_s4 }
 0xf2e   :  { %1666 = vperm.xlu1 %3926, %v1656_v29  }
 0xf32   :  { %1671 = vperm.xlu1 %3926, %v1657_v61  }
 0xf36   :  { %1676 = vperm.xlu1 %3926, %v1658_v10  }
 0xf3a   :  { %3927 = vset.pattern.permute.xlu1 %v4294_v49 }
 0xf8c   :  { %v1692_v44 = vpop.permute.xlu0 %1691 }
 0xf8d   :  { %v1703_v45 = vsub.f32 %v4724_v4, %v1692_v44 }
 0xf8f   :  { %1709 = vperm.xlu1 %3927, %v1703_v45  }
 0xf94   :  { %v1696_v46 = vpop.permute.xlu1 %1695 }
 0xf95   :  { %v1705_v53 = vsub.f32 %v4730_v26, %v1696_v46 }
 0xf98   :  { %v1694_v50 = vpop.permute.xlu1 %1693 }
 0xf99   :  { %v1704_v47 = vsub.f32 %v4727_v52, %v1694_v50 }
 0xf9b   :  { %1714 = vperm.xlu0 %3928, %v1704_v47  }
 0xf9c   :  { %v1698_v51 = vpop.permute.xlu1 %1697 }
 0xf9d   :  { %v1706_v54 = vsub.f32 %v4793_v37, %v1698_v51  ;;  %v1662_v4 = vpop.permute.xlu0 %1661 }
 0xf9e   :  { %v1679_v60 = vmul.f32 %v1662_v4, %v4811_v28 }
 0xf9f   :  { %1719 = vperm.xlu0 %3928, %v1705_v53   ;;  %1724 = vperm.xlu1 %3927, %v1706_v54  }
 0xfad   :  { %v1667_v56 = vpop.permute.xlu1 %1666 }
 0xfae   :  { %v1680_v52 = vmul.f32 %v1667_v56, %v4815_v5 }
 0xfb1   :  { %v1672_v35 = vpop.permute.xlu1 %1671 }
 0xfb2   :  { %v1681_v63 = vmul.f32 %v4808_v27, %v1672_v35 }
 0xfb5   :  { %v1677_v33 = vpop.permute.xlu1 %1676 }
 0xfb6   :  { %v1682_v1 = vmul.f32 %v4813_v39, %v1677_v33 }
0x100e   :  { %v1710_v59 = vpop.permute.xlu1 %1709 }
0x100f   :  { %v1727_v2 = vadd.f32 %v1710_v59, %v1679_v60 }
0x1011   :  { %v1731_v26 = vadd.f32 %v1727_v2, %v1331_v0 }
0x1013   :  { %v1735_v9 = vmax.f32 %v1731_v26, 0.0 }
0x101a   :  { %v1715_v62 = vpop.permute.xlu0 %1714 }
0x101b   :  { %v1728_v37 = vadd.f32 %v1715_v62, %v1680_v52 }
0x101d   :  { %v1732_v3 = vadd.f32 %v1728_v37, %v1332_v30 }
0x101e   :  { %v1725_v6 = vpop.permute.xlu1 %1724  ;;  %v1720_v8 = vpop.permute.xlu0 %1719 }
0x101f   :  { %v1736_v13 = vmax.f32 %v1732_v3, 0.0  ;;  %v1730_v28 = vadd.f32 %v1725_v6, %v1682_v1  ;;  %v1729_v14 = vadd.f32 %v1720_v8, %v1681_v63 }
0x1021   :  { %v1734_v5 = vadd.f32 %v1730_v28, %v1334_v24  ;;  %v1733_v19 = vadd.f32 %v1729_v14, %v1333_v58  ;;  %v1744_v0 = vpack.c.bf16 %v1736_v13, %v1735_v9 }
0x1023   :  { %v1738_v16 = vmax.f32 %v1734_v5, 0.0  ;;  %v1737_v27 = vmax.f32 %v1733_v19, 0.0  ;;  %3773 = vmatprep.subr.bf16.mxu1 %v1744_v0 }
0x1024   :  { %3774 = vmatpush3.bf16.msra.mxu1 %v1744_v0 }
0x1025   :  { %v1745_v39 = vpack.c.bf16 %v1738_v16, %v1737_v27 }
0x1027   :  { %3775 = vmatprep.subr.bf16.mxu1 %v1745_v39 }
0x1028   :  { %3776 = vmatpush3.bf16.msra.mxu1 %v1745_v39 }
0x102b   :  { %3778 = vmatmul.mubr.msk.bf16.vlgmr.msra.gmra.mrb[20].mxu1 %vm394_vm0, %v3952_v18 }
0x10fe   :  { %v3779_v30 = vpop.f32.mrb[20].mxu1 }
0x10ff   :  { %v1796_v21 = vpop.f32.mrb[21].mxu1 }
0x1100   :  { %1808 = vst [vmem:[#allocation12] sm:$0x1] %v1796_v21  ;;  %v3780_v12 = vpop.f32.mrb[22].mxu1 }
0x1101   :  { %v1799_v11 = vpop.f32.mrb[23].mxu1 }
0x1102 PF:  { %p3639_p5 = scmp.ge.s32.totalorder %s5380_s0, 128 }
0x1103   :  { %v1813_v25 = vld [vmem:[#allocation4] sm:$0xff] (!%p3639_p5)  ;;  %v1814_v24 = vld [vmem:[#allocation4 + $0x8] sm:$0xff] (!%p3639_p5)  ;;  %v4295_v58 = vmov (!%p3639_p5), 0   ;;  %vm2134_vm0 = vcmask (!%p3639_p5), 261120   ;;  %v4056_v17 = vld [vmem:[#allocation7 + $0x4] ss:$8 sps:$4 sm:$0xff] (!%p3639_p5)  }
0x1104   :  { %1812 = sbr.rel (%p3639_p5) target bundleno = 8654 (0x21ce), region = 41  ;;  %2147 = vmatprep.subr.bf16.mxu0 (!%p3639_p5), %v4295_v58  ;;  %v4858_v23 = vmul.f32 (!%p3639_p5), 3.1415927, %v1813_v25  ;;  %v4860_v22 = vmul.f32 (!%p3639_p5), 3.1415927, %v1814_v24  ;;  %4022 = vset.pattern.permute.xlu0 (!%p3639_p5), %v4295_v58 }
0x1105   :  { %4021 = vset.pattern.permute.xlu1 (!%p3639_p5), %v4295_v58  ;;  %3657 = vmatprep.mubr.msk.bf16.mxu0 (!%p3639_p5), %vm2134_vm0, %v4056_v17  ;;  %v4296_v51 = vmov (!%p3639_p5), 683565275   ;;  %v4297_v54 = vmov (!%p3639_p5), 2475754826   ;;  %v4298_v56 = vmov (!%p3639_p5), 2131351028  }
0x1106   :  { %v1817_v41 = vand.u32 (!%p3639_p5), 2147483647, %v4858_v23  ;;  %v1820_v15 = vand.u32 (!%p3639_p5), 2139095040, %v4858_v23  ;;  %v1921_v40 = vand.u32 (!%p3639_p5), 2147483647, %v4860_v22  ;;  %v1924_v31 = vand.u32 (!%p3639_p5), 2139095040, %v4860_v22 }
0x1107   :  { %v4299_v33 = vmov (!%p3639_p5), 2102212464   ;;  %v4300_v59 = vmov (!%p3639_p5), 920167782   ;;  %v4301_v63 = vmov (!%p3639_p5), 1326507024  }
0x1108   :  { %v1821_v48 = vshrl.u32 (!%p3639_p5), %v1820_v15, 23  ;;  %v1824_v43 = vand.u32 (!%p3639_p5), 8388607, %v1817_v41  ;;  %v1925_v32 = vshrl.u32 (!%p3639_p5), %v1924_v31, 23  ;;  %v1928_v20 = vand.u32 (!%p3639_p5), 8388607, %v1921_v40 }
0x110a   :  { %v3640_v34 = vadd.s32 (!%p3639_p5), 4294967169, %v1821_v48  ;;  %v1825_v36 = vor.u32 (!%p3639_p5), 8388608, %v1824_v43  ;;  %v3644_v61 = vadd.s32 (!%p3639_p5), 4294967169, %v1925_v32  ;;  %v1929_v29 = vor.u32 (!%p3639_p5), 8388608, %v1928_v20 }
0x110c   :  { %v1827_v7 = vadd.s32 1, %v3640_v34  ;;  %v1931_v38 = vadd.s32 1, %v3644_v61  ;;  %v4873_v49 = vshll.u32 %v1825_v36, 8  ;;  %v4875_v45 = vshll.u32 %v1929_v29, 8 }
0x110e   :  { %vm1828_vm12 = vcmp.gt.s32.totalorder %v1827_v7, 0  ;;  %vm1932_vm13 = vcmp.gt.s32.totalorder %v1931_v38, 0 }
0x110f   :  { %v1829_v57 = vsel %vm1828_vm12, %v1827_v7, 0  ;;  %v1933_v44 = vsel %vm1932_vm13, %v1931_v38, 0  ;;  %vm1819_vm12 = vcmp.lt.s32.totalorder %v4858_v23, 0  ;;  %vm1818_vm13 = vcmp.le.f32.partialorder %v1817_v41, 0.7853982 }
0x1110   :  { %v1830_v10 = vshrl.u32 %v1829_v57, 5  ;;  %v1831_v42 = vand.u32 31, %v1829_v57  ;;  %v4877_v46 = vshrl.u32 %v1933_v44, 5  ;;  %v1935_v50 = vand.u32 31, %v1933_v44 }
0x1112   :  { %v1832_v47 = vsub.s32 32, %v1831_v42  ;;  %v1834_v53 = vshll.u32 %v4296_v51, %v1831_v42  ;;  %v1837_v55 = vshll.u32 %v4297_v54, %v1831_v42  ;;  %v1840_v35 = vshll.u32 %v4298_v56, %v1831_v42 }
0x1113   :  { %v1843_v4 = vshll.u32 %v4299_v33, %v1831_v42  ;;  %v1846_v60 = vshll.u32 %v4300_v59, %v1831_v42  ;;  %vm1849_vm14 = vcmp.lt.s32.totalorder %v1830_v10, 1  ;;  %vm1850_vm15 = vcmp.lt.s32.totalorder %v1830_v10, 2 }
0x1114   :  { %v1833_v2 = vshrl.u32 %v4296_v51, %v1832_v47  ;;  %v1835_v52 = vshrl.u32 %v4297_v54, %v1832_v47  ;;  %v1838_v62 = vshrl.u32 %v4298_v56, %v1832_v47  ;;  %v1841_v26 = vshrl.u32 %v4299_v33, %v1832_v47 }
0x1115   :  { %v1844_v37 = vshrl.u32 %v4300_v59, %v1832_v47  ;;  %v1847_v1 = vshrl.u32 %v4301_v63, %v1832_v47  ;;  %vm1851_vm1 = vcmp.lt.s32.totalorder %v1830_v10, 3  ;;  %vm1852_vm2 = vcmp.lt.s32.totalorder %v1830_v10, 4 }
0x1116   :  { %v1836_v3 = vor.u32 %v1835_v52, %v1834_v53  ;;  %v1839_v6 = vor.u32 %v1838_v62, %v1837_v55  ;;  %v1842_v8 = vor.u32 %v1841_v26, %v1840_v35  ;;  %v1936_v9 = vsub.s32 32, %v1935_v50 }
0x1117   :  { %v1845_v13 = vor.u32 %v1844_v37, %v1843_v4  ;;  %v1848_v28 = vor.u32 %v1847_v1, %v1846_v60  ;;  %v1938_v14 = vshll.u32 %v4296_v51, %v1935_v50  ;;  %v1941_v30 = vshll.u32 %v4297_v54, %v1935_v50 }
0x1118   :  { %v1853_v5 = vsel %vm1849_vm14, %v1833_v2, %v1836_v3  ;;  %v1854_v19 = vsel %vm1852_vm2, %v1842_v8, 2102212464  ;;  %v1857_v0 = vsel %vm1849_vm14, %v1836_v3, %v1839_v6  ;;  %v1861_v16 = vsel %vm1849_vm14, %v1839_v6, %v1842_v8 }
0x1119   :  { %v1855_v27 = vsel %vm1851_vm1, %v1839_v6, %v1854_v19  ;;  %v1858_v39 = vsel %vm1852_vm2, %v1845_v13, 920167782  ;;  %v1862_v18 = vsel %vm1852_vm2, %v1848_v28, 1326507024  ;;  %v1937_v11 = vshrl.u32 %v4296_v51, %v1936_v9 }
0x111a   :  { %v1859_v21 = vsel %vm1851_vm1, %v1842_v8, %v1858_v39  ;;  %v1863_v12 = vsel %vm1851_vm1, %v1845_v13, %v1862_v18  ;;  %v1939_v25 = vshrl.u32 %v4297_v54, %v1936_v9  ;;  %v1856_v24 = vsel %vm1850_vm15, %v1853_v5, %v1855_v27 }
0x111b   :  { %v1860_v15 = vsel %vm1850_vm15, %v1857_v0, %v1859_v21  ;;  %v1864_v31 = vsel %vm1850_vm15, %v1861_v16, %v1863_v12  ;;  %v1942_v48 = vshrl.u32 %v4298_v56, %v1936_v9  ;;  %v1944_v61 = vshll.u32 %v4298_v56, %v1935_v50 }
0x111c   :  { %v4889_v43 = vmul.u32.u64.low %v4873_v49, %v1864_v31  ;;  %v4890_v32 = vmul.u32.u64.high %v4873_v49, %v1864_v31, %v4889_v43  ;;  %v4893_v20 = vmul.u32.u64.low %v4873_v49, %v1860_v15  ;;  %v4894_v34 = vmul.u32.u64.high %v4873_v49, %v1860_v15, %v4893_v20 }
0x111d   :  { %v1940_v36 = vor.u32 %v1939_v25, %v1938_v14  ;;  %v1943_v17 = vor.u32 %v1942_v48, %v1941_v30  ;;  %v1945_v7 = vshrl.u32 %v4299_v33, %v1936_v9  ;;  %v1947_v29 = vshll.u32 %v4299_v33, %v1935_v50 }
0x111e   :  { %v1948_v38 = vshrl.u32 %v4300_v59, %v1936_v9  ;;  %v1950_v57 = vshll.u32 %v4300_v59, %v1935_v50  ;;  %v1951_v42 = vshrl.u32 %v4301_v63, %v1936_v9  ;;  %v1872_v10 = vmul.u32 %v4873_v49, %v1856_v24 }
0x111f   :  { %v1946_v44 = vor.u32 %v1945_v7, %v1944_v61  ;;  %vm1953_vm3 = vcmp.lt.s32.totalorder %v4877_v46, 1  ;;  %vm1954_vm4 = vcmp.lt.s32.totalorder %v4877_v46, 2  ;;  %vm1874_vm5 = vc.u32 %v4890_v32, %v4893_v20 }
0x1120   :  { %v1875_v47 = vadd.s32 1, %v4894_v34  ;;  %v1949_v51 = vor.u32 %v1948_v38, %v1947_v29  ;;  %vm1955_vm6 = vcmp.lt.s32.totalorder %v4877_v46, 3  ;;  %v1952_v53 = vor.u32 %v1951_v42, %v1950_v57 }
0x1121   :  { %vm1956_vm7 = vcmp.lt.s32.totalorder %v4877_v46, 4  ;;  %v1957_v50 = vsel %vm1953_vm3, %v1937_v11, %v1940_v36  ;;  %v1961_v54 = vsel %vm1953_vm3, %v1940_v36, %v1943_v17  ;;  %v1965_v35 = vsel %vm1953_vm3, %v1943_v17, %v1946_v44 }
0x1122   :  { %v1876_v49 = vsel %vm1874_vm5, %v1875_v47, %v4894_v34  ;;  %v1958_v55 = vsel %vm1956_vm7, %v1946_v44, 2102212464  ;;  %v1962_v56 = vsel %vm1956_vm7, %v1949_v51, 920167782  ;;  %v1966_v60 = vsel %vm1956_vm7, %v1952_v53, 1326507024 }
0x1123   :  { %v1877_v33 = vadd.s32 %v1876_v49, %v1872_v10  ;;  %v1959_v4 = vsel %vm1955_vm6, %v1943_v17, %v1958_v55  ;;  %v1963_v59 = vsel %vm1955_vm6, %v1946_v44, %v1962_v56  ;;  %v1967_v62 = vsel %vm1955_vm6, %v1949_v51, %v1966_v60 }
0x1124   :  { %v1960_v2 = vsel %vm1954_vm4, %v1957_v50, %v1959_v4  ;;  %v1964_v52 = vsel %vm1954_vm4, %v1961_v54, %v1963_v59  ;;  %v2080_v26 = vlaneseq  ;;  %v1968_v63 = vsel %vm1954_vm4, %v1965_v35, %v1967_v62 }
0x1125   :  { %v1878_v37 = vadd.s32 536870912, %v1877_v33  ;;  %v4913_v1 = vmul.u32.u64.low %v4875_v45, %v1964_v52  ;;  %v4914_v3 = vmul.u32.u64.high %v4875_v45, %v1964_v52, %v4913_v1  ;;  %v2082_v28 = vstv %s5380_s0  ;;  %s4303_s0 = smov 1  }
0x1126   :  { %v4917_v6 = vmul.u32.u64.low %v4875_v45, %v1968_v63  ;;  %v4918_v8 = vmul.u32.u64.high %v4875_v45, %v1968_v63, %v4917_v6  ;;  %v2081_v9 = vand.u32 127, %v2080_v26  ;;  %v1976_v14 = vmul.u32 %v4875_v45, %v1960_v2 }
0x1127   :  { %v1879_v13 = vshrl.u32 %v1878_v37, 30  ;;  %v1979_v46 = vadd.s32 1, %v4914_v3  ;;  %v4302_v19 = vmov 0.0   ;;  %v1873_v15 = vadd.s32 %v4893_v20, %v4890_v32 }
0x1128   :  { %vm2083_vm8 = vcmp.lt.s32.totalorder %v2081_v9, %v2082_v28  ;;  %vm1978_vm9 = vc.u32 %v4918_v8, %v4913_v1  ;;  %v1977_v47 = vadd.s32 %v4913_v1, %v4918_v8  ;;  %vm1923_vm14 = vcmp.lt.s32.totalorder %v4860_v22, 0 }
0x1129   :  { %v1880_v5 = vshll.u32 %v1879_v13, 30  ;;  %v4925_v0 = vsel %vm2083_vm8, 1.0, %v4302_v19  ;;  %v1980_v27 = vsel %vm1978_vm9, %v1979_v46, %v4914_v3  ;;  %v1903_v32 = vsub.s32 4, %v1879_v13 }
0x112a   :  { %2086 = vadd.xlane.f32.xlu0 %v4925_v0  ;;  %v1981_v39 = vadd.s32 %v1980_v27, %v1976_v14  ;;  %vm1922_vm15 = vcmp.le.f32.partialorder %v1921_v40, 0.7853982  ;;  %vm1909_vm4 = vweird.f32 %v4858_v23  ;;  %vm2013_vm8 = vweird.f32 %v4860_v22 }
0x112b   :  { %v1881_v16 = vsub.s32 %v1877_v33, %v1880_v5  ;;  %v1904_v33 = vsel %vm1819_vm12, %v1903_v32, %v1879_v13 }
0x112c   :  { %v1982_v30 = vadd.s32 536870912, %v1981_v39  ;;  %v1906_v52 = vsel %vm1818_vm13, 0, %v1904_v33 }
0x112d   :  { %v1883_v18 = vsub.s32 0, %v1881_v16  ;;  %v1910_v1 = vadd.s32 3, %v1906_v52 }
0x112e   :  { %v1983_v12 = vshrl.u32 %v1982_v30, 30 }
0x112f   :  { %v3641_v21 = vmin.u32 %v1883_v18, %v1881_v16  ;;  %v1911_v8 = vand.u32 3, %v1910_v1 }
0x1130   :  { %v1984_v11 = vshll.u32 %v1983_v12, 30  ;;  %v2007_v63 = vsub.s32 4, %v1983_v12 }
0x1131   :  { %v1885_v45 = vclz %v3641_v21  ;;  %vm1916_vm1 = vcmp.eq.s32.totalorder %v1911_v8, 2  ;;  %vm1913_vm2 = vcmp.eq.s32.totalorder %v1911_v8, 0  ;;  %vm1912_vm3 = vcmp.lt.s32.totalorder %v1911_v8, 2 }
0x1132   :  { %v1985_v24 = vsub.s32 %v1981_v39, %v1984_v11  ;;  %v2008_v6 = vsel %vm1923_vm14, %v2007_v63, %v1983_v12 }
0x1133   :  { %v3642_v25 = vadd.s32 4294967294, %v1885_v45  ;;  %v2010_v28 = vsel %vm1922_vm15, 0, %v2008_v6 }
0x1134   :  { %v1987_v48 = vsub.s32 0, %v1985_v24  ;;  %v2014_v19 = vadd.s32 3, %v2010_v28 }
0x1135   :  { %vm3643_vm10 = vcmp.lt.s32.totalorder %v3642_v25, 0 }
0x1136   :  { %v1888_v31 = vsel %vm3643_vm10, 0, %v3642_v25  ;;  %v3645_v17 = vmin.u32 %v1987_v48, %v1985_v24  ;;  %v2015_v40 = vand.u32 3, %v2014_v19 }
0x1137   :  { %v1889_v43 = vsub.s32 32, %v1888_v31  ;;  %v1890_v34 = vshll.u32 %v1881_v16, %v1888_v31  ;;  %v1893_v36 = vsub.s32 4294967266, %v1888_v31 }
0x1138   :  { %v1989_v29 = vclz %v3645_v17  ;;  %vm2020_vm5 = vcmp.eq.s32.totalorder %v2015_v40, 2  ;;  %vm2017_vm6 = vcmp.eq.s32.totalorder %v2015_v40, 0  ;;  %vm2016_vm7 = vcmp.lt.s32.totalorder %v2015_v40, 2 }
0x1139   :  { %v1891_v61 = vshrl.u32 %v1873_v15, %v1889_v43  ;;  %v1894_v7 = vadd.s32 127, %v1893_v36 }
0x113a   :  { %v3646_v42 = vadd.s32 4294967294, %v1989_v29 }
0x113b   :  { %v1892_v38 = vor.u32 %v1891_v61, %v1890_v34  ;;  %v1895_v57 = vshll.u32 %v1894_v7, 23 }
0x113c   :  { %vm3647_vm11 = vcmp.lt.s32.totalorder %v3646_v42, 0 }
0x113d   :  { %v1896_v10 = vor.u32 4788187, %v1895_v57  ;;  %v1899_v44 = vcvt.s32.f32 %v1892_v38  ;;  %v1992_v20 = vsel %vm3647_vm11, 0, %v3646_v42 }
0x113e   :  { %v1993_v53 = vsub.s32 32, %v1992_v20  ;;  %v1994_v50 = vshll.u32 %v1985_v24, %v1992_v20  ;;  %v1997_v54 = vsub.s32 4294967266, %v1992_v20 }
0x113f   :  { %v1897_v51 = vand.u32 2147483647, %v1896_v10 }
0x1140   :  { %v1995_v55 = vshrl.u32 %v1977_v47, %v1993_v53  ;;  %v1998_v56 = vadd.s32 127, %v1997_v54 }
0x1141   :  { %v1900_v49 = vmul.f32 %v1899_v44, %v1897_v51 }
0x1142   :  { %v1996_v4 = vor.u32 %v1995_v55, %v1994_v50  ;;  %v1999_v59 = vshll.u32 %v1998_v56, 23 }
0x1143   :  { %v1901_v35 = vxor.u32 2147483648, %v1900_v49 }
0x1144   :  { %v2000_v62 = vor.u32 4788187, %v1999_v59  ;;  %v2003_v26 = vcvt.s32.f32 %v1996_v4 }
0x1145   :  { %v1902_v60 = vsel %vm1819_vm12, %v1901_v35, %v1900_v49 }
0x1146   :  { %v1905_v2 = vsel %vm1818_vm13, %v4858_v23, %v1902_v60  ;;  %v2001_v37 = vand.u32 2147483647, %v2000_v62 }
0x1147   :  { %4078 = vcosq.f32 %v1905_v2 }
0x1148   :  { %4080 = vsinq.f32 %v1905_v2  ;;  %v2004_v3 = vmul.f32 %v2003_v26, %v2001_v37 }
0x114a   :  { %v2005_v41 = vxor.u32 2147483648, %v2004_v3 }
0x114c   :  { %v2006_v9 = vsel %vm1923_vm14, %v2005_v41, %v2004_v3 }
0x114d   :  { %v2009_v13 = vsel %vm1922_vm15, %v4860_v22, %v2006_v9 }
0x114e   :  { %4082 = vcosq.f32 %v2009_v13 }
0x114f   :  { %4084 = vsinq.f32 %v2009_v13 }
0x1151   :  { %v4079_v14 = vpop.eup %4078 }
0x1152   :  { %v4081_v5 = vpop.eup %4080  ;;  %v1917_v46 = vxor.u32 2147483648, %v4079_v14 }
0x1153   :  { %v1914_v16 = vxor.u32 2147483648, %v4081_v5 }
0x1154   :  { %v1918_v27 = vsel %vm1916_vm1, %v1917_v46, %v4081_v5 }
0x1155   :  { %v1915_v39 = vsel %vm1913_vm2, %v4079_v14, %v1914_v16 }
0x1156   :  { %v1919_v18 = vsel %vm1912_vm3, %v1915_v39, %v1918_v27 }
0x1157   :  { %v1920_v21 = vsel %vm1909_vm4, nan, %v1919_v18 }
0x1158   :  { %v4083_v30 = vpop.eup %4082  ;;  %v2025_v24 = vmul.f32 2.0, %v1920_v21 }
0x1159   :  { %v4085_v12 = vpop.eup %4084  ;;  %v2021_v45 = vxor.u32 2147483648, %v4083_v30 }
0x115a   :  { %v2018_v11 = vxor.u32 2147483648, %v4085_v12 }
0x115b   :  { %v2022_v25 = vsel %vm2020_vm5, %v2021_v45, %v4085_v12  ;;  %v4054_v12 = vld [vmem:[#allocation7] ss:$8 sps:$4 sm:$0xff]   ;;  %v4057_v45 = vld [vmem:[#allocation7 + $0x14] ss:$8 sps:$4 sm:$0xff]  }
0x115c   :  { %v2019_v15 = vsel %vm2017_vm6, %v4083_v30, %v2018_v11  ;;  %v4059_v11 = vld [vmem:[#allocation7 + $0x10] ss:$8 sps:$4 sm:$0xff]  }
0x115d   :  { %v2023_v31 = vsel %vm2016_vm7, %v2019_v15, %v2022_v25  ;;  %v4060_v25 = vld [vmem:[#allocation7 + $0x24] ss:$8 sps:$4 sm:$0xff]   ;;  %v4063_v15 = vld [vmem:[#allocation7 + $0x34] ss:$8 sps:$4 sm:$0xff]  }
0x115e   :  { %v2024_v48 = vsel %vm2013_vm8, nan, %v2023_v31  ;;  %v4065_v31 = vld [vmem:[#allocation7 + $0x30] ss:$8 sps:$4 sm:$0xff]  }
0x115f   :  { %v2026_v43 = vmul.f32 %v2025_v24, %v2024_v48  ;;  %v2027_v34 = vsub.f32 %v2024_v48, %v1920_v21  ;;  %v2028_v36 = vadd.f32 %v2024_v48, %v1920_v21  ;;  %v2070_v23 = vpack.c.bf16 %v2024_v48, %v1920_v21  ;;  %v4062_v24 = vld [vmem:[#allocation7 + $0x20] ss:$8 sps:$4 sm:$0xff]  }
0x1161   :  { %v2029_v17 = vmul.f32 %v2028_v36, %v2027_v34  ;;  %2148 = vmatpush1.bf16.msra.mxu0 %v2070_v23  ;;  %v2030_v61 = vmul.f32 2.0, %v2026_v43 }
0x1162   :  { %2149 = vmatprep.subr.bf16.mxu0 %v4295_v58 }
0x1163   :  { %v2071_v7 = vpack.c.bf16 %v2029_v17, %v2026_v43  ;;  %v2031_v29 = vmul.f32 %v2030_v61, %v2029_v17  ;;  %v2032_v38 = vsub.f32 %v2029_v17, %v2026_v43  ;;  %v2033_v57 = vadd.f32 %v2029_v17, %v2026_v43 }
0x1165   :  { %2150 = vmatpush1.bf16.msra.mxu0 %v2071_v7  ;;  %v2034_v22 = vmul.f32 %v2033_v57, %v2032_v38  ;;  %v2035_v42 = vmul.f32 2.0, %v2031_v29 }
0x1166   :  { %2151 = vmatprep.subr.bf16.mxu0 %v4295_v58 }
0x1167   :  { %v2072_v10 = vpack.c.bf16 %v2034_v22, %v2031_v29  ;;  %v2036_v44 = vmul.f32 %v2035_v42, %v2034_v22  ;;  %v2037_v47 = vsub.f32 %v2034_v22, %v2031_v29  ;;  %v2038_v51 = vadd.f32 %v2034_v22, %v2031_v29 }
0x1169   :  { %2152 = vmatpush1.bf16.msra.mxu0 %v2072_v10  ;;  %v2039_v32 = vmul.f32 %v2038_v51, %v2037_v47  ;;  %v2040_v20 = vmul.f32 2.0, %v2036_v44 }
0x116a   :  { %2153 = vmatprep.subr.bf16.mxu0 %v4295_v58 }
0x116b   :  { %v2073_v53 = vpack.c.bf16 %v2039_v32, %v2036_v44  ;;  %v2041_v50 = vmul.f32 %v2040_v20, %v2039_v32  ;;  %v2042_v54 = vsub.f32 %v2039_v32, %v2036_v44  ;;  %v2043_v49 = vadd.f32 %v2039_v32, %v2036_v44 }
0x116d   :  { %2154 = vmatpush1.bf16.msra.mxu0 %v2073_v53  ;;  %v2044_v55 = vmul.f32 %v2043_v49, %v2042_v54  ;;  %v2045_v56 = vmul.f32 2.0, %v2041_v50 }
0x116e   :  { %2155 = vmatprep.subr.bf16.mxu0 %v4295_v58 }
0x116f   :  { %v2074_v35 = vpack.c.bf16 %v2044_v55, %v2041_v50  ;;  %v2046_v33 = vmul.f32 %v2045_v56, %v2044_v55  ;;  %v2047_v4 = vsub.f32 %v2044_v55, %v2041_v50  ;;  %v2048_v59 = vadd.f32 %v2044_v55, %v2041_v50 }
0x1171   :  { %2156 = vmatpush1.bf16.msra.mxu0 %v2074_v35  ;;  %v2049_v60 = vmul.f32 %v2048_v59, %v2047_v4  ;;  %v2050_v2 = vmul.f32 2.0, %v2046_v33 }
0x1172   :  { %2157 = vmatprep.subr.bf16.mxu0 %v4295_v58 }
0x1173   :  { %v2075_v52 = vpack.c.bf16 %v2049_v60, %v2046_v33  ;;  %v2051_v62 = vmul.f32 %v2050_v2, %v2049_v60  ;;  %v2052_v26 = vsub.f32 %v2049_v60, %v2046_v33  ;;  %v2053_v37 = vadd.f32 %v2049_v60, %v2046_v33 }
0x1175   :  { %2158 = vmatpush1.bf16.msra.mxu0 %v2075_v52  ;;  %v2054_v63 = vmul.f32 %v2053_v37, %v2052_v26  ;;  %v2055_v1 = vmul.f32 2.0, %v2051_v62 }
0x1176   :  { %2159 = vmatprep.subr.bf16.mxu0 %v4295_v58 }
0x1177   :  { %v2076_v3 = vpack.c.bf16 %v2054_v63, %v2051_v62  ;;  %v2056_v41 = vmul.f32 %v2055_v1, %v2054_v63  ;;  %v2057_v6 = vsub.f32 %v2054_v63, %v2051_v62  ;;  %v2058_v8 = vadd.f32 %v2054_v63, %v2051_v62 }
0x1179   :  { %2160 = vmatpush1.bf16.msra.mxu0 %v2076_v3  ;;  %v2059_v9 = vmul.f32 %v2058_v8, %v2057_v6  ;;  %v2060_v13 = vmul.f32 2.0, %v2056_v41 }
0x117a   :  { %2161 = vmatprep.subr.bf16.mxu0 %v4295_v58 }
0x117b   :  { %v2077_v28 = vpack.c.bf16 %v2059_v9, %v2056_v41  ;;  %v2061_v14 = vmul.f32 %v2060_v13, %v2059_v9  ;;  %v2062_v5 = vsub.f32 %v2059_v9, %v2056_v41  ;;  %v2063_v46 = vadd.f32 %v2059_v9, %v2056_v41 }
0x117d   :  { %2162 = vmatpush1.bf16.msra.mxu0 %v2077_v28  ;;  %v2064_v19 = vmul.f32 %v2063_v46, %v2062_v5  ;;  %v2065_v16 = vmul.f32 2.0, %v2061_v14 }
0x117e   :  { %2163 = vmatprep.subr.bf16.mxu0 %v4295_v58 }
0x117f   :  { %v2078_v27 = vpack.c.bf16 %v2064_v19, %v2061_v14  ;;  %v2066_v39 = vmul.f32 %v2065_v16, %v2064_v19  ;;  %v2067_v40 = vsub.f32 %v2064_v19, %v2061_v14  ;;  %v2068_v18 = vadd.f32 %v2064_v19, %v2061_v14 }
0x1181   :  { %2164 = vmatpush1.bf16.msra.mxu0 %v2078_v27  ;;  %v2069_v30 = vmul.f32 %v2068_v18, %v2067_v40  ;;  %v4985_v27 = vld [vmem:[#allocation10 + $0x8] sm:$0xff]  ;;  %v4987_v40 = vld [vmem:[#allocation10] sm:$0xff] }
0x1182   :  { %2165 = vmatprep.subr.bf16.mxu0 %v4295_v58 }
0x1183   :  { %v2079_v21 = vpack.c.bf16 %v2069_v30, %v2066_v39 }
0x1185   :  { %2166 = vmatpush1.bf16.msra.mxu0 %v2079_v21 }
0x1188   :  { %2180 = vmatmul.mubr.bf16.vlgmr.msra.gmra.mrb[0].mxu0 %v4054_v12 }
0x1189   :  { %3658 = vmatprep.mubr.msk.bf16.mxu0 %vm2134_vm0, %v4057_v45 }
0x1190   :  { %2188 = vmatmul.mubr.bf16.gmra.mrb[4].mxu0 %v4059_v11  ;;  %v4993_v11 = vld [vmem:[#allocation10 + $0x10] sm:$0xff] }
0x1191   :  { %3659 = vmatprep.mubr.msk.bf16.mxu0 %vm2134_vm0, %v4060_v25 }
0x1198   :  { %2196 = vmatmul.mubr.bf16.gmra.mrb[8].mxu0 %v4062_v24  ;;  %v4995_v24 = vld [vmem:[#allocation10 + $0x18] sm:$0xff] }
0x1199   :  { %3660 = vmatprep.mubr.msk.bf16.mxu0 %vm2134_vm0, %v4063_v15 }
0x11a0   :  { %2204 = vmatmul.mubr.bf16.gmra.mrb[12].mxu0 %v4065_v31 }
0x11b7   :  { %v2087_v47 = vpop.xlane.xlu0 %2086 }
0x11b8   :  { %4086 = vrcp.f32 %v2087_v47 }
0x11c2   :  { %v4975_v51 = vpop.eup %4086 }
0x125b   :  { %v4955_v58 = vpop.f32.mrb[0].mxu0 }
0x125c   :  { %v2183_v48 = vpop.f32.mrb[1].mxu0  ;;  %v2216_v43 = vmul.f32 %v4925_v0, %v4955_v58 }
0x125d   :  { %v4959_v34 = vpop.f32.mrb[2].mxu0 }
0x125e   :  { %2220 = vadd.xlane.f32.xlu0 %v2216_v43  ;;  %v2186_v36 = vpop.f32.mrb[3].mxu0  ;;  %v2217_v23 = vmul.f32 %v4925_v0, %v4959_v34  ;;  %v2228_v61 = vmul.f32 %v2216_v43, %v4955_v58 }
0x1260   :  { %2222 = vadd.xlane.f32.xlu1 %v2217_v23  ;;  %v2229_v17 = vmul.f32 %v2217_v23, %v4959_v34  ;;  %v4304_v23 = vmov 1  }
0x1262   :  { %2234 = vadd.xlane.f32.xlu0 %v2229_v17 }
0x1263   :  { %v4965_v7 = vpop.f32.mrb[4].mxu0 }
0x1264   :  { %2232 = vadd.xlane.f32.xlu1 %v2228_v61  ;;  %v2191_v29 = vpop.f32.mrb[5].mxu0  ;;  %v2218_v22 = vmul.f32 %v4925_v0, %v4965_v7 }
0x1265   :  { %v4967_v38 = vpop.f32.mrb[6].mxu0 }
0x1266   :  { %v2194_v57 = vpop.f32.mrb[7].mxu0  ;;  %v2219_v42 = vmul.f32 %v4925_v0, %v4967_v38  ;;  %v2230_v10 = vmul.f32 %v2218_v22, %v4965_v7 }
0x1268   :  { %2224 = vadd.xlane.f32.xlu1 %v2218_v22  ;;  %2226 = vadd.xlane.f32.xlu0 %v2219_v42  ;;  %v2231_v44 = vmul.f32 %v2219_v42, %v4967_v38 }
0x126b   :  { %v5001_v17 = vpop.f32.mrb[8].mxu0 }
0x126c   :  { %2236 = vadd.xlane.f32.xlu1 %v2230_v10  ;;  %2238 = vadd.xlane.f32.xlu0 %v2231_v44  ;;  %v2199_v61 = vpop.f32.mrb[9].mxu0 }
0x126d   :  { %v5003_v29 = vpop.f32.mrb[10].mxu0 }
0x126e   :  { %v2202_v57 = vpop.f32.mrb[11].mxu0 }
0x1273   :  { %v5005_v22 = vpop.f32.mrb[12].mxu0 }
0x1274   :  { %v2207_v42 = vpop.f32.mrb[13].mxu0 }
0x1275   :  { %v5007_v10 = vpop.f32.mrb[14].mxu0 }
0x1276   :  { %v2210_v44 = vpop.f32.mrb[15].mxu0 }
0x12eb   :  { %v2221_v32 = vpop.xlane.xlu0 %2220 }
0x12ec   :  { %v2240_v53 = vmul.f32 %v4975_v51, %v2221_v32 }
0x12ed   :  { %v2223_v20 = vpop.xlane.xlu1 %2222 }
0x12ee   :  { %v2241_v50 = vmul.f32 %v4975_v51, %v2223_v20  ;;  %v2248_v35 = vmul.f32 %v2240_v53, %v2240_v53 }
0x12ef   :  { %v2235_v54 = vpop.xlane.xlu0 %2234 }
0x12f0   :  { %v2249_v49 = vmul.f32 %v2241_v50, %v2241_v50  ;;  %v2245_v55 = vmul.f32 %v4975_v51, %v2235_v54 }
0x12f1   :  { %v2233_v56 = vpop.xlane.xlu1 %2232 }
0x12f2   :  { %v2253_v33 = vsub.f32 %v2245_v55, %v2249_v49  ;;  %v2244_v4 = vmul.f32 %v4975_v51, %v2233_v56  ;;  %v4066_v56 = vld [vmem:[#allocation9] sm:$0xff]  }
0x12f3   :  { %3785 = vmatprep.mubr.msk.bf16.mxu1 %vm2134_vm0, %v4066_v56 }
0x12f4   :  { %v2257_v59 = vmax.f32 %v2253_v33, 0.0  ;;  %v2252_v60 = vsub.f32 %v2244_v4, %v2248_v35  ;;  %v2547_v35 = vmul.f32 %v4925_v0, %v5001_v17  ;;  %v2548_v33 = vmul.f32 %v4925_v0, %v5003_v29 }
0x12f5   :  { %v2225_v2 = vpop.xlane.xlu1 %2224  ;;  %v2227_v52 = vpop.xlane.xlu0 %2226 }
0x12f6   :  { %v2261_v62 = vadd.f32 1e-05, %v2257_v59  ;;  %v2256_v26 = vmax.f32 %v2252_v60, 0.0  ;;  %v2242_v37 = vmul.f32 %v4975_v51, %v2225_v2  ;;  %v2243_v63 = vmul.f32 %v4975_v51, %v2227_v52 }
0x12f7   :  { %v2560_v4 = vmul.f32 %v2548_v33, %v5003_v29  ;;  %v2559_v59 = vmul.f32 %v2547_v35, %v5001_v17  ;;  %v5022_v60 = vmul.f32 %v4925_v0, %v5007_v10  ;;  %v5026_v2 = vmul.f32 %v4925_v0, %v5005_v22 }
0x12f8   :  { %4088 = vrsqrt.f32 %v2261_v62  ;;  %v2260_v1 = vadd.f32 1e-05, %v2256_v26  ;;  %v2250_v3 = vmul.f32 %v2242_v37, %v2242_v37  ;;  %v2251_v8 = vmul.f32 %v2243_v63, %v2243_v63 }
0x12f9   :  { %v2237_v41 = vpop.xlane.xlu1 %2236  ;;  %v2239_v6 = vpop.xlane.xlu0 %2238 }
0x12fa   :  { %4090 = vrsqrt.f32 %v2260_v1  ;;  %v2246_v9 = vmul.f32 %v4975_v51, %v2237_v41  ;;  %v2247_v13 = vmul.f32 %v4975_v51, %v2239_v6 }
0x12fc   :  { %v2254_v28 = vsub.f32 %v2246_v9, %v2250_v3  ;;  %v2255_v14 = vsub.f32 %v2247_v13, %v2251_v8 }
0x12fe   :  { %v2258_v5 = vmax.f32 %v2254_v28, 0.0  ;;  %v2259_v46 = vmax.f32 %v2255_v14, 0.0 }
0x1300   :  { %v2262_v19 = vadd.f32 1e-05, %v2258_v5  ;;  %v2263_v16 = vadd.f32 1e-05, %v2259_v46 }
0x1302   :  { %v4089_v39 = vpop.eup %4088  ;;  %4092 = vrsqrt.f32 %v2262_v19 }
0x1303   :  { %4094 = vrsqrt.f32 %v2263_v16  ;;  %v2269_v18 = vmul.f32 %v4089_v39, %v4985_v27 }
0x1304   :  { %v4091_v30 = vpop.eup %4090 }
0x1305   :  { %v2297_v21 = vmul.f32 %v2269_v18, %v2241_v50  ;;  %v2268_v12 = vmul.f32 %v4091_v30, %v4987_v40  ;;  %v4067_v30 = vld [vmem:[#allocation9 + $0x8] sm:$0xff]  }
0x1307   :  { %2306 = vrot.lane.b32.xlu0 %v2297_v21, %s4303_s0  ;;  %v2296_v45 = vmul.f32 %v2268_v12, %v2240_v53 }
0x1309   :  { %2304 = vrot.lane.b32.xlu1 %v2296_v45, %s4303_s0 }
0x130b   :  { %2279 = vperm.xlu0 %4022, %v2269_v18  }
0x130c   :  { %v4093_v25 = vpop.eup %4092 }
0x130d   :  { %v4095_v15 = vpop.eup %4094  ;;  %v2270_v31 = vmul.f32 %v4093_v25, %v4993_v11 }
0x130e   :  { %v2271_v43 = vmul.f32 %v4095_v15, %v4995_v24 }
0x130f   :  { %2284 = vperm.xlu0 %4022, %v2270_v31   ;;  %v2298_v48 = vmul.f32 %v2270_v31, %v2242_v37 }
0x1310   :  { %v2299_v36 = vmul.f32 %v2271_v43, %v2243_v63 }
0x1311   :  { %2308 = vrot.lane.b32.xlu1 %v2298_v48, %s4303_s0 }
0x1313   :  { %4024 = vset.pattern.permute.xlu0 %v4304_v23 }
0x1315   :  { %2310 = vrot.lane.b32.xlu1 %v2299_v36, %s4303_s0 }
0x1319   :  { %2274 = vperm.xlu1 %4021, %v2268_v12  }
0x131d   :  { %2289 = vperm.xlu1 %4021, %v2271_v43  }
0x1321   :  { %4023 = vset.pattern.permute.xlu1 %v4304_v23 }
0x1379   :  { %v2307_v20 = vpop.permute.xlu0 %2306 }
0x137a   :  { %v2317_v53 = vsub.f32 %v4985_v27, %v2307_v20 }
0x137b   :  { %v2305_v47 = vpop.permute.xlu1 %2304 }
0x137c   :  { %v2316_v32 = vsub.f32 %v4987_v40, %v2305_v47 }
0x137e   :  { %2322 = vperm.xlu1 %4023, %v2316_v32  }
0x1382   :  { %2327 = vperm.xlu1 %4023, %v2317_v53  }
0x1383   :  { %v2309_v50 = vpop.permute.xlu1 %2308 }
0x1384   :  { %v2318_v54 = vsub.f32 %v4993_v11, %v2309_v50 }
0x1386   :  { %2332 = vperm.xlu0 %4024, %v2318_v54  }
0x1387   :  { %v2311_v49 = vpop.permute.xlu1 %2310 }
0x1388   :  { %v2319_v55 = vsub.f32 %v4995_v24, %v2311_v49 }
0x138a   :  { %2337 = vperm.xlu1 %4023, %v2319_v55   ;;  %v2280_v26 = vpop.permute.xlu0 %2279 }
0x138b   :  { %v2293_v1 = vmul.f32 %v2280_v26, %v4959_v34 }
0x138e   :  { %v2285_v41 = vpop.permute.xlu0 %2284 }
0x138f   :  { %v2294_v14 = vmul.f32 %v2285_v41, %v4965_v7 }
0x1398   :  { %v2275_v52 = vpop.permute.xlu1 %2274 }
0x1399   :  { %v2292_v63 = vmul.f32 %v2275_v52, %v4955_v58  ;;  %v2562_v52 = vmul.f32 %v5022_v60, %v5007_v10 }
0x139c   :  { %v2290_v62 = vpop.permute.xlu1 %2289 }
0x139d   :  { %v2295_v46 = vmul.f32 %v2290_v62, %v4967_v38 }
0x13a5   :  { %2551 = vadd.xlane.f32.xlu0 %v2547_v35 }
0x13a9   :  { %2553 = vadd.xlane.f32.xlu0 %v2548_v33 }
0x13ad   :  { %2565 = vadd.xlane.f32.xlu0 %v2560_v4 }
0x13ae   :  { %2563 = vadd.xlane.f32.xlu1 %v2559_v59  ;;  %v2561_v59 = vmul.f32 %v5026_v2, %v5005_v22 }
0x13b1   :  { %2557 = vadd.xlane.f32.xlu0 %v5022_v60 }
0x13b2   :  { %2555 = vadd.xlane.f32.xlu1 %v5026_v2 }
0x13fd   :  { %v2323_v37 = vpop.permute.xlu1 %2322 }
0x13fe   :  { %v2340_v3 = vadd.f32 %v2323_v37, %v2292_v63 }
0x1400   :  { %v2344_v9 = vmax.f32 %v2340_v3, 0.0  ;;  %v4305_v3 = vmov 2  }
0x1401   :  { %v2328_v6 = vpop.permute.xlu1 %2327  ;;  %4025 = vset.pattern.permute.xlu1 %v4305_v3  ;;  %4026 = vset.pattern.permute.xlu0 %v4305_v3 }
0x1402   :  { %v2341_v8 = vadd.f32 %v2328_v6, %v2293_v1 }
0x1404   :  { %v2345_v13 = vmax.f32 %v2341_v8, 0.0 }
0x1405   :  { %v2333_v28 = vpop.permute.xlu0 %2332 }
0x1406   :  { %v2352_v5 = vpack.c.bf16 %v2345_v13, %v2344_v9  ;;  %v2342_v19 = vadd.f32 %v2333_v28, %v2294_v14 }
0x1408   :  { %3781 = vmatprep.subr.bf16.mxu1 %v2352_v5  ;;  %v2346_v58 = vmax.f32 %v2342_v19, 0.0 }
0x1409   :  { %v2338_v16 = vpop.permute.xlu1 %2337  ;;  %3782 = vmatpush3.bf16.msra.mxu1 %v2352_v5 }
0x140a   :  { %v2343_v39 = vadd.f32 %v2338_v16, %v2295_v46 }
0x140c   :  { %v2347_v18 = vmax.f32 %v2343_v39, 0.0 }
0x140e   :  { %v2353_v34 = vpack.c.bf16 %v2347_v18, %v2346_v58 }
0x1410   :  { %3783 = vmatprep.subr.bf16.mxu1 %v2353_v34 }
0x1411   :  { %3784 = vmatpush3.bf16.msra.mxu1 %v2353_v34 }
0x1414   :  { %3786 = vmatmul.mubr.msk.bf16.vlgmr.msra.gmra.mrb[0].mxu1 %vm2134_vm0, %v4067_v30 }
0x1432   :  { %v2552_v21 = vpop.xlane.xlu0 %2551 }
0x1433   :  { %v2571_v7 = vmul.f32 %v4975_v51, %v2552_v21 }
0x1435   :  { %v2579_v36 = vmul.f32 %v2571_v7, %v2571_v7 }
0x1436   :  { %v2554_v12 = vpop.xlane.xlu0 %2553 }
0x1437   :  { %v2572_v23 = vmul.f32 %v4975_v51, %v2554_v12 }
0x1439   :  { %v2580_v32 = vmul.f32 %v2572_v23, %v2572_v23 }
0x143a   :  { %v2566_v48 = vpop.xlane.xlu0 %2565 }
0x143b   :  { %v2564_v45 = vpop.xlane.xlu1 %2563  ;;  %v2576_v42 = vmul.f32 %v4975_v51, %v2566_v48 }
0x143c   :  { %v2575_v38 = vmul.f32 %v4975_v51, %v2564_v45 }
0x143d   :  { %v2584_v53 = vsub.f32 %v2576_v42, %v2580_v32 }
0x143e   :  { %v2583_v44 = vsub.f32 %v2575_v38, %v2579_v36  ;;  %v2558_v41 = vpop.xlane.xlu0 %2557 }
0x143f   :  { %v2588_v55 = vmax.f32 %v2584_v53, 0.0  ;;  %v2556_v60 = vpop.xlane.xlu1 %2555 }
0x1440   :  { %v2587_v50 = vmax.f32 %v2583_v44, 0.0  ;;  %v2573_v48 = vmul.f32 %v4975_v51, %v2556_v60 }
0x1441   :  { %v2592_v4 = vadd.f32 1e-05, %v2588_v55 }
0x1442   :  { %v2591_v56 = vadd.f32 1e-05, %v2587_v50 }
0x1444   :  { %4096 = vrsqrt.f32 %v2591_v56 }
0x1445   :  { %4098 = vrsqrt.f32 %v2592_v4 }
0x144e   :  { %v4097_v62 = vpop.eup %4096 }
0x144f   :  { %v5064_v26 = vmul.f32 %v4097_v62, %v4987_v40  ;;  %v4099_v37 = vpop.eup %4098 }
0x1450   :  { %v5068_v1 = vmul.f32 %v4099_v37, %v4985_v27 }
0x1451   :  { %v2627_v63 = vmul.f32 %v5064_v26, %v2571_v7 }
0x1452   :  { %v2628_v2 = vmul.f32 %v5068_v1, %v2572_v23 }
0x14e7   :  { %v5036_v25 = vpop.f32.mrb[0].mxu1 }
0x14e8   :  { %v5039_v15 = vpop.f32.mrb[1].mxu1  ;;  %v2421_v31 = vmul.f32 %v5036_v25, %v4925_v0 }
0x14e9   :  { %v5043_v43 = vpop.f32.mrb[2].mxu1  ;;  %v2419_v47 = vmul.f32 %v4925_v0, %v5039_v15 }
0x14ea   :  { %v5046_v61 = vpop.f32.mrb[3].mxu1  ;;  %2427 = vadd.xlane.f32.xlu1 %v2421_v31  ;;  %v2422_v57 = vmul.f32 %v5043_v43, %v4925_v0  ;;  %v2433_v54 = vmul.f32 %v5036_v25, %v2421_v31  ;;  %v2574_v31 = vmul.f32 %v4975_v51, %v2558_v41 }
0x14eb   :  { %v2420_v20 = vmul.f32 %v4925_v0, %v5046_v61  ;;  %v2431_v35 = vmul.f32 %v2419_v47, %v5039_v15 }
0x14ec   :  { %2429 = vadd.xlane.f32.xlu0 %v2422_v57  ;;  %v2434_v49 = vmul.f32 %v5043_v43, %v2422_v57 }
0x14ed   :  { %v2432_v33 = vmul.f32 %v2420_v20, %v5046_v61 }
0x14ee   :  { %2423 = vadd.xlane.f32.xlu1 %v2419_v47 }
0x14f0   :  { %2425 = vadd.xlane.f32.xlu0 %v2420_v20 }
0x14f2   :  { %2439 = vadd.xlane.f32.xlu1 %v2433_v54  ;;  %v2582_v54 = vmul.f32 %v2574_v31, %v2574_v31 }
0x14f4   :  { %2441 = vadd.xlane.f32.xlu0 %v2434_v49  ;;  %v2581_v49 = vmul.f32 %v2573_v48, %v2573_v48 }
0x14f6   :  { %2435 = vadd.xlane.f32.xlu1 %v2431_v35 }
0x14f8   :  { %2437 = vadd.xlane.f32.xlu0 %v2432_v33 }
0x14fa   :  { %2567 = vadd.xlane.f32.xlu1 %v2561_v59 }
0x14fc   :  { %2569 = vadd.xlane.f32.xlu0 %v2562_v52 }
0x150b   :  { %2635 = vrot.lane.b32.xlu1 %v2627_v63, %s4303_s0 }
0x150f   :  { %2637 = vrot.lane.b32.xlu1 %v2628_v2, %s4303_s0 }
0x1577   :  { %v2428_v6 = vpop.xlane.xlu1 %2427 }
0x1578   :  { %v2445_v13 = vmul.f32 %v4975_v51, %v2428_v6 }
0x1579   :  { %v2430_v8 = vpop.xlane.xlu0 %2429 }
0x157a   :  { %v2446_v14 = vmul.f32 %v4975_v51, %v2430_v8  ;;  %v2453_v46 = vmul.f32 %v2445_v13, %v2445_v13 }
0x157b   :  { %v2424_v9 = vpop.xlane.xlu1 %2423 }
0x157c   :  { %v2443_v19 = vmul.f32 %v4975_v51, %v2424_v9  ;;  %v2454_v18 = vmul.f32 %v2446_v14, %v2446_v14 }
0x157d   :  { %v2426_v28 = vpop.xlane.xlu0 %2425 }
0x157e   :  { %v2444_v39 = vmul.f32 %v4975_v51, %v2426_v28  ;;  %v2451_v12 = vmul.f32 %v2443_v19, %v2443_v19 }
0x157f   :  { %v2440_v5 = vpop.xlane.xlu1 %2439 }
0x1580   :  { %v2449_v16 = vmul.f32 %v4975_v51, %v2440_v5  ;;  %v2452_v36 = vmul.f32 %v2444_v39, %v2444_v39 }
0x1581   :  { %v2442_v58 = vpop.xlane.xlu0 %2441 }
0x1582   :  { %v2457_v34 = vsub.f32 %v2449_v16, %v2453_v46  ;;  %v2450_v30 = vmul.f32 %v4975_v51, %v2442_v58 }
0x1583   :  { %v2436_v21 = vpop.xlane.xlu1 %2435 }
0x1584   :  { %v2461_v45 = vmax.f32 %v2457_v34, 0.0  ;;  %v2458_v7 = vsub.f32 %v2450_v30, %v2454_v18  ;;  %v2447_v38 = vmul.f32 %v4975_v51, %v2436_v21 }
0x1585   :  { %v2438_v23 = vpop.xlane.xlu0 %2437 }
0x1586   :  { %v2465_v57 = vadd.f32 1e-05, %v2461_v45  ;;  %v2462_v42 = vmax.f32 %v2458_v7, 0.0  ;;  %v2455_v44 = vsub.f32 %v2447_v38, %v2451_v12  ;;  %v2448_v47 = vmul.f32 %v4975_v51, %v2438_v23 }
0x1587   :  { %v2568_v32 = vpop.xlane.xlu1 %2567  ;;  %v4307_v23 = vmov 5  }
0x1588   :  { %4100 = vrsqrt.f32 %v2465_v57  ;;  %v2466_v20 = vadd.f32 1e-05, %v2462_v42  ;;  %v2459_v53 = vmax.f32 %v2455_v44, 0.0  ;;  %v2456_v50 = vsub.f32 %v2448_v47, %v2452_v36 }
0x1589   :  { %v2577_v55 = vmul.f32 %v4975_v51, %v2568_v32  ;;  %v2570_v56 = vpop.xlane.xlu0 %2569 }
0x158a   :  { %4102 = vrsqrt.f32 %v2466_v20  ;;  %v2463_v35 = vadd.f32 1e-05, %v2459_v53  ;;  %v2460_v33 = vmax.f32 %v2456_v50, 0.0  ;;  %v2578_v4 = vmul.f32 %v4975_v51, %v2570_v56 }
0x158b   :  { %v2585_v59 = vsub.f32 %v2577_v55, %v2581_v49  ;;  %v2636_v7 = vpop.permute.xlu1 %2635  ;;  %v4068_v49 = vld [vmem:[#allocation9 + $0x10] sm:$0xff]  }
0x158c   :  { %4104 = vrsqrt.f32 %v2463_v35  ;;  %v2464_v52 = vadd.f32 1e-05, %v2460_v33  ;;  %v2586_v62 = vsub.f32 %v2578_v4, %v2582_v54  ;;  %3793 = vmatprep.mubr.msk.bf16.mxu1 %vm2134_vm0, %v4068_v49 }
0x158d   :  { %v2589_v37 = vmax.f32 %v2585_v59, 0.0 }
0x158e   :  { %4106 = vrsqrt.f32 %v2464_v52  ;;  %v2590_v63 = vmax.f32 %v2586_v62, 0.0 }
0x158f   :  { %v2593_v2 = vadd.f32 1e-05, %v2589_v37 }
0x1590   :  { %v2594_v60 = vadd.f32 1e-05, %v2590_v63 }
0x1591   :  { %4108 = vrsqrt.f32 %v2593_v2 }
0x1592   :  { %v4101_v41 = vpop.eup %4100  ;;  %4110 = vrsqrt.f32 %v2594_v60 }
0x1593   :  { %v2473_v6 = vmul.f32 %v4101_v41, %v4993_v11 }
0x1594   :  { %v4103_v8 = vpop.eup %4102 }
0x1595   :  { %v2501_v9 = vmul.f32 %v2473_v6, %v2445_v13  ;;  %v2474_v28 = vmul.f32 %v4103_v8, %v4995_v24 }
0x1596   :  { %v4105_v5 = vpop.eup %4104 }
0x1597   :  { %2511 = vrot.lane.b32.xlu1 %v2501_v9, %s4303_s0  ;;  %v2502_v46 = vmul.f32 %v2474_v28, %v2446_v14  ;;  %v2471_v16 = vmul.f32 %v4105_v5, %v4987_v40 }
0x1598   :  { %v4107_v58 = vpop.eup %4106 }
0x1599   :  { %2513 = vrot.lane.b32.xlu0 %v2502_v46, %s4303_s0  ;;  %v2499_v18 = vmul.f32 %v2471_v16, %v2443_v19  ;;  %v2472_v34 = vmul.f32 %v4107_v58, %v4985_v27  ;;  %v2638_v19 = vpop.permute.xlu1 %2637 }
0x159a   :  { %v2648_v36 = vsub.f32 %v4985_v27, %v2638_v19 }
0x159b   :  { %v4109_v30 = vpop.eup %4108  ;;  %2507 = vrot.lane.b32.xlu1 %v2499_v18, %s4303_s0  ;;  %v2500_v21 = vmul.f32 %v2472_v34, %v2444_v39  ;;  %v4306_v39 = vmov 4  }
0x159c   :  { %v4111_v12 = vpop.eup %4110  ;;  %v2601_v13 = vmul.f32 %v4109_v30, %v4993_v11 }
0x159d   :  { %2509 = vrot.lane.b32.xlu0 %v2500_v21, %s4303_s0  ;;  %v2602_v45 = vmul.f32 %v4111_v12, %v4995_v24 }
0x159e   :  { %v2629_v14 = vmul.f32 %v2601_v13, %v2573_v48  ;;  %v4308_v48 = vmov 3  }
0x159f   :  { %v2630_v38 = vmul.f32 %v2602_v45, %v2574_v31  ;;  %v2647_v31 = vsub.f32 %v4987_v40, %v2636_v7 }
0x15a0   :  { %2639 = vrot.lane.b32.xlu1 %v2629_v14, %s4303_s0 }
0x15a1   :  { %2641 = vrot.lane.b32.xlu0 %v2630_v38, %s4303_s0 }
0x15a4   :  { %2477 = vperm.xlu1 %4025, %v2471_v16  }
0x15a5   :  { %2482 = vperm.xlu0 %4026, %v2472_v34  }
0x15a8   :  { %4027 = vset.pattern.permute.xlu1 %v4306_v39 }
0x15a9   :  { %2605 = vperm.xlu1 %4027, %v5064_v26   ;;  %4029 = vset.pattern.permute.xlu0 %v4307_v23 }
0x15aa   :  { %2658 = vperm.xlu0 %4029, %v2648_v36  }
0x15ad   :  { %2610 = vperm.xlu1 %4027, %v5068_v1  }
0x15ae   :  { %4031 = vset.pattern.permute.xlu0 %v4306_v39 }
0x15af   :  { %2615 = vperm.xlu0 %4031, %v2601_v13  }
0x15b1   :  { %4028 = vset.pattern.permute.xlu1 %v4307_v23 }
0x15b2   :  { %2653 = vperm.xlu1 %4028, %v2647_v31  }
0x15b3   :  { %4034 = vset.pattern.permute.xlu0 %v4308_v48 }
0x15b6   :  { %4030 = vset.pattern.permute.xlu1 %v4305_v3 }
0x15b7   :  { %2487 = vperm.xlu1 %4030, %v2473_v6  }
0x15bb   :  { %2492 = vperm.xlu1 %4030, %v2474_v28  }
0x15bf   :  { %4032 = vset.pattern.permute.xlu1 %v4306_v39 }
0x15c0   :  { %2620 = vperm.xlu1 %4032, %v2602_v45  }
0x15c4   :  { %4033 = vset.pattern.permute.xlu1 %v4308_v48 }
0x1609   :  { %v2512_v26 = vpop.permute.xlu1 %2511 }
0x160a   :  { %v2521_v57 = vsub.f32 %v4993_v11, %v2512_v26 }
0x160b   :  { %v2514_v42 = vpop.permute.xlu0 %2513 }
0x160c   :  { %2535 = vperm.xlu1 %4033, %v2521_v57   ;;  %v2522_v47 = vsub.f32 %v4995_v24, %v2514_v42 }
0x160d   :  { %v2508_v1 = vpop.permute.xlu1 %2507 }
0x160e   :  { %v2519_v44 = vsub.f32 %v4987_v40, %v2508_v1 }
0x160f   :  { %v2510_v20 = vpop.permute.xlu0 %2509 }
0x1610   :  { %2525 = vperm.xlu0 %4034, %v2519_v44   ;;  %4035 = vset.pattern.permute.xlu1 %v4307_v23  ;;  %v2520_v53 = vsub.f32 %v4985_v27, %v2510_v20 }
0x1612   :  { %v2640_v32 = vpop.permute.xlu1 %2639 }
0x1613   :  { %v2649_v3 = vsub.f32 %v4993_v11, %v2640_v32  ;;  %v2642_v50 = vpop.permute.xlu0 %2641 }
0x1614   :  { %2540 = vperm.xlu0 %4034, %v2522_v47   ;;  %v2650_v54 = vsub.f32 %v4995_v24, %v2642_v50  ;;  %v4309_v50 = vmov 6  }
0x1615   :  { %2663 = vperm.xlu1 %4035, %v2649_v3  }
0x1618   :  { %4038 = vset.pattern.permute.xlu0 %v4309_v50 }
0x1619   :  { %4036 = vset.pattern.permute.xlu1 %v4308_v48 }
0x161a   :  { %2530 = vperm.xlu1 %4036, %v2520_v53  }
0x161e   :  { %4037 = vset.pattern.permute.xlu1 %v4307_v23  ;;  %v4069_v23 = vld [vmem:[#allocation9 + $0x18] sm:$0xff]  }
0x161f   :  { %2668 = vperm.xlu1 %4037, %v2650_v54  }
0x1623   :  { %v2478_v55 = vpop.permute.xlu1 %2477  ;;  %4039 = vset.pattern.permute.xlu1 %v4309_v50 }
0x1624   :  { %v2483_v4 = vpop.permute.xlu0 %2482  ;;  %v2495_v2 = vmul.f32 %v2478_v55, %v5039_v15 }
0x1625   :  { %v2496_v15 = vmul.f32 %v2483_v4, %v5046_v61 }
0x1628   :  { %v2606_v56 = vpop.permute.xlu1 %2605 }
0x1629   :  { %v2659_v52 = vpop.permute.xlu0 %2658  ;;  %v2623_v60 = vmul.f32 %v2606_v56, %v5001_v17 }
0x162c   :  { %v2611_v35 = vpop.permute.xlu1 %2610 }
0x162d   :  { %v2624_v34 = vmul.f32 %v2611_v35, %v5003_v29 }
0x162e   :  { %v2616_v37 = vpop.permute.xlu0 %2615 }
0x162f   :  { %v2625_v5 = vmul.f32 %v2616_v37, %v5005_v22  ;;  %v2672_v21 = vadd.f32 %v2659_v52, %v2624_v34 }
0x1631   :  { %v2654_v33 = vpop.permute.xlu1 %2653 }
0x1632   :  { %v2671_v6 = vadd.f32 %v2654_v33, %v2623_v60 }
0x1636   :  { %v2488_v59 = vpop.permute.xlu1 %2487 }
0x1637   :  { %v2497_v46 = vmul.f32 %v5036_v25, %v2488_v59 }
0x163a   :  { %v2493_v62 = vpop.permute.xlu1 %2492 }
0x163b   :  { %v2498_v14 = vmul.f32 %v5043_v43, %v2493_v62 }
0x163f   :  { %v2621_v63 = vpop.permute.xlu1 %2620 }
0x1640   :  { %v2626_v22 = vmul.f32 %v2621_v63, %v5007_v10 }
0x168b   :  { %v2536_v8 = vpop.permute.xlu1 %2535 }
0x168c   :  { %v2545_v58 = vadd.f32 %v2536_v8, %v2497_v46 }
0x168f   :  { %v2526_v41 = vpop.permute.xlu0 %2525 }
0x1690   :  { %v2543_v9 = vadd.f32 %v2526_v41, %v2495_v2 }
0x1692   :  { %v5113_v28 = vadd.f32 %v2671_v6, %v2543_v9 }
0x1693   :  { %v2541_v13 = vpop.permute.xlu0 %2540 }
0x1694   :  { %v2664_v16 = vpop.permute.xlu1 %2663  ;;  %v2679_v25 = vmax.f32 %v5113_v28, 0.0  ;;  %v2546_v29 = vadd.f32 %v2541_v13, %v2498_v14 }
0x1695   :  { %v2673_v18 = vadd.f32 %v2664_v16, %v2625_v5 }
0x1697   :  { %v5118_v30 = vadd.f32 %v2673_v18, %v2545_v58 }
0x1699   :  { %v2531_v17 = vpop.permute.xlu1 %2530  ;;  %v2681_v39 = vmax.f32 %v5118_v30, 0.0  ;;  %v4073_v30 = vld [vmem:[#allocation9 + $0x38] sm:$0xff]  }
0x169a   :  { %v2544_v12 = vadd.f32 %v2531_v17, %v2496_v15 }
0x169c   :  { %v5121_v45 = vadd.f32 %v2672_v21, %v2544_v12 }
0x169e   :  { %v2680_v7 = vmax.f32 %v5121_v45, 0.0  ;;  %v2669_v38 = vpop.permute.xlu1 %2668 }
0x169f   :  { %v2674_v19 = vadd.f32 %v2669_v38, %v2626_v22 }
0x16a0   :  { %v2688_v61 = vpack.c.bf16 %v2680_v7, %v2679_v25 }
0x16a1   :  { %v5131_v36 = vadd.f32 %v2674_v19, %v2546_v29 }
0x16a2   :  { %3789 = vmatprep.subr.bf16.mxu1 %v2688_v61 }
0x16a3   :  { %v2682_v43 = vmax.f32 %v5131_v36, 0.0  ;;  %3790 = vmatpush3.bf16.msra.mxu1 %v2688_v61 }
0x16a5   :  { %v2689_v10 = vpack.c.bf16 %v2682_v43, %v2681_v39 }
0x16a7   :  { %3791 = vmatprep.subr.bf16.mxu1 %v2689_v10 }
0x16a8   :  { %3792 = vmatpush3.bf16.msra.mxu1 %v2689_v10 }
0x16ab   :  { %3794 = vmatmul.mubr.msk.bf16.vlgmr.msra.gmra.mrb[4].mxu1 %vm2134_vm0, %v4069_v23 }
0x177e   :  { %v5140_v31 = vpop.f32.mrb[4].mxu1 }
0x177f   :  { %v5142_v48 = vpop.f32.mrb[5].mxu1  ;;  %v2757_v26 = vmul.f32 %v5140_v31, %v4925_v0 }
0x1780   :  { %v5146_v57 = vpop.f32.mrb[6].mxu1  ;;  %v2755_v44 = vmul.f32 %v4925_v0, %v5142_v48 }
0x1781   :  { %2763 = vadd.xlane.f32.xlu0 %v2757_v26  ;;  %v5148_v1 = vpop.f32.mrb[7].mxu1  ;;  %v2758_v47 = vmul.f32 %v5146_v57, %v4925_v0  ;;  %v2769_v53 = vmul.f32 %v5140_v31, %v2757_v26 }
0x1782   :  { %v2756_v42 = vmul.f32 %v4925_v0, %v5148_v1  ;;  %v2767_v32 = vmul.f32 %v2755_v44, %v5142_v48 }
0x1783   :  { %v2770_v3 = vmul.f32 %v5146_v57, %v2758_v47 }
0x1784   :  { %2761 = vadd.xlane.f32.xlu1 %v2756_v42  ;;  %v2768_v20 = vmul.f32 %v2756_v42, %v5148_v1 }
0x1785   :  { %2759 = vadd.xlane.f32.xlu0 %v2755_v44 }
0x1788   :  { %2765 = vadd.xlane.f32.xlu1 %v2758_v47 }
0x1789   :  { %2771 = vadd.xlane.f32.xlu0 %v2767_v32  ;;  %v4310_v32 = vmov 7  }
0x178c   :  { %2777 = vadd.xlane.f32.xlu1 %v2770_v3 }
0x178d   :  { %2773 = vadd.xlane.f32.xlu0 %v2768_v20 }
0x1791   :  { %2775 = vadd.xlane.f32.xlu0 %v2769_v53 }
0x180e   :  { %v2764_v54 = vpop.xlane.xlu0 %2763 }
0x180f   :  { %v2781_v2 = vmul.f32 %v4975_v51, %v2764_v54 }
0x1811   :  { %v2762_v49 = vpop.xlane.xlu1 %2761  ;;  %v2789_v58 = vmul.f32 %v2781_v2, %v2781_v2 }
0x1812   :  { %v2760_v55 = vpop.xlane.xlu0 %2759  ;;  %v2780_v4 = vmul.f32 %v4975_v51, %v2762_v49 }
0x1813   :  { %v2779_v56 = vmul.f32 %v4975_v51, %v2760_v55 }
0x1814   :  { %v2788_v41 = vmul.f32 %v2780_v4, %v2780_v4 }
0x1815   :  { %v2766_v35 = vpop.xlane.xlu1 %2765  ;;  %v2787_v59 = vmul.f32 %v2779_v56, %v2779_v56 }
0x1816   :  { %v2772_v33 = vpop.xlane.xlu0 %2771  ;;  %v2782_v62 = vmul.f32 %v4975_v51, %v2766_v35 }
0x1817   :  { %v2783_v52 = vmul.f32 %v4975_v51, %v2772_v33 }
0x1818   :  { %v2790_v5 = vmul.f32 %v2782_v62, %v2782_v62 }
0x1819   :  { %v2791_v37 = vsub.f32 %v2783_v52, %v2787_v59  ;;  %v2778_v63 = vpop.xlane.xlu1 %2777  ;;  %v4070_v59 = vld [vmem:[#allocation9 + $0x20] sm:$0xff]  }
0x181a   :  { %v2774_v60 = vpop.xlane.xlu0 %2773  ;;  %v2786_v8 = vmul.f32 %v4975_v51, %v2778_v63  ;;  %3801 = vmatprep.mubr.msk.bf16.mxu1 %vm2134_vm0, %v4070_v59 }
0x181b   :  { %v2795_v6 = vmax.f32 %v2791_v37, 0.0  ;;  %v2784_v9 = vmul.f32 %v4975_v51, %v2774_v60 }
0x181c   :  { %v2794_v34 = vsub.f32 %v2786_v8, %v2790_v5 }
0x181d   :  { %v2799_v46 = vadd.f32 1e-05, %v2795_v6  ;;  %v2792_v16 = vsub.f32 %v2784_v9, %v2788_v41 }
0x181e   :  { %v2776_v18 = vpop.xlane.xlu0 %2775  ;;  %v2798_v13 = vmax.f32 %v2794_v34, 0.0 }
0x181f   :  { %4112 = vrsqrt.f32 %v2799_v46  ;;  %v2796_v15 = vmax.f32 %v2792_v16, 0.0  ;;  %v2785_v17 = vmul.f32 %v4975_v51, %v2776_v18 }
0x1820   :  { %v2802_v38 = vadd.f32 1e-05, %v2798_v13 }
0x1821   :  { %v2793_v21 = vsub.f32 %v2785_v17, %v2789_v58  ;;  %v2800_v12 = vadd.f32 1e-05, %v2796_v15 }
0x1823   :  { %v2797_v14 = vmax.f32 %v2793_v21, 0.0  ;;  %4114 = vrsqrt.f32 %v2800_v12 }
0x1825   :  { %v2801_v22 = vadd.f32 1e-05, %v2797_v14 }
0x1827   :  { %4116 = vrsqrt.f32 %v2801_v22 }
0x1828   :  { %4118 = vrsqrt.f32 %v2802_v38 }
0x1829   :  { %v4113_v29 = vpop.eup %4112 }
0x182a   :  { %v2807_v19 = vmul.f32 %v4113_v29, %v4987_v40 }
0x182c   :  { %v2835_v61 = vmul.f32 %v2807_v19, %v2779_v56 }
0x182d   :  { %v4115_v10 = vpop.eup %4114 }
0x182e   :  { %2843 = vrot.lane.b32.xlu0 %v2835_v61, %s4303_s0  ;;  %v2808_v44 = vmul.f32 %v4115_v10, %v4985_v27 }
0x1830   :  { %v2836_v3 = vmul.f32 %v2808_v44, %v2780_v4 }
0x1831   :  { %v4117_v23 = vpop.eup %4116 }
0x1832   :  { %2813 = vperm.xlu0 %4038, %v2807_v19   ;;  %v2809_v26 = vmul.f32 %v4117_v23, %v4993_v11  ;;  %v4119_v47 = vpop.eup %4118 }
0x1833   :  { %v2810_v20 = vmul.f32 %v4119_v47, %v4995_v24 }
0x1834   :  { %v2837_v42 = vmul.f32 %v2809_v26, %v2781_v2 }
0x1835   :  { %v2838_v53 = vmul.f32 %v2810_v20, %v2782_v62 }
0x1836   :  { %2847 = vrot.lane.b32.xlu1 %v2837_v42, %s4303_s0  ;;  %4041 = vset.pattern.permute.xlu0 %v4310_v32 }
0x183a   :  { %2845 = vrot.lane.b32.xlu1 %v2836_v3, %s4303_s0 }
0x183e   :  { %2849 = vrot.lane.b32.xlu1 %v2838_v53, %s4303_s0 }
0x1842   :  { %2818 = vperm.xlu1 %4039, %v2808_v44   ;;  %v4311_v44 = vmov 8  }
0x1846   :  { %2823 = vperm.xlu1 %4039, %v2809_v26  }
0x184a   :  { %2828 = vperm.xlu1 %4039, %v2810_v20  }
0x184e   :  { %4040 = vset.pattern.permute.xlu1 %v4310_v32 }
0x18a0   :  { %v2844_v50 = vpop.permute.xlu0 %2843 }
0x18a1   :  { %v2855_v54 = vsub.f32 %v4987_v40, %v2844_v50 }
0x18a3   :  { %2861 = vperm.xlu1 %4040, %v2855_v54  }
0x18a8   :  { %v2848_v49 = vpop.permute.xlu1 %2847 }
0x18a9   :  { %v2857_v33 = vsub.f32 %v4993_v11, %v2848_v49 }
0x18ac   :  { %v2846_v55 = vpop.permute.xlu1 %2845 }
0x18ad   :  { %v2856_v56 = vsub.f32 %v4985_v27, %v2846_v55 }
0x18af   :  { %2866 = vperm.xlu0 %4041, %v2856_v56  }
0x18b0   :  { %v2850_v35 = vpop.permute.xlu1 %2849 }
0x18b1   :  { %v2858_v4 = vsub.f32 %v4995_v24, %v2850_v35  ;;  %v2814_v63 = vpop.permute.xlu0 %2813 }
0x18b2   :  { %v2831_v60 = vmul.f32 %v2814_v63, %v5142_v48 }
0x18b3   :  { %2871 = vperm.xlu0 %4041, %v2857_v33   ;;  %2876 = vperm.xlu1 %4040, %v2858_v4  }
0x18b7   :  { %4042 = vset.pattern.permute.xlu0 %v4311_v44  ;;  %4043 = vset.pattern.permute.xlu1 %v4311_v44 }
0x18c1   :  { %v2819_v52 = vpop.permute.xlu1 %2818 }
0x18c2   :  { %v2832_v41 = vmul.f32 %v2819_v52, %v5148_v1  ;;  %v4071_v1 = vld [vmem:[#allocation9 + $0x28] sm:$0xff]  }
0x18c5   :  { %v2824_v62 = vpop.permute.xlu1 %2823 }
0x18c6   :  { %v2833_v5 = vmul.f32 %v5140_v31, %v2824_v62 }
0x18c9   :  { %v2829_v37 = vpop.permute.xlu1 %2828 }
0x18ca   :  { %v2834_v46 = vmul.f32 %v5146_v57, %v2829_v37 }
0x1922   :  { %v2862_v2 = vpop.permute.xlu1 %2861 }
0x1923   :  { %v2879_v6 = vadd.f32 %v2862_v2, %v2831_v60 }
0x1925   :  { %v2883_v16 = vmax.f32 %v2879_v6, 0.0 }
0x192e   :  { %v2867_v8 = vpop.permute.xlu0 %2866 }
0x192f   :  { %v2880_v9 = vadd.f32 %v2867_v8, %v2832_v41 }
0x1931   :  { %v2884_v58 = vmax.f32 %v2880_v9, 0.0 }
0x1932   :  { %v2877_v18 = vpop.permute.xlu1 %2876  ;;  %v2872_v34 = vpop.permute.xlu0 %2871 }
0x1933   :  { %v2892_v15 = vpack.c.bf16 %v2884_v58, %v2883_v16  ;;  %v2882_v17 = vadd.f32 %v2877_v18, %v2834_v46  ;;  %v2881_v21 = vadd.f32 %v2872_v34, %v2833_v5 }
0x1935   :  { %v2886_v12 = vmax.f32 %v2882_v17, 0.0  ;;  %v2885_v13 = vmax.f32 %v2881_v21, 0.0  ;;  %3797 = vmatprep.subr.bf16.mxu1 %v2892_v15 }
0x1936   :  { %3798 = vmatpush3.bf16.msra.mxu1 %v2892_v15 }
0x1937   :  { %v2893_v48 = vpack.c.bf16 %v2886_v12, %v2885_v13 }
0x1939   :  { %3799 = vmatprep.subr.bf16.mxu1 %v2893_v48 }
0x193a   :  { %3800 = vmatpush3.bf16.msra.mxu1 %v2893_v48 }
0x193d   :  { %3802 = vmatmul.mubr.msk.bf16.vlgmr.msra.gmra.mrb[8].mxu1 %vm2134_vm0, %v4071_v1 }
0x1a10   :  { %v5186_v31 = vpop.f32.mrb[8].mxu1 }
0x1a11   :  { %v5188_v57 = vpop.f32.mrb[9].mxu1  ;;  %v2961_v14 = vmul.f32 %v5186_v31, %v4925_v0 }
0x1a12   :  { %v5192_v22 = vpop.f32.mrb[10].mxu1  ;;  %v2959_v19 = vmul.f32 %v4925_v0, %v5188_v57 }
0x1a13   :  { %2967 = vadd.xlane.f32.xlu0 %v2961_v14  ;;  %v5194_v38 = vpop.f32.mrb[11].mxu1  ;;  %v2962_v61 = vmul.f32 %v5192_v22, %v4925_v0  ;;  %v2973_v42 = vmul.f32 %v5186_v31, %v2961_v14 }
0x1a14   :  { %v2960_v29 = vmul.f32 %v4925_v0, %v5194_v38  ;;  %v2971_v10 = vmul.f32 %v2959_v19, %v5188_v57 }
0x1a15   :  { %v2974_v23 = vmul.f32 %v5192_v22, %v2962_v61 }
0x1a16   :  { %2965 = vadd.xlane.f32.xlu1 %v2960_v29  ;;  %v2972_v26 = vmul.f32 %v2960_v29, %v5194_v38 }
0x1a17   :  { %2963 = vadd.xlane.f32.xlu0 %v2959_v19 }
0x1a1a   :  { %2969 = vadd.xlane.f32.xlu1 %v2962_v61 }
0x1a1b   :  { %2975 = vadd.xlane.f32.xlu0 %v2971_v10  ;;  %v4312_v10 = vmov 9  }
0x1a1e   :  { %2981 = vadd.xlane.f32.xlu1 %v2974_v23 }
0x1a1f   :  { %2977 = vadd.xlane.f32.xlu0 %v2972_v26 }
0x1a23   :  { %2979 = vadd.xlane.f32.xlu0 %v2973_v42  ;;  %v5222_v42 = vld [vmem:[#allocation10] sm:$0xff] }
0x1aa0   :  { %v2968_v47 = vpop.xlane.xlu0 %2967 }
0x1aa1   :  { %v2985_v4 = vmul.f32 %v4975_v51, %v2968_v47 }
0x1aa3   :  { %v2966_v32 = vpop.xlane.xlu1 %2965  ;;  %v2993_v6 = vmul.f32 %v2985_v4, %v2985_v4 }
0x1aa4   :  { %v2964_v3 = vpop.xlane.xlu0 %2963  ;;  %v2984_v54 = vmul.f32 %v4975_v51, %v2966_v32  ;;  %v5225_v32 = vld [vmem:[#allocation10 + $0x8] sm:$0xff] }
0x1aa5   :  { %v2983_v20 = vmul.f32 %v4975_v51, %v2964_v3 }
0x1aa6   :  { %v2992_v52 = vmul.f32 %v2984_v54, %v2984_v54 }
0x1aa7   :  { %v2970_v53 = vpop.xlane.xlu1 %2969  ;;  %v2991_v49 = vmul.f32 %v2983_v20, %v2983_v20 }
0x1aa8   :  { %v2976_v50 = vpop.xlane.xlu0 %2975  ;;  %v2986_v56 = vmul.f32 %v4975_v51, %v2970_v53 }
0x1aa9   :  { %v2987_v55 = vmul.f32 %v4975_v51, %v2976_v50  ;;  %v5231_v50 = vld [vmem:[#allocation10 + $0x18] sm:$0xff] }
0x1aaa   :  { %v2994_v2 = vmul.f32 %v2986_v56, %v2986_v56 }
0x1aab   :  { %v2995_v35 = vsub.f32 %v2987_v55, %v2991_v49  ;;  %v2982_v33 = vpop.xlane.xlu1 %2981  ;;  %v4072_v49 = vld [vmem:[#allocation9 + $0x30] sm:$0xff]  }
0x1aac   :  { %v2978_v59 = vpop.xlane.xlu0 %2977  ;;  %v2990_v37 = vmul.f32 %v4975_v51, %v2982_v33  ;;  %3809 = vmatprep.mubr.msk.bf16.mxu1 %vm2134_vm0, %v4072_v49 }
0x1aad   :  { %v2999_v62 = vmax.f32 %v2995_v35, 0.0  ;;  %v2988_v63 = vmul.f32 %v4975_v51, %v2978_v59 }
0x1aae   :  { %v2998_v9 = vsub.f32 %v2990_v37, %v2994_v2 }
0x1aaf   :  { %v3003_v60 = vadd.f32 1e-05, %v2999_v62  ;;  %v2996_v41 = vsub.f32 %v2988_v63, %v2992_v52 }
0x1ab0   :  { %v2980_v8 = vpop.xlane.xlu0 %2979  ;;  %v3002_v18 = vmax.f32 %v2998_v9, 0.0 }
0x1ab1   :  { %4120 = vrsqrt.f32 %v3003_v60  ;;  %v3000_v5 = vmax.f32 %v2996_v41, 0.0  ;;  %v2989_v46 = vmul.f32 %v4975_v51, %v2980_v8 }
0x1ab2   :  { %v3006_v17 = vadd.f32 1e-05, %v3002_v18 }
0x1ab3   :  { %v2997_v16 = vsub.f32 %v2989_v46, %v2993_v6  ;;  %v3004_v58 = vadd.f32 1e-05, %v3000_v5 }
0x1ab5   :  { %v3001_v34 = vmax.f32 %v2997_v16, 0.0  ;;  %4122 = vrsqrt.f32 %v3004_v58 }
0x1ab7   :  { %v3005_v15 = vadd.f32 1e-05, %v3001_v34 }
0x1ab9   :  { %4124 = vrsqrt.f32 %v3005_v15 }
0x1aba   :  { %4126 = vrsqrt.f32 %v3006_v17 }
0x1abb   :  { %v4121_v21 = vpop.eup %4120 }
0x1abc   :  { %v3011_v12 = vmul.f32 %v4121_v21, %v4987_v40 }
0x1abe   :  { %v3039_v13 = vmul.f32 %v3011_v12, %v2983_v20  ;;  %v5228_v20 = vld [vmem:[#allocation10 + $0x10] sm:$0xff] }
0x1abf   :  { %v4123_v48 = vpop.eup %4122 }
0x1ac0   :  { %3047 = vrot.lane.b32.xlu0 %v3039_v13, %s4303_s0  ;;  %v3012_v19 = vmul.f32 %v4123_v48, %v4985_v27  ;;  %v4313_v48 = vmov 10  }
0x1ac2   :  { %v3040_v23 = vmul.f32 %v3012_v19, %v2984_v54 }
0x1ac3   :  { %v4125_v1 = vpop.eup %4124 }
0x1ac4   :  { %3017 = vperm.xlu0 %4042, %v3011_v12   ;;  %v3013_v14 = vmul.f32 %v4125_v1, %v4993_v11  ;;  %v4127_v61 = vpop.eup %4126 }
0x1ac5   :  { %v3014_v40 = vmul.f32 %v4127_v61, %v4995_v24 }
0x1ac6   :  { %v3041_v29 = vmul.f32 %v3013_v14, %v2985_v4 }
0x1ac7   :  { %v3042_v26 = vmul.f32 %v3014_v40, %v2986_v56 }
0x1ac8   :  { %3051 = vrot.lane.b32.xlu1 %v3041_v29, %s4303_s0  ;;  %4045 = vset.pattern.permute.xlu0 %v4312_v10 }
0x1acc   :  { %3049 = vrot.lane.b32.xlu1 %v3040_v23, %s4303_s0 }
0x1ad0   :  { %3053 = vrot.lane.b32.xlu1 %v3042_v26, %s4303_s0 }
0x1ad4   :  { %3022 = vperm.xlu1 %4043, %v3012_v19  }
0x1ad8   :  { %3027 = vperm.xlu1 %4043, %v3013_v14  }
0x1adc   :  { %3032 = vperm.xlu1 %4043, %v3014_v40  }
0x1ae0   :  { %4044 = vset.pattern.permute.xlu1 %v4312_v10 }
0x1b32   :  { %v3048_v11 = vpop.permute.xlu0 %3047 }
0x1b33   :  { %v3059_v27 = vsub.f32 %v5222_v42, %v3048_v11 }
0x1b35   :  { %3065 = vperm.xlu1 %4044, %v3059_v27  }
0x1b3a   :  { %v3052_v44 = vpop.permute.xlu1 %3051 }
0x1b3b   :  { %v3061_v53 = vsub.f32 %v5228_v20, %v3052_v44 }
0x1b3e   :  { %v3050_v47 = vpop.permute.xlu1 %3049 }
0x1b3f   :  { %v3060_v24 = vsub.f32 %v5225_v32, %v3050_v47 }
0x1b41   :  { %3070 = vperm.xlu0 %4045, %v3060_v24  }
0x1b42   :  { %v3054_v3 = vpop.permute.xlu1 %3053 }
0x1b43   :  { %v3062_v54 = vsub.f32 %v5231_v50, %v3054_v3  ;;  %v3018_v33 = vpop.permute.xlu0 %3017 }
0x1b44   :  { %v3035_v59 = vmul.f32 %v3018_v33, %v5188_v57 }
0x1b45   :  { %3075 = vperm.xlu0 %4045, %v3061_v53   ;;  %3080 = vperm.xlu1 %4044, %v3062_v54  }
0x1b49   :  { %4046 = vset.pattern.permute.xlu0 %v4313_v48  ;;  %4047 = vset.pattern.permute.xlu1 %v4313_v48 }
0x1b53   :  { %v3023_v55 = vpop.permute.xlu1 %3022 }
0x1b54   :  { %v3036_v62 = vmul.f32 %v3023_v55, %v5194_v38 }
0x1b57   :  { %v3028_v56 = vpop.permute.xlu1 %3027 }
0x1b58   :  { %v3037_v60 = vmul.f32 %v5186_v31, %v3028_v56 }
0x1b5b   :  { %v3033_v35 = vpop.permute.xlu1 %3032 }
0x1b5c   :  { %v3038_v41 = vmul.f32 %v5192_v22, %v3033_v35 }
0x1bb4   :  { %v3066_v4 = vpop.permute.xlu1 %3065 }
0x1bb5   :  { %v3083_v52 = vadd.f32 %v3066_v4, %v3035_v59 }
0x1bb7   :  { %v5239_v63 = vadd.f32 %v3083_v52, %v2679_v25 }
0x1bb9   :  { %v3091_v57 = vmax.f32 %v5239_v63, 0.0 }
0x1bc0   :  { %v3071_v37 = vpop.permute.xlu0 %3070 }
0x1bc1   :  { %v3084_v2 = vadd.f32 %v3071_v37, %v3036_v62 }
0x1bc3   :  { %v5245_v6 = vadd.f32 %v3084_v2, %v2680_v7 }
0x1bc4   :  { %v3081_v8 = vpop.permute.xlu1 %3080  ;;  %v3076_v9 = vpop.permute.xlu0 %3075 }
0x1bc5   :  { %v3092_v38 = vmax.f32 %v5245_v6, 0.0  ;;  %v3086_v5 = vadd.f32 %v3081_v8, %v3038_v41  ;;  %v3085_v46 = vadd.f32 %v3076_v9, %v3037_v60  ;;  %v4077_v6 = vld [vmem:[#allocation9 + $0x58] sm:$0xff]  }
0x1bc7   :  { %v5251_v28 = vadd.f32 %v3086_v5, %v2682_v43  ;;  %v5255_v25 = vadd.f32 %v3085_v46, %v2681_v39  ;;  %v3100_v45 = vpack.c.bf16 %v3092_v38, %v3091_v57 }
0x1bc9   :  { %v3094_v7 = vmax.f32 %v5251_v28, 0.0  ;;  %v3093_v31 = vmax.f32 %v5255_v25, 0.0  ;;  %3805 = vmatprep.subr.bf16.mxu1 %v3100_v45 }
0x1bca   :  { %3806 = vmatpush3.bf16.msra.mxu1 %v3100_v45 }
0x1bcb   :  { %v3101_v36 = vpack.c.bf16 %v3094_v7, %v3093_v31 }
0x1bcd   :  { %3807 = vmatprep.subr.bf16.mxu1 %v3101_v36 }
0x1bce   :  { %3808 = vmatpush3.bf16.msra.mxu1 %v3101_v36 }
0x1bd1   :  { %3810 = vmatmul.mubr.msk.bf16.vlgmr.msra.gmra.mrb[12].mxu1 %vm2134_vm0, %v4073_v30 }
0x1ca4   :  { %v5268_v39 = vpop.f32.mrb[12].mxu1 }
0x1ca5   :  { %v5270_v43 = vpop.f32.mrb[13].mxu1  ;;  %v3169_v22 = vmul.f32 %v5268_v39, %v4925_v0 }
0x1ca6   :  { %v5274_v16 = vpop.f32.mrb[14].mxu1  ;;  %v3167_v34 = vmul.f32 %v4925_v0, %v5270_v43 }
0x1ca7   :  { %3175 = vadd.xlane.f32.xlu0 %v3169_v22  ;;  %v5276_v58 = vpop.f32.mrb[15].mxu1  ;;  %v3170_v15 = vmul.f32 %v5274_v16, %v4925_v0  ;;  %v3181_v13 = vmul.f32 %v5268_v39, %v3169_v22 }
0x1ca8   :  { %v3168_v18 = vmul.f32 %v4925_v0, %v5276_v58  ;;  %v3179_v17 = vmul.f32 %v3167_v34, %v5270_v43 }
0x1ca9   :  { %v3182_v21 = vmul.f32 %v5274_v16, %v3170_v15 }
0x1caa   :  { %3173 = vadd.xlane.f32.xlu1 %v3168_v18  ;;  %v3180_v12 = vmul.f32 %v3168_v18, %v5276_v58 }
0x1cab   :  { %3171 = vadd.xlane.f32.xlu0 %v3167_v34 }
0x1cae   :  { %3177 = vadd.xlane.f32.xlu1 %v3170_v15 }
0x1caf   :  { %3183 = vadd.xlane.f32.xlu0 %v3179_v17  ;;  %v4314_v17 = vmov 11  }
0x1cb2   :  { %3189 = vadd.xlane.f32.xlu1 %v3182_v21 }
0x1cb3   :  { %3185 = vadd.xlane.f32.xlu0 %v3180_v12 }
0x1cb7   :  { %3187 = vadd.xlane.f32.xlu0 %v3181_v13 }
0x1d34   :  { %v3176_v1 = vpop.xlane.xlu0 %3175 }
0x1d35   :  { %v3193_v47 = vmul.f32 %v4975_v51, %v3176_v1 }
0x1d37   :  { %v3174_v14 = vpop.xlane.xlu1 %3173  ;;  %v3201_v33 = vmul.f32 %v3193_v47, %v3193_v47 }
0x1d38   :  { %v3172_v29 = vpop.xlane.xlu0 %3171  ;;  %v3192_v23 = vmul.f32 %v4975_v51, %v3174_v14 }
0x1d39   :  { %v3191_v19 = vmul.f32 %v4975_v51, %v3172_v29 }
0x1d3a   :  { %v3200_v3 = vmul.f32 %v3192_v23, %v3192_v23 }
0x1d3b   :  { %v3178_v61 = vpop.xlane.xlu1 %3177  ;;  %v3199_v40 = vmul.f32 %v3191_v19, %v3191_v19 }
0x1d3c   :  { %v3184_v10 = vpop.xlane.xlu0 %3183  ;;  %v3194_v11 = vmul.f32 %v4975_v51, %v3178_v61 }
0x1d3d   :  { %v3195_v26 = vmul.f32 %v4975_v51, %v3184_v10 }
0x1d3e   :  { %v3202_v55 = vmul.f32 %v3194_v11, %v3194_v11 }
0x1d3f   :  { %v3203_v27 = vsub.f32 %v3195_v26, %v3199_v40  ;;  %v3190_v44 = vpop.xlane.xlu1 %3189  ;;  %v4074_v40 = vld [vmem:[#allocation9 + $0x40] sm:$0xff]  }
0x1d40   :  { %v3186_v24 = vpop.xlane.xlu0 %3185  ;;  %v3198_v54 = vmul.f32 %v4975_v51, %v3190_v44  ;;  %3817 = vmatprep.mubr.msk.bf16.mxu1 %vm2134_vm0, %v4074_v40 }
0x1d41   :  { %v3207_v53 = vmax.f32 %v3203_v27, 0.0  ;;  %v3196_v49 = vmul.f32 %v4975_v51, %v3186_v24 }
0x1d42   :  { %v3206_v59 = vsub.f32 %v3198_v54, %v3202_v55 }
0x1d43   :  { %v3211_v56 = vadd.f32 1e-05, %v3207_v53  ;;  %v3204_v35 = vsub.f32 %v3196_v49, %v3200_v3 }
0x1d44   :  { %v3188_v4 = vpop.xlane.xlu0 %3187  ;;  %v3210_v60 = vmax.f32 %v3206_v59, 0.0 }
0x1d45   :  { %4128 = vrsqrt.f32 %v3211_v56  ;;  %v3208_v52 = vmax.f32 %v3204_v35, 0.0  ;;  %v3197_v62 = vmul.f32 %v4975_v51, %v3188_v4 }
0x1d46   :  { %v3214_v9 = vadd.f32 1e-05, %v3210_v60 }
0x1d47   :  { %v3205_v37 = vsub.f32 %v3197_v62, %v3201_v33  ;;  %v3212_v2 = vadd.f32 1e-05, %v3208_v52 }
0x1d49   :  { %v3209_v41 = vmax.f32 %v3205_v37, 0.0  ;;  %4130 = vrsqrt.f32 %v3212_v2 }
0x1d4b   :  { %v3213_v8 = vadd.f32 1e-05, %v3209_v41 }
0x1d4d   :  { %4132 = vrsqrt.f32 %v3213_v8 }
0x1d4e   :  { %4134 = vrsqrt.f32 %v3214_v9 }
0x1d4f   :  { %v4129_v5 = vpop.eup %4128 }
0x1d50   :  { %v3219_v46 = vmul.f32 %v5222_v42, %v4129_v5 }
0x1d52   :  { %v3247_v45 = vmul.f32 %v3219_v46, %v3191_v19 }
0x1d53   :  { %v4131_v36 = vpop.eup %4130 }
0x1d54   :  { %3255 = vrot.lane.b32.xlu0 %v3247_v45, %s4303_s0  ;;  %v3220_v34 = vmul.f32 %v5225_v32, %v4131_v36 }
0x1d56   :  { %v3248_v21 = vmul.f32 %v3220_v34, %v3192_v23 }
0x1d57   :  { %v4133_v30 = vpop.eup %4132 }
0x1d58   :  { %3225 = vperm.xlu0 %4046, %v3219_v46   ;;  %v3221_v22 = vmul.f32 %v5228_v20, %v4133_v30  ;;  %v4135_v15 = vpop.eup %4134 }
0x1d59   :  { %v3222_v12 = vmul.f32 %v5231_v50, %v4135_v15 }
0x1d5a   :  { %v3249_v18 = vmul.f32 %v3221_v22, %v3193_v47 }
0x1d5b   :  { %v3250_v13 = vmul.f32 %v3222_v12, %v3194_v11 }
0x1d5c   :  { %3259 = vrot.lane.b32.xlu1 %v3249_v18, %s4303_s0  ;;  %4049 = vset.pattern.permute.xlu0 %v4314_v17 }
0x1d60   :  { %3257 = vrot.lane.b32.xlu1 %v3248_v21, %s4303_s0 }
0x1d64   :  { %3261 = vrot.lane.b32.xlu1 %v3250_v13, %s4303_s0 }
0x1d68   :  { %3230 = vperm.xlu1 %4047, %v3220_v34   ;;  %v4315_v34 = vmov 12  }
0x1d6c   :  { %3235 = vperm.xlu1 %4047, %v3221_v22  }
0x1d70   :  { %3240 = vperm.xlu1 %4047, %v3222_v12  }
0x1d74   :  { %4048 = vset.pattern.permute.xlu1 %v4314_v17 }
0x1dc6   :  { %v3256_v48 = vpop.permute.xlu0 %3255 }
0x1dc7   :  { %v3267_v1 = vsub.f32 %v5222_v42, %v3256_v48 }
0x1dc9   :  { %3273 = vperm.xlu1 %4048, %v3267_v1  }
0x1dce   :  { %v3260_v14 = vpop.permute.xlu1 %3259 }
0x1dcf   :  { %v3269_v10 = vsub.f32 %v5228_v20, %v3260_v14 }
0x1dd2   :  { %v3258_v29 = vpop.permute.xlu1 %3257 }
0x1dd3   :  { %v3268_v19 = vsub.f32 %v5225_v32, %v3258_v29 }
0x1dd5   :  { %3278 = vperm.xlu0 %4049, %v3268_v19  }
0x1dd6   :  { %v3262_v61 = vpop.permute.xlu1 %3261 }
0x1dd7   :  { %v3270_v23 = vsub.f32 %v5231_v50, %v3262_v61  ;;  %v3226_v44 = vpop.permute.xlu0 %3225 }
0x1dd8   :  { %v3243_v24 = vmul.f32 %v3226_v44, %v5270_v43 }
0x1dd9   :  { %3283 = vperm.xlu0 %4049, %v3269_v10   ;;  %3288 = vperm.xlu1 %4048, %v3270_v23  }
0x1ddd   :  { %4050 = vset.pattern.permute.xlu0 %v4315_v34  ;;  %4051 = vset.pattern.permute.xlu1 %v4315_v34 }
0x1de7   :  { %v3231_v26 = vpop.permute.xlu1 %3230 }
0x1de8   :  { %v3244_v3 = vmul.f32 %v3231_v26, %v5276_v58  ;;  %v4075_v58 = vld [vmem:[#allocation9 + $0x48] sm:$0xff]  }
0x1deb   :  { %v3236_v11 = vpop.permute.xlu1 %3235 }
0x1dec   :  { %v3245_v55 = vmul.f32 %v5268_v39, %v3236_v11 }
0x1def   :  { %v3241_v27 = vpop.permute.xlu1 %3240 }
0x1df0   :  { %v3246_v56 = vmul.f32 %v5274_v16, %v3241_v27 }
0x1e48   :  { %v3274_v47 = vpop.permute.xlu1 %3273 }
0x1e49   :  { %v3291_v53 = vadd.f32 %v3274_v47, %v3243_v24 }
0x1e4b   :  { %v3295_v35 = vmax.f32 %v3291_v53, 0.0 }
0x1e54   :  { %v3279_v54 = vpop.permute.xlu0 %3278 }
0x1e55   :  { %v3292_v49 = vadd.f32 %v3279_v54, %v3244_v3 }
0x1e57   :  { %v3296_v33 = vmax.f32 %v3292_v49, 0.0 }
0x1e58   :  { %v3289_v4 = vpop.permute.xlu1 %3288  ;;  %v3284_v59 = vpop.permute.xlu0 %3283 }
0x1e59   :  { %v3304_v52 = vpack.c.bf16 %v3296_v33, %v3295_v35  ;;  %v3294_v62 = vadd.f32 %v3289_v4, %v3246_v56  ;;  %v3293_v37 = vadd.f32 %v3284_v59, %v3245_v55 }
0x1e5b   :  { %v3298_v2 = vmax.f32 %v3294_v62, 0.0  ;;  %v3297_v60 = vmax.f32 %v3293_v37, 0.0  ;;  %3813 = vmatprep.subr.bf16.mxu1 %v3304_v52 }
0x1e5c   :  { %3814 = vmatpush3.bf16.msra.mxu1 %v3304_v52 }
0x1e5d   :  { %v3305_v43 = vpack.c.bf16 %v3298_v2, %v3297_v60 }
0x1e5f   :  { %3815 = vmatprep.subr.bf16.mxu1 %v3305_v43 }
0x1e60   :  { %3816 = vmatpush3.bf16.msra.mxu1 %v3305_v43 }
0x1e63   :  { %3818 = vmatmul.mubr.msk.bf16.vlgmr.msra.gmra.mrb[16].mxu1 %vm2134_vm0, %v4075_v58 }
0x1f36   :  { %v5314_v39 = vpop.f32.mrb[16].mxu1 }
0x1f37   :  { %v3373_v16 = vmul.f32 %v5314_v39, %v4925_v0  ;;  %v5318_v41 = vpop.f32.mrb[17].mxu1 }
0x1f38   :  { %v5320_v8 = vpop.f32.mrb[18].mxu1  ;;  %v3371_v46 = vmul.f32 %v4925_v0, %v5318_v41 }
0x1f39   :  { %3379 = vadd.xlane.f32.xlu0 %v3373_v16  ;;  %v5322_v9 = vpop.f32.mrb[19].mxu1  ;;  %v3374_v45 = vmul.f32 %v5320_v8, %v4925_v0  ;;  %v3385_v18 = vmul.f32 %v5314_v39, %v3373_v16 }
0x1f3a   :  { %v3372_v5 = vmul.f32 %v4925_v0, %v5322_v9  ;;  %v3383_v36 = vmul.f32 %v3371_v46, %v5318_v41 }
0x1f3b   :  { %v3386_v30 = vmul.f32 %v5320_v8, %v3374_v45 }
0x1f3c   :  { %3377 = vadd.xlane.f32.xlu1 %v3372_v5  ;;  %v3384_v22 = vmul.f32 %v3372_v5, %v5322_v9 }
0x1f3d   :  { %3375 = vadd.xlane.f32.xlu0 %v3371_v46  ;;  %v4316_v46 = vmov 13  }
0x1f40   :  { %3381 = vadd.xlane.f32.xlu1 %v3374_v45 }
0x1f41   :  { %3387 = vadd.xlane.f32.xlu0 %v3383_v36 }
0x1f44   :  { %3393 = vadd.xlane.f32.xlu1 %v3386_v30 }
0x1f45   :  { %3389 = vadd.xlane.f32.xlu0 %v3384_v22 }
0x1f49   :  { %3391 = vadd.xlane.f32.xlu0 %v3385_v18 }
0x1fc6   :  { %v3380_v15 = vpop.xlane.xlu0 %3379 }
0x1fc7   :  { %v3397_v10 = vmul.f32 %v4975_v51, %v3380_v15 }
0x1fc9   :  { %v3378_v17 = vpop.xlane.xlu1 %3377  ;;  %v3405_v3 = vmul.f32 %v3397_v10, %v3397_v10 }
0x1fca   :  { %v3376_v21 = vpop.xlane.xlu0 %3375  ;;  %v3396_v48 = vmul.f32 %v4975_v51, %v3378_v17 }
0x1fcb   :  { %v3395_v0 = vmul.f32 %v4975_v51, %v3376_v21 }
0x1fcc   :  { %v3404_v40 = vmul.f32 %v3396_v48, %v3396_v48 }
0x1fcd   :  { %v3382_v12 = vpop.xlane.xlu1 %3381  ;;  %v3403_v1 = vmul.f32 %v3395_v0, %v3395_v0 }
0x1fce   :  { %v3388_v13 = vpop.xlane.xlu0 %3387  ;;  %v3398_v29 = vmul.f32 %v4975_v51, %v3382_v12 }
0x1fcf   :  { %v3399_v14 = vmul.f32 %v4975_v51, %v3388_v13  ;;  %v4076_v13 = vld [vmem:[#allocation9 + $0x50] sm:$0xff]  }
0x1fd0   :  { %v3406_v44 = vmul.f32 %v3398_v29, %v3398_v29  ;;  %3825 = vmatprep.mubr.msk.bf16.mxu1 %vm2134_vm0, %v4076_v13 }
0x1fd1   :  { %v3407_v19 = vsub.f32 %v3399_v14, %v3403_v1  ;;  %v3394_v61 = vpop.xlane.xlu1 %3393 }
0x1fd2   :  { %v3390_v23 = vpop.xlane.xlu0 %3389  ;;  %v3402_v11 = vmul.f32 %v4975_v51, %v3394_v61 }
0x1fd3   :  { %v3411_v26 = vmax.f32 %v3407_v19, 0.0  ;;  %v3400_v27 = vmul.f32 %v4975_v51, %v3390_v23 }
0x1fd4   :  { %v3410_v54 = vsub.f32 %v3402_v11, %v3406_v44 }
0x1fd5   :  { %v3415_v47 = vadd.f32 1e-05, %v3411_v26  ;;  %v3408_v24 = vsub.f32 %v3400_v27, %v3404_v40 }
0x1fd6   :  { %v3392_v53 = vpop.xlane.xlu0 %3391  ;;  %v3414_v33 = vmax.f32 %v3410_v54, 0.0 }
0x1fd7   :  { %4136 = vrsqrt.f32 %v3415_v47  ;;  %v3412_v49 = vmax.f32 %v3408_v24, 0.0  ;;  %v3401_v55 = vmul.f32 %v4975_v51, %v3392_v53 }
0x1fd8   :  { %v3418_v52 = vadd.f32 1e-05, %v3414_v33 }
0x1fd9   :  { %v3409_v56 = vsub.f32 %v3401_v55, %v3405_v3  ;;  %v3416_v35 = vadd.f32 1e-05, %v3412_v49 }
0x1fdb   :  { %v3413_v4 = vmax.f32 %v3409_v56, 0.0  ;;  %4138 = vrsqrt.f32 %v3416_v35 }
0x1fdd   :  { %v3417_v59 = vadd.f32 1e-05, %v3413_v4 }
0x1fdf   :  { %4140 = vrsqrt.f32 %v3417_v59 }
0x1fe0   :  { %4142 = vrsqrt.f32 %v3418_v52 }
0x1fe1   :  { %v4137_v62 = vpop.eup %4136 }
0x1fe2   :  { %v3423_v37 = vmul.f32 %v5222_v42, %v4137_v62 }
0x1fe4   :  { %v3451_v2 = vmul.f32 %v3423_v37, %v3395_v0 }
0x1fe5   :  { %v4139_v60 = vpop.eup %4138 }
0x1fe6   :  { %3459 = vrot.lane.b32.xlu0 %v3451_v2, %s4303_s0  ;;  %v3424_v16 = vmul.f32 %v5225_v32, %v4139_v60 }
0x1fe8   :  { %v3452_v45 = vmul.f32 %v3424_v16, %v3396_v48 }
0x1fe9   :  { %v4141_v43 = vpop.eup %4140 }
0x1fea   :  { %3429 = vperm.xlu0 %4050, %v3423_v37   ;;  %v3425_v51 = vmul.f32 %v5228_v20, %v4141_v43  ;;  %v4143_v5 = vpop.eup %4142 }
0x1feb   :  { %v3426_v36 = vmul.f32 %v5231_v50, %v4143_v5 }
0x1fec   :  { %v3453_v58 = vmul.f32 %v3425_v51, %v3397_v10 }
0x1fed   :  { %v3454_v30 = vmul.f32 %v3426_v36, %v3398_v29 }
0x1fee   :  { %3463 = vrot.lane.b32.xlu1 %v3453_v58, %s4303_s0  ;;  %4053 = vset.pattern.permute.xlu0 %v4316_v46 }
0x1ff2   :  { %3461 = vrot.lane.b32.xlu1 %v3452_v45, %s4303_s0 }
0x1ff6   :  { %3465 = vrot.lane.b32.xlu1 %v3454_v30, %s4303_s0 }
0x1ffa   :  { %3434 = vperm.xlu1 %4051, %v3424_v16  }
0x1ffe   :  { %3439 = vperm.xlu1 %4051, %v3425_v51  }
0x2002   :  { %3444 = vperm.xlu1 %4051, %v3426_v36  }
0x2006   :  { %4052 = vset.pattern.permute.xlu1 %v4316_v46 }
0x2058   :  { %v3460_v22 = vpop.permute.xlu0 %3459 }
0x2059   :  { %v3471_v18 = vsub.f32 %v5222_v42, %v3460_v22 }
0x205b   :  { %3477 = vperm.xlu1 %4052, %v3471_v18  }
0x2060   :  { %v3464_v34 = vpop.permute.xlu1 %3463 }
0x2061   :  { %v3473_v0 = vsub.f32 %v5228_v20, %v3464_v34 }
0x2064   :  { %v3462_v15 = vpop.permute.xlu1 %3461 }
0x2065   :  { %v3472_v17 = vsub.f32 %v5225_v32, %v3462_v15 }
0x2067   :  { %3482 = vperm.xlu0 %4053, %v3472_v17  }
0x2068   :  { %v3466_v21 = vpop.permute.xlu1 %3465 }
0x2069   :  { %v3474_v12 = vsub.f32 %v5231_v50, %v3466_v21  ;;  %v3430_v42 = vpop.permute.xlu0 %3429 }
0x206a   :  { %v3447_v19 = vmul.f32 %v3430_v42, %v5318_v41 }
0x206b   :  { %3487 = vperm.xlu0 %4053, %v3473_v0   ;;  %3492 = vperm.xlu1 %4052, %v3474_v12  }
0x2079   :  { %v3435_v48 = vpop.permute.xlu1 %3434 }
0x207a   :  { %v3448_v32 = vmul.f32 %v3435_v48, %v5322_v9 }
0x207d   :  { %v3440_v1 = vpop.permute.xlu1 %3439 }
0x207e   :  { %v3449_v23 = vmul.f32 %v5314_v39, %v3440_v1 }
0x2081   :  { %v3445_v14 = vpop.permute.xlu1 %3444 }
0x2082   :  { %v3450_v40 = vmul.f32 %v5320_v8, %v3445_v14 }
0x20da   :  { %v3478_v29 = vpop.permute.xlu1 %3477 }
0x20db   :  { %v3495_v61 = vadd.f32 %v3478_v29, %v3447_v19 }
0x20dd   :  { %v3499_v20 = vadd.f32 %v3495_v61, %v3091_v57 }
0x20df   :  { %v3503_v44 = vmax.f32 %v3499_v20, 0.0 }
0x20e6   :  { %v3483_v10 = vpop.permute.xlu0 %3482 }
0x20e7   :  { %v3496_v50 = vadd.f32 %v3483_v10, %v3448_v32 }
0x20e9   :  { %v3500_v26 = vadd.f32 %v3496_v50, %v3092_v38 }
0x20ea   :  { %v3493_v11 = vpop.permute.xlu1 %3492  ;;  %v3488_v27 = vpop.permute.xlu0 %3487 }
0x20eb   :  { %v3504_v47 = vmax.f32 %v3500_v26, 0.0  ;;  %v3498_v41 = vadd.f32 %v3493_v11, %v3450_v40  ;;  %v3497_v24 = vadd.f32 %v3488_v27, %v3449_v23 }
0x20ed   :  { %v3502_v9 = vadd.f32 %v3498_v41, %v3094_v7  ;;  %v3501_v63 = vadd.f32 %v3497_v24, %v3093_v31  ;;  %v3512_v57 = vpack.c.bf16 %v3504_v47, %v3503_v44 }
0x20ef   :  { %v3506_v3 = vmax.f32 %v3502_v9, 0.0  ;;  %v3505_v39 = vmax.f32 %v3501_v63, 0.0  ;;  %3821 = vmatprep.subr.bf16.mxu1 %v3512_v57 }
0x20f0   :  { %3822 = vmatpush3.bf16.msra.mxu1 %v3512_v57 }
0x20f1   :  { %v3513_v8 = vpack.c.bf16 %v3506_v3, %v3505_v39 }
0x20f3   :  { %3823 = vmatprep.subr.bf16.mxu1 %v3513_v8 }
0x20f4   :  { %3824 = vmatpush3.bf16.msra.mxu1 %v3513_v8 }
0x20f7   :  { %3826 = vmatmul.mubr.msk.bf16.vlgmr.msra.gmra.mrb[20].mxu1 %vm2134_vm0, %v4077_v6 }
0x21ca   :  { %v3827_v38 = vpop.f32.mrb[20].mxu1 }
0x21cb   :  { %v3564_v53 = vpop.f32.mrb[21].mxu1 }
0x21cc   :  { %3576 = vst [vmem:[#allocation12] sm:$0x1] %v3564_v53  ;;  %v3828_v54 = vpop.f32.mrb[22].mxu1 }
0x21cd   :  { %v3567_v28 = vpop.f32.mrb[23].mxu1 }
0x21ce PF:  { %s4317_s23 = smov [#allocation12]  }
0x21cf   :  { %s3583_s24 = sshll.u32 %s4317_s23, 4  ;;  %s3584_s24 = int_to_ptr.vmem [resolvable:$true] %s3583_s24 }
0x21d0   :  { %s4236_s25 = scalar_lea.vmem %s3584_s24, 16  ;;  %s4240_s26 = scalar_lea.vmem %s3584_s24, 32 }
0x21d1   :  { %p4237_p6 = scmp.ne.s32.totalorder %s3584_s24, %s4236_s25  ;;  %p4241_p7 = scmp.lt.s32.totalorder %s3584_s24, %s3584_s24 }
0x21d2   :  { %p4242_p8 = scmp.lt.s32.totalorder %s4240_s26, %s4236_s25 }
0x21d4   :  { %p4243_p9 = por %p4242_p8, %p4241_p7 }
0x21d6   :  { %p4244_p10 = pnand %p4243_p9, %p4237_p6 }
0x21d8   :  { %4247 = shalt.err (!%p4244_p10)
}
0x21d9   :  { %s4248_s1 = scalar_lea.hbm %s5385_s5, 16 }
0x21da   :  { %p4249_p11 = scmp.ne.s32.totalorder %s5385_s5, %s4248_s1  ;;  %p4252_p12 = scmp.lt.u32.totalorder %s4248_s1, %s5385_s5 }
0x21dc   :  { %p4254_p13 = pnand %p4252_p12, %p4249_p11 }
0x21de   :  { %4257 = shalt.err (!%p4254_p13)
}
0x21df   :  { %3586 = dma.vmem_to_hbm [thread:$0]  %s3584_s24, 16, %s5385_s5, [#allocation6]  }
0x21e0   :  { %4264 = dma.done.wait [#allocation6], 16  }
0x21e1   :  { %4265 = vsyncadd [#allocation6], 4294967280 }
0x21e2   :  { %3590 = vsyncpa [#allocation5], 1 }
0x21e3   :  { %3591 = vsyncpa [#allocation8], 1 }
0x21e4   :  { %3592 = vsyncpa [#allocation11], 1 }
0x21e5   :  { %3593 = vsyncpa [#allocation6], 1 }

</bundles_post_ra>
